<compile_context>
chip_gen: v7x
topology: tpu7x:2x2x1
jax: 0.10.0
libtpu: 0.0.40
codegen_flags: <defaults>
</compile_context>

<pallas_src>
import functools

import jax
import jax.numpy as jnp
from jax import lax
from jax.experimental import pallas as pl
from jax.experimental.pallas import tpu as pltpu


def _crop_res_block_kernel(x_ref, w1_ref, b1_ref, w2_ref, b2_ref,
                           wd_ref, bd_ref, o_ref, p1_ref, p2_ref,
                           *, has_downsample):
    # x_ref : (1, H, W, Cin) f32          o_ref : (1, Cout, (H-4)*(W-4)) f32
    # w1_ref: (9*Cin, Cout)  bf16         b1_ref: (1, Cout) f32
    # w2_ref: (9*Cout, Cout) bf16         b2_ref: (1, Cout) f32
    # wd_ref: (Cin, Cout)    bf16         bd_ref: (1, Cout) f32
    # p1_ref: (H1*W1, 9*Cin)  f32 VMEM scratch  (im2col buffer for conv1)
    # p2_ref: (H2*W2, 9*Cout) f32 VMEM scratch  (im2col buffer for conv2)
    x = x_ref[0]                                   # (H, W, Cin) f32
    H, W, Cin = x.shape
    Cout = o_ref.shape[1]
    H1, W1 = H - 2, W - 2                          # after conv1 (valid 3x3)
    H2, W2 = H - 4, W - 4                          # after conv2 (valid 3x3)

    # ---- conv1: im2col into VMEM scratch, single MXU matmul, bias + ReLU ----
    for t in range(9):
        dy, dx = divmod(t, 3)
        patch = x[dy:dy + H1, dx:dx + W1, :].reshape(H1 * W1, Cin)
        p1_ref[:, t * Cin:(t + 1) * Cin] = patch
    y1 = jnp.dot(p1_ref[...].astype(jnp.bfloat16), w1_ref[...],
                 preferred_element_type=jnp.float32)           # (H1*W1, Cout)
    y1 = jnp.maximum(y1 + b1_ref[...], 0.0)                    # f32 ReLU
    y1 = y1.reshape(H1, W1, Cout)

    # ---- conv2: im2col of y1, single MXU matmul, bias ------------------------
    for t in range(9):
        dy, dx = divmod(t, 3)
        patch = y1[dy:dy + H2, dx:dx + W2, :].reshape(H2 * W2, Cout)
        p2_ref[:, t * Cout:(t + 1) * Cout] = patch
    y2 = jnp.dot(p2_ref[...].astype(jnp.bfloat16), w2_ref[...],
                 preferred_element_type=jnp.float32) + b2_ref[...]  # (H2*W2, Cout)

    # ---- identity branch: crop 2 px per side (ZeroPad2d(-2)), 1x1 conv -------
    ident = x[2:2 + H2, 2:2 + W2, :].reshape(H2 * W2, Cin)
    if has_downsample:
        ident = jnp.dot(ident.astype(jnp.bfloat16), wd_ref[...],
                        preferred_element_type=jnp.float32) + bd_ref[...]
    # else: Cin == Cout, identity passes through untouched (exact f32).

    # ---- residual add + ReLU (f32), store channel-major (lane-dense) ---------
    out = jnp.maximum(y2 + ident, 0.0)             # (H2*W2, Cout) f32
    o_ref[0] = out.T.astype(o_ref.dtype)           # (Cout, H2*W2)


def crop_res_block_no_norm(x_nchw, params):
    """Pallas forward.  x_nchw: (N, Cin, H, W) f32 -> (N, Cout, H-4, W-4) f32."""
    N, Cin, H, W = x_nchw.shape
    Cout = params["w1"].shape[-1]
    H1, W1 = H - 2, W - 2
    Hout, Wout = H - 4, W - 4
    has_downsample = (Cout != Cin)

    # Input layout: one NCHW->NHWC transpose remains (see TODO at top).  The
    # kernel emits channel-major output directly, so no output transpose.
    x = jnp.transpose(x_nchw, (0, 2, 3, 1))        # NCHW -> NHWC

    # Weight prep (tiny, done outside the kernel): flatten taps into the K dim
    # and cast to bf16 so the MXU runs at native rate.
    w1m = params["w1"].reshape(9 * Cin, Cout).astype(jnp.bfloat16)
    w2m = params["w2"].reshape(9 * Cout, Cout).astype(jnp.bfloat16)
    if has_downsample:
        wdm = params["wd"].astype(jnp.bfloat16)
        bd = params["bd"]
    else:                                          # unused dummies
        wdm = jnp.zeros((Cin, Cout), jnp.bfloat16)
        bd = jnp.zeros((1, Cout), jnp.float32)

    kernel = pl.pallas_call(
        functools.partial(_crop_res_block_kernel,
                          has_downsample=has_downsample),
        out_shape=jax.ShapeDtypeStruct((N, Cout, Hout * Wout), x.dtype),
        grid_spec=pltpu.PrefetchScalarGridSpec(
            num_scalar_prefetch=0,
            grid=(N,),
            in_specs=[
                pl.BlockSpec((1, H, W, Cin), lambda n: (n, 0, 0, 0)),
                pl.BlockSpec((9 * Cin, Cout), lambda n: (0, 0)),
                pl.BlockSpec((1, Cout), lambda n: (0, 0)),
                pl.BlockSpec((9 * Cout, Cout), lambda n: (0, 0)),
                pl.BlockSpec((1, Cout), lambda n: (0, 0)),
                pl.BlockSpec((Cin, Cout), lambda n: (0, 0)),
                pl.BlockSpec((1, Cout), lambda n: (0, 0)),
            ],
            out_specs=pl.BlockSpec((1, Cout, Hout * Wout),
                                   lambda n: (n, 0, 0)),
            scratch_shapes=[
                pltpu.VMEM((H1 * W1, 9 * Cin), jnp.float32),    # conv1 im2col
                pltpu.VMEM((Hout * Wout, 9 * Cout), jnp.float32),  # conv2 im2col
            ],
        ),
        compiler_params=pltpu.CompilerParams(
            dimension_semantics=("parallel",)),
    )
    out = kernel(x, w1m, params["b1"], w2m, params["b2"], wdm, bd)
    # Channel-major slab -> NCHW is a pure (free) reshape, no transpose.
    return out.reshape(N, Cout, Hout, Wout)


def _reference_forward(x_nchw, params):
    """Pure-JAX f32 reference (lax.conv) replicating the PyTorch module."""
    x = jnp.transpose(x_nchw, (0, 2, 3, 1))
    dn = ("NHWC", "HWIO", "NHWC")
    y = lax.conv_general_dilated(x, params["w1"], (1, 1), "VALID",
                                 dimension_numbers=dn) + params["b1"]
    y = jax.nn.relu(y)
    y = lax.conv_general_dilated(y, params["w2"], (1, 1), "VALID",
                                 dimension_numbers=dn) + params["b2"]
    ident = x[:, 2:-2, 2:-2, :]
    ident = lax.conv_general_dilated(ident, params["wd"][None, None],
                                     (1, 1), "VALID",
                                     dimension_numbers=dn) + params["bd"]
    out = jax.nn.relu(y + ident)
    return jnp.transpose(out, (0, 3, 1, 2))


def init_params(key, in_channels, out_channels):
    """Deterministic synthetic parameters (HWIO weight layout)."""
    k1, k2, k3, k4, k5, k6 = jax.random.split(key, 6)
    s = 0.1
    return {
        "w1": s * jax.random.normal(k1, (3, 3, in_channels, out_channels),
                                    jnp.float32),
        "b1": s * jax.random.normal(k2, (1, out_channels), jnp.float32),
        "w2": s * jax.random.normal(k3, (3, 3, out_channels, out_channels),
                                    jnp.float32),
        "b2": s * jax.random.normal(k4, (1, out_channels), jnp.float32),
        "wd": s * jax.random.normal(k5, (in_channels, out_channels),
                                    jnp.float32),
        "bd": s * jax.random.normal(k6, (1, out_channels), jnp.float32),
    }


if __name__ == "__main__":
    key = jax.random.PRNGKey(0)
    kx, kp = jax.random.split(key)

    N, Cin, H, W = 2, 4, 16, 16
    Cout = 8  # != Cin -> downsample branch is active

    x = jax.random.normal(kx, (N, Cin, H, W), jnp.float32)
    params = init_params(kp, Cin, Cout)

    out = crop_res_block_no_norm(x, params)
    out = jax.block_until_ready(out)

    ref = _reference_forward(x, params)
    assert out.shape == (N, Cout, H - 4, W - 4), out.shape
    # bf16 MXU operands (f32 accumulation) -> loosened tolerance vs f32 ref.
    assert jnp.allclose(out, ref, atol=5e-2, rtol=5e-2), (
        float(jnp.max(jnp.abs(out - ref))))

    print("KERNEL_OK")
</pallas_src>

<mosaic_0001>
module attributes {stable_mosaic.version = 11 : i64} {
  func.func @_crop_res_block_kernel(%arg0: i32, %arg1: memref<1x16x16x4xf32, #tpu.memory_space<vmem>>, %arg2: memref<36x8xbf16, #tpu.memory_space<vmem>>, %arg3: memref<1x8xf32, #tpu.memory_space<vmem>>, %arg4: memref<72x8xbf16, #tpu.memory_space<vmem>>, %arg5: memref<1x8xf32, #tpu.memory_space<vmem>>, %arg6: memref<4x8xbf16, #tpu.memory_space<vmem>>, %arg7: memref<1x8xf32, #tpu.memory_space<vmem>>, %arg8: memref<1x8x144xf32, #tpu.memory_space<vmem>>, %arg9: memref<196x36xf32, #tpu.memory_space<vmem>>, %arg10: memref<144x72xf32, #tpu.memory_space<vmem>>) attributes {dimension_semantics = [#tpu.dimension_semantics<parallel>], iteration_bounds = array<i64: 2>, scalar_prefetch = 0 : i64, scratch_operands = 2 : i64, tpu.core_type = #tpu.core_type<tc>, window_params = [{transform_indices = @transform_0, window_bounds = array<i64: 1, 16, 16, 4>}, {pipeline_mode = #tpu.pipeline_mode<synchronous>, transform_indices = @transform_1, window_bounds = array<i64: 36, 8>}, {pipeline_mode = #tpu.pipeline_mode<synchronous>, transform_indices = @transform_2, window_bounds = array<i64: 1, 8>}, {pipeline_mode = #tpu.pipeline_mode<synchronous>, transform_indices = @transform_3, window_bounds = array<i64: 72, 8>}, {pipeline_mode = #tpu.pipeline_mode<synchronous>, transform_indices = @transform_4, window_bounds = array<i64: 1, 8>}, {pipeline_mode = #tpu.pipeline_mode<synchronous>, transform_indices = @transform_5, window_bounds = array<i64: 4, 8>}, {pipeline_mode = #tpu.pipeline_mode<synchronous>, transform_indices = @transform_6, window_bounds = array<i64: 1, 8>}, {transform_indices = @transform_7, window_bounds = array<i64: 1, 8, 144>}]} {
    %c0 = arith.constant 0 : index
    %c0_0 = arith.constant 0 : index
    %c0_1 = arith.constant 0 : index
    %c0_2 = arith.constant 0 : index
    %0 = vector.load %arg1[%c0, %c0_0, %c0_1, %c0_2] : memref<1x16x16x4xf32, #tpu.memory_space<vmem>>, vector<1x16x16x4xf32>
    %1 = vector.shape_cast %0 : vector<1x16x16x4xf32> to vector<16x16x4xf32>
    %2 = vector.extract_strided_slice %1 {offsets = [0, 0, 0], sizes = [14, 14, 4], strides = [1, 1, 1]} : vector<16x16x4xf32> to vector<14x14x4xf32>
    %3 = vector.shape_cast %2 : vector<14x14x4xf32> to vector<196x4xf32>
    %c0_3 = arith.constant 0 : index
    %c0_4 = arith.constant 0 : index
    %4 = vector.load %arg9[%c0_3, %c0_4] : memref<196x36xf32, #tpu.memory_space<vmem>>, vector<196x4xf32>
    tpu.vector_store %arg9[%c0_3, %c0_4], %3 {strides = array<i32>} : memref<196x36xf32, #tpu.memory_space<vmem>>, vector<196x4xf32>,
    %5 = vector.extract_strided_slice %1 {offsets = [0, 1, 0], sizes = [14, 14, 4], strides = [1, 1, 1]} : vector<16x16x4xf32> to vector<14x14x4xf32>
    %6 = vector.shape_cast %5 : vector<14x14x4xf32> to vector<196x4xf32>
    %c0_5 = arith.constant 0 : index
    %c4 = arith.constant 4 : index
    %7 = vector.load %arg9[%c0_5, %c4] : memref<196x36xf32, #tpu.memory_space<vmem>>, vector<196x4xf32>
    tpu.vector_store %arg9[%c0_5, %c4], %6 {strides = array<i32>} : memref<196x36xf32, #tpu.memory_space<vmem>>, vector<196x4xf32>,
    %8 = vector.extract_strided_slice %1 {offsets = [0, 2, 0], sizes = [14, 14, 4], strides = [1, 1, 1]} : vector<16x16x4xf32> to vector<14x14x4xf32>
    %9 = vector.shape_cast %8 : vector<14x14x4xf32> to vector<196x4xf32>
    %c0_6 = arith.constant 0 : index
    %c8 = arith.constant 8 : index
    %10 = vector.load %arg9[%c0_6, %c8] : memref<196x36xf32, #tpu.memory_space<vmem>>, vector<196x4xf32>
    tpu.vector_store %arg9[%c0_6, %c8], %9 {strides = array<i32>} : memref<196x36xf32, #tpu.memory_space<vmem>>, vector<196x4xf32>,
    %11 = vector.extract_strided_slice %1 {offsets = [1, 0, 0], sizes = [14, 14, 4], strides = [1, 1, 1]} : vector<16x16x4xf32> to vector<14x14x4xf32>
    %12 = vector.shape_cast %11 : vector<14x14x4xf32> to vector<196x4xf32>
    %c0_7 = arith.constant 0 : index
    %c12 = arith.constant 12 : index
    %13 = vector.load %arg9[%c0_7, %c12] : memref<196x36xf32, #tpu.memory_space<vmem>>, vector<196x4xf32>
    tpu.vector_store %arg9[%c0_7, %c12], %12 {strides = array<i32>} : memref<196x36xf32, #tpu.memory_space<vmem>>, vector<196x4xf32>,
    %14 = vector.extract_strided_slice %1 {offsets = [1, 1, 0], sizes = [14, 14, 4], strides = [1, 1, 1]} : vector<16x16x4xf32> to vector<14x14x4xf32>
    %15 = vector.shape_cast %14 : vector<14x14x4xf32> to vector<196x4xf32>
    %c0_8 = arith.constant 0 : index
    %c16 = arith.constant 16 : index
    %16 = vector.load %arg9[%c0_8, %c16] : memref<196x36xf32, #tpu.memory_space<vmem>>, vector<196x4xf32>
    tpu.vector_store %arg9[%c0_8, %c16], %15 {strides = array<i32>} : memref<196x36xf32, #tpu.memory_space<vmem>>, vector<196x4xf32>,
    %17 = vector.extract_strided_slice %1 {offsets = [1, 2, 0], sizes = [14, 14, 4], strides = [1, 1, 1]} : vector<16x16x4xf32> to vector<14x14x4xf32>
    %18 = vector.shape_cast %17 : vector<14x14x4xf32> to vector<196x4xf32>
    %c0_9 = arith.constant 0 : index
    %c20 = arith.constant 20 : index
    %19 = vector.load %arg9[%c0_9, %c20] : memref<196x36xf32, #tpu.memory_space<vmem>>, vector<196x4xf32>
    tpu.vector_store %arg9[%c0_9, %c20], %18 {strides = array<i32>} : memref<196x36xf32, #tpu.memory_space<vmem>>, vector<196x4xf32>,
    %20 = vector.extract_strided_slice %1 {offsets = [2, 0, 0], sizes = [14, 14, 4], strides = [1, 1, 1]} : vector<16x16x4xf32> to vector<14x14x4xf32>
    %21 = vector.shape_cast %20 : vector<14x14x4xf32> to vector<196x4xf32>
    %c0_10 = arith.constant 0 : index
    %c24 = arith.constant 24 : index
    %22 = vector.load %arg9[%c0_10, %c24] : memref<196x36xf32, #tpu.memory_space<vmem>>, vector<196x4xf32>
    tpu.vector_store %arg9[%c0_10, %c24], %21 {strides = array<i32>} : memref<196x36xf32, #tpu.memory_space<vmem>>, vector<196x4xf32>,
    %23 = vector.extract_strided_slice %1 {offsets = [2, 1, 0], sizes = [14, 14, 4], strides = [1, 1, 1]} : vector<16x16x4xf32> to vector<14x14x4xf32>
    %24 = vector.shape_cast %23 : vector<14x14x4xf32> to vector<196x4xf32>
    %c0_11 = arith.constant 0 : index
    %c28 = arith.constant 28 : index
    %25 = vector.load %arg9[%c0_11, %c28] : memref<196x36xf32, #tpu.memory_space<vmem>>, vector<196x4xf32>
    tpu.vector_store %arg9[%c0_11, %c28], %24 {strides = array<i32>} : memref<196x36xf32, #tpu.memory_space<vmem>>, vector<196x4xf32>,
    %26 = vector.extract_strided_slice %1 {offsets = [2, 2, 0], sizes = [14, 14, 4], strides = [1, 1, 1]} : vector<16x16x4xf32> to vector<14x14x4xf32>
    %27 = vector.shape_cast %26 : vector<14x14x4xf32> to vector<196x4xf32>
    %c0_12 = arith.constant 0 : index
    %c32 = arith.constant 32 : index
    %28 = vector.load %arg9[%c0_12, %c32] : memref<196x36xf32, #tpu.memory_space<vmem>>, vector<196x4xf32>
    tpu.vector_store %arg9[%c0_12, %c32], %27 {strides = array<i32>} : memref<196x36xf32, #tpu.memory_space<vmem>>, vector<196x4xf32>,
    %c0_13 = arith.constant 0 : index
    %c0_14 = arith.constant 0 : index
    %29 = vector.load %arg9[%c0_13, %c0_14] : memref<196x36xf32, #tpu.memory_space<vmem>>, vector<196x36xf32>
    %30 = arith.truncf %29 : vector<196x36xf32> to vector<196x36xbf16>
    %c0_15 = arith.constant 0 : index
    %c0_16 = arith.constant 0 : index
    %31 = vector.load %arg2[%c0_15, %c0_16] : memref<36x8xbf16, #tpu.memory_space<vmem>>, vector<36x8xbf16>
    %cst = arith.constant dense<0.000000e+00> : vector<196x8xf32>
    %32 = tpu.matmul %30, %31, %cst {dimension_numbers = #tpu.dot_dimension_numbers<[1], [0], [0], [1], [0, 0, 1, 1], [], []>} : vector<196x36xbf16>, vector<36x8xbf16>, vector<196x8xf32> -> vector<196x8xf32>
    %c0_17 = arith.constant 0 : index
    %c0_18 = arith.constant 0 : index
    %33 = vector.load %arg3[%c0_17, %c0_18] : memref<1x8xf32, #tpu.memory_space<vmem>>, vector<1x8xf32>
    %34 = vector.broadcast %33 : vector<1x8xf32> to vector<196x8xf32>
    %35 = arith.addf %32, %34 : vector<196x8xf32>
    %cst_19 = arith.constant 0.000000e+00 : f32
    %36 = vector.broadcast %cst_19 : f32 to vector<196x8xf32>
    %37 = arith.maximumf %35, %36 : vector<196x8xf32>
    %38 = vector.shape_cast %37 : vector<196x8xf32> to vector<14x14x8xf32>
    %39 = vector.extract_strided_slice %38 {offsets = [0, 0, 0], sizes = [12, 12, 8], strides = [1, 1, 1]} : vector<14x14x8xf32> to vector<12x12x8xf32>
    %40 = vector.shape_cast %39 : vector<12x12x8xf32> to vector<144x8xf32>
    %c0_20 = arith.constant 0 : index
    %c0_21 = arith.constant 0 : index
    %41 = vector.load %arg10[%c0_20, %c0_21] : memref<144x72xf32, #tpu.memory_space<vmem>>, vector<144x8xf32>
    tpu.vector_store %arg10[%c0_20, %c0_21], %40 {strides = array<i32>} : memref<144x72xf32, #tpu.memory_space<vmem>>, vector<144x8xf32>,
    %42 = vector.extract_strided_slice %38 {offsets = [0, 1, 0], sizes = [12, 12, 8], strides = [1, 1, 1]} : vector<14x14x8xf32> to vector<12x12x8xf32>
    %43 = vector.shape_cast %42 : vector<12x12x8xf32> to vector<144x8xf32>
    %c0_22 = arith.constant 0 : index
    %c8_23 = arith.constant 8 : index
    %44 = vector.load %arg10[%c0_22, %c8_23] : memref<144x72xf32, #tpu.memory_space<vmem>>, vector<144x8xf32>
    tpu.vector_store %arg10[%c0_22, %c8_23], %43 {strides = array<i32>} : memref<144x72xf32, #tpu.memory_space<vmem>>, vector<144x8xf32>,
    %45 = vector.extract_strided_slice %38 {offsets = [0, 2, 0], sizes = [12, 12, 8], strides = [1, 1, 1]} : vector<14x14x8xf32> to vector<12x12x8xf32>
    %46 = vector.shape_cast %45 : vector<12x12x8xf32> to vector<144x8xf32>
    %c0_24 = arith.constant 0 : index
    %c16_25 = arith.constant 16 : index
    %47 = vector.load %arg10[%c0_24, %c16_25] : memref<144x72xf32, #tpu.memory_space<vmem>>, vector<144x8xf32>
    tpu.vector_store %arg10[%c0_24, %c16_25], %46 {strides = array<i32>} : memref<144x72xf32, #tpu.memory_space<vmem>>, vector<144x8xf32>,
    %48 = vector.extract_strided_slice %38 {offsets = [1, 0, 0], sizes = [12, 12, 8], strides = [1, 1, 1]} : vector<14x14x8xf32> to vector<12x12x8xf32>
    %49 = vector.shape_cast %48 : vector<12x12x8xf32> to vector<144x8xf32>
    %c0_26 = arith.constant 0 : index
    %c24_27 = arith.constant 24 : index
    %50 = vector.load %arg10[%c0_26, %c24_27] : memref<144x72xf32, #tpu.memory_space<vmem>>, vector<144x8xf32>
    tpu.vector_store %arg10[%c0_26, %c24_27], %49 {strides = array<i32>} : memref<144x72xf32, #tpu.memory_space<vmem>>, vector<144x8xf32>,
    %51 = vector.extract_strided_slice %38 {offsets = [1, 1, 0], sizes = [12, 12, 8], strides = [1, 1, 1]} : vector<14x14x8xf32> to vector<12x12x8xf32>
    %52 = vector.shape_cast %51 : vector<12x12x8xf32> to vector<144x8xf32>
    %c0_28 = arith.constant 0 : index
    %c32_29 = arith.constant 32 : index
    %53 = vector.load %arg10[%c0_28, %c32_29] : memref<144x72xf32, #tpu.memory_space<vmem>>, vector<144x8xf32>
    tpu.vector_store %arg10[%c0_28, %c32_29], %52 {strides = array<i32>} : memref<144x72xf32, #tpu.memory_space<vmem>>, vector<144x8xf32>,
    %54 = vector.extract_strided_slice %38 {offsets = [1, 2, 0], sizes = [12, 12, 8], strides = [1, 1, 1]} : vector<14x14x8xf32> to vector<12x12x8xf32>
    %55 = vector.shape_cast %54 : vector<12x12x8xf32> to vector<144x8xf32>
    %c0_30 = arith.constant 0 : index
    %c40 = arith.constant 40 : index
    %56 = vector.load %arg10[%c0_30, %c40] : memref<144x72xf32, #tpu.memory_space<vmem>>, vector<144x8xf32>
    tpu.vector_store %arg10[%c0_30, %c40], %55 {strides = array<i32>} : memref<144x72xf32, #tpu.memory_space<vmem>>, vector<144x8xf32>,
    %57 = vector.extract_strided_slice %38 {offsets = [2, 0, 0], sizes = [12, 12, 8], strides = [1, 1, 1]} : vector<14x14x8xf32> to vector<12x12x8xf32>
    %58 = vector.shape_cast %57 : vector<12x12x8xf32> to vector<144x8xf32>
    %c0_31 = arith.constant 0 : index
    %c48 = arith.constant 48 : index
    %59 = vector.load %arg10[%c0_31, %c48] : memref<144x72xf32, #tpu.memory_space<vmem>>, vector<144x8xf32>
    tpu.vector_store %arg10[%c0_31, %c48], %58 {strides = array<i32>} : memref<144x72xf32, #tpu.memory_space<vmem>>, vector<144x8xf32>,
    %60 = vector.extract_strided_slice %38 {offsets = [2, 1, 0], sizes = [12, 12, 8], strides = [1, 1, 1]} : vector<14x14x8xf32> to vector<12x12x8xf32>
    %61 = vector.shape_cast %60 : vector<12x12x8xf32> to vector<144x8xf32>
    %c0_32 = arith.constant 0 : index
    %c56 = arith.constant 56 : index
    %62 = vector.load %arg10[%c0_32, %c56] : memref<144x72xf32, #tpu.memory_space<vmem>>, vector<144x8xf32>
    tpu.vector_store %arg10[%c0_32, %c56], %61 {strides = array<i32>} : memref<144x72xf32, #tpu.memory_space<vmem>>, vector<144x8xf32>,
    %63 = vector.extract_strided_slice %38 {offsets = [2, 2, 0], sizes = [12, 12, 8], strides = [1, 1, 1]} : vector<14x14x8xf32> to vector<12x12x8xf32>
    %64 = vector.shape_cast %63 : vector<12x12x8xf32> to vector<144x8xf32>
    %c0_33 = arith.constant 0 : index
    %c64 = arith.constant 64 : index
    %65 = vector.load %arg10[%c0_33, %c64] : memref<144x72xf32, #tpu.memory_space<vmem>>, vector<144x8xf32>
    tpu.vector_store %arg10[%c0_33, %c64], %64 {strides = array<i32>} : memref<144x72xf32, #tpu.memory_space<vmem>>, vector<144x8xf32>,
    %c0_34 = arith.constant 0 : index
    %c0_35 = arith.constant 0 : index
    %66 = vector.load %arg10[%c0_34, %c0_35] : memref<144x72xf32, #tpu.memory_space<vmem>>, vector<144x72xf32>
    %67 = arith.truncf %66 : vector<144x72xf32> to vector<144x72xbf16>
    %c0_36 = arith.constant 0 : index
    %c0_37 = arith.constant 0 : index
    %68 = vector.load %arg4[%c0_36, %c0_37] : memref<72x8xbf16, #tpu.memory_space<vmem>>, vector<72x8xbf16>
    %cst_38 = arith.constant dense<0.000000e+00> : vector<144x8xf32>
    %69 = tpu.matmul %67, %68, %cst_38 {dimension_numbers = #tpu.dot_dimension_numbers<[1], [0], [0], [1], [0, 0, 1, 1], [], []>} : vector<144x72xbf16>, vector<72x8xbf16>, vector<144x8xf32> -> vector<144x8xf32>
    %c0_39 = arith.constant 0 : index
    %c0_40 = arith.constant 0 : index
    %70 = vector.load %arg5[%c0_39, %c0_40] : memref<1x8xf32, #tpu.memory_space<vmem>>, vector<1x8xf32>
    %71 = vector.broadcast %70 : vector<1x8xf32> to vector<144x8xf32>
    %72 = arith.addf %69, %71 : vector<144x8xf32>
    %73 = vector.extract_strided_slice %1 {offsets = [2, 2, 0], sizes = [12, 12, 4], strides = [1, 1, 1]} : vector<16x16x4xf32> to vector<12x12x4xf32>
    %74 = vector.shape_cast %73 : vector<12x12x4xf32> to vector<144x4xf32>
    %75 = arith.truncf %74 : vector<144x4xf32> to vector<144x4xbf16>
    %c0_41 = arith.constant 0 : index
    %c0_42 = arith.constant 0 : index
    %76 = vector.load %arg6[%c0_41, %c0_42] : memref<4x8xbf16, #tpu.memory_space<vmem>>, vector<4x8xbf16>
    %cst_43 = arith.constant dense<0.000000e+00> : vector<144x8xf32>
    %77 = tpu.matmul %75, %76, %cst_43 {dimension_numbers = #tpu.dot_dimension_numbers<[1], [0], [0], [1], [0, 0, 1, 1], [], []>} : vector<144x4xbf16>, vector<4x8xbf16>, vector<144x8xf32> -> vector<144x8xf32>
    %c0_44 = arith.constant 0 : index
    %c0_45 = arith.constant 0 : index
    %78 = vector.load %arg7[%c0_44, %c0_45] : memref<1x8xf32, #tpu.memory_space<vmem>>, vector<1x8xf32>
    %79 = vector.broadcast %78 : vector<1x8xf32> to vector<144x8xf32>
    %80 = arith.addf %77, %79 : vector<144x8xf32>
    %81 = arith.addf %72, %80 : vector<144x8xf32>
    %cst_46 = arith.constant 0.000000e+00 : f32
    %82 = vector.broadcast %cst_46 : f32 to vector<144x8xf32>
    %83 = arith.maximumf %81, %82 : vector<144x8xf32>
    %84 = tpu.transpose %83, [1, 0] : vector<144x8xf32> -> vector<8x144xf32>
    %c0_47 = arith.constant 0 : index
    %c0_48 = arith.constant 0 : index
    %c0_49 = arith.constant 0 : index
    %85 = vector.load %arg8[%c0_47, %c0_48, %c0_49] : memref<1x8x144xf32, #tpu.memory_space<vmem>>, vector<1x8x144xf32>
    %86 = vector.shape_cast %85 : vector<1x8x144xf32> to vector<8x144xf32>
    %87 = vector.shape_cast %84 : vector<8x144xf32> to vector<1x8x144xf32>
    tpu.vector_store %arg8[%c0_47, %c0_48, %c0_49], %87 {strides = array<i32>} : memref<1x8x144xf32, #tpu.memory_space<vmem>>, vector<1x8x144xf32>,
    return
  }
  func.func @transform_0(%arg0: i32) -> (i32, i32, i32, i32) {
    %c0_i32 = arith.constant 0 : i32
    %c0_i32_0 = arith.constant 0 : i32
    %c0_i32_1 = arith.constant 0 : i32
    %c0_i32_2 = arith.constant 0 : i32
    return %arg0, %c0_i32, %c0_i32_0, %c0_i32_1 : i32, i32, i32, i32
  }
  func.func @transform_1(%arg0: i32) -> (i32, i32) {
    %c0_i32 = arith.constant 0 : i32
    %c0_i32_0 = arith.constant 0 : i32
    %c0_i32_1 = arith.constant 0 : i32
    return %c0_i32, %c0_i32_0 : i32, i32
  }
  func.func @transform_2(%arg0: i32) -> (i32, i32) {
    %c0_i32 = arith.constant 0 : i32
    %c0_i32_0 = arith.constant 0 : i32
    %c0_i32_1 = arith.constant 0 : i32
    return %c0_i32, %c0_i32_0 : i32, i32
  }
  func.func @transform_3(%arg0: i32) -> (i32, i32) {
    %c0_i32 = arith.constant 0 : i32
    %c0_i32_0 = arith.constant 0 : i32
    %c0_i32_1 = arith.constant 0 : i32
    return %c0_i32, %c0_i32_0 : i32, i32
  }
  func.func @transform_4(%arg0: i32) -> (i32, i32) {
    %c0_i32 = arith.constant 0 : i32
    %c0_i32_0 = arith.constant 0 : i32
    %c0_i32_1 = arith.constant 0 : i32
    return %c0_i32, %c0_i32_0 : i32, i32
  }
  func.func @transform_5(%arg0: i32) -> (i32, i32) {
    %c0_i32 = arith.constant 0 : i32
    %c0_i32_0 = arith.constant 0 : i32
    %c0_i32_1 = arith.constant 0 : i32
    return %c0_i32, %c0_i32_0 : i32, i32
  }
  func.func @transform_6(%arg0: i32) -> (i32, i32) {
    %c0_i32 = arith.constant 0 : i32
    %c0_i32_0 = arith.constant 0 : i32
    %c0_i32_1 = arith.constant 0 : i32
    return %c0_i32, %c0_i32_0 : i32, i32
  }
  func.func @transform_7(%arg0: i32) -> (i32, i32, i32) {
    %c0_i32 = arith.constant 0 : i32
    %c0_i32_0 = arith.constant 0 : i32
    %c0_i32_1 = arith.constant 0 : i32
    return %arg0, %c0_i32, %c0_i32_0 : i32, i32, i32
  }
}

</mosaic_0001>

<bundles_post_ra>
// kernel: tpu_custom_call.1
= control target key start
LH: loop header
LB: loop body
LE: loop exit
PB: predicated region body
PF: predicated region fallthrough
CT: control target
= control target key end

     0   :  { %12 = vsyncpa [#allocation5], 0  ;;  %s13283_s0 = inlined_call_operand.vmem [shape: f32[2,16,16,4], index: 0, kind: input, shape index: {}]   ;;  %s13284_s1 = inlined_call_operand.vmem [shape: bf16[36,8], index: 1, kind: input, shape index: {}]   ;;  %s13285_s2 = inlined_call_operand.vmem [shape: f32[1,8], index: 2, kind: input, shape index: {}]   ;;  %s13286_s3 = inlined_call_operand.vmem [shape: bf16[72,8], index: 3, kind: input, shape index: {}]   ;;  %s13287_s4 = inlined_call_operand.vmem [shape: f32[1,8], index: 4, kind: input, shape index: {}]   ;;  %s13288_s5 = inlined_call_operand.vmem [shape: bf16[4,8], index: 5, kind: input, shape index: {}]   ;;  %s13289_s6 = inlined_call_operand.vmem [shape: f32[1,8], index: 6, kind: input, shape index: {}]   ;;  %s13290_s7 = inlined_call_operand.hbm [shape: f32[2,8,144], index: 7, kind: output, shape index: {}]  }
   0x1   :  { %14 = vsyncpa [#allocation5 + $0x1], 0  ;;  %s8293_s24 = smov 0   ;;  %s8295_s25 = smov 0  }
   0x2   :  { %s8297_s26 = smov 0   ;;  %s8299_s27 = smov 0  }
   0x3 LB: > { %s8314_s28 = sadd.s32 4294967295, %s8235_s27   ;;  %s7686_s29 = sadd.s32 4294967294, %s8235_s27   ;;  %s8235_s27 = sphi %s8299_s27, %s13699_s27   ;;  %s8231_s26 = sphi %s8297_s26, %s13698_s26   ;;  %s8227_s25 = sphi %s8295_s25, %s13697_s25   ;;  %s8223_s24 = sphi %s8293_s24, %s13696_s24  }
   0x4   : > { %s8318_s30 = sadd.s32 1, %s8235_s27   ;;  %s179_s8 = sadd.s32 1, %s8231_s26 }
   0x5   : > { %s176_s9 = ssub.s32 %s8235_s27, %s8318_s30  ;;  %p189_p0 = scmp.ne.s32.totalorder %s8231_s26, %s8227_s25 }
   0x6   : > { %p177_p1 = scmp.eq.s32.totalorder %s176_s9, 0  ;;  %p190_p2 = scmp.eq.s32.totalorder %s8314_s28, 1 }
   0x7   : > { %p195_p3 = scmp.ne.s32.totalorder %s8227_s25, %s8223_s24  ;;  %p196_p4 = scmp.eq.s32.totalorder %s7686_s29, 1 }
   0x8   : > { %s8329_s10 = scalar_select %p177_p1, %s8231_s26, %s179_s8  }
   0x9   : > { %p8331_p5 = por %p190_p2, %p189_p0  ;;  %p8335_p6 = por %p196_p4, %p195_p3 }
   0xa   : > { %p7689_p7 = scmp.ge.s32.totalorder %s8235_s27, 1  ;;  %p240_p8 = scmp.lt.s32.totalorder %s8235_s27, 3 }
   0xc   : > { %p241_p9 = pnand %p7689_p7, %p240_p8 }
   0xe   : > { %244 = sbr.rel (%p241_p9) target bundleno = 1396 (0x574), region = 48 }
  0x15   : > { %p272_p10 = scmp.lt.s32.totalorder %s8314_s28, 1  ;;  %v342_v0 = vlaneseq  ;;  %v8237_v1 = vmov 1983009808   ;;  %vm1282_vm0 = vcmask 1040384   ;;  %vm1283_vm1 = vcmask 1042434   ;;  %s8238_s18 = smov 8  }
  0x16   : > { %v340_v2 = vunpack.c.l.s4 %v8237_v1  ;;  %vm1285_vm2 = vcmask 1044484   ;;  %vm8448_vm3 = vmor %vm1282_vm0, %vm1283_vm1  ;;  %s8239_s19 = smov 12   ;;  %vm1287_vm5 = vcmask 1046534   ;;  %s8240_s20 = smov 20   ;;  %vm1241_vm7 = vcmask 31744  }
  0x17   : > { %s273_s13 = scalar_select %p272_p10, %s8314_s28, 1  ;;  %v343_v3 = vshrl.u32 %v342_v0, 7  ;;  %vm1286_vm4 = vmor %vm8448_vm3, %vm1285_vm2  ;;  %vm4374_vm8 = vcmask 1041408   ;;  %vm8247_vm9 = vmmov 0   ;;  %vm2088_vm10 = vcmask 64544  }
  0x18   : > { %v341_v4 = vunpack.c.0.s8 %v340_v2  ;;  %vm8499_vm6 = vmor %vm1286_vm4, %vm1287_vm5  ;;  %s8241_s21 = smov 24   ;;  %s8242_s22 = smov 4   ;;  %vm2606_vm11 = vcmask 97344   ;;  %vm2903_vm12 = vcmask 130144   ;;  %vm3444_vm13 = vcmask 162944  }
  0x19   : > { %s7797_s14 = sshll.u32 %s273_s13, 8  ;;  %s8243_s23 = smov 16   ;;  %vm3688_vm14 = vcmask 195744   ;;  %vm3889_vm15 = vcmask 228544   ;;  %vm4094_vm0 = vcmask 261344   ;;  %vm4242_vm1 = vcmask 294144  }
  0x1a   : > { %s8346_s17 = scalar_lea.vmem %s13283_s0, %s7797_s14  ;;  %v8348_v5 = vsub.s32 %v341_v4, %v343_v3  ;;  %s8244_s29 = smov 28   ;;  %vm4334_vm2 = vcmask 293888   ;;  %vm1266_vm3 = vcmask 27648   ;;  %vm5304_vm4 = vcmask 64512  }
  0x1b   : > { %v279_v6 = vld [vmem:[%s8346_s17 + $0x8] sm:$0xff]  ;;  %v280_v7 = vld [vmem:[%s8346_s17 + $0x10] sm:$0xff]  ;;  %v281_v8 = vld [vmem:[%s8346_s17 + $0x18] sm:$0xff]  ;;  %s8245_s8 = smov 32   ;;  %vm2113_vm5 = vcmask 60448   ;;  %s8250_s15 = smov 64  }
  0x1c   : > { %v355_v9 = vcombine.high %v279_v6, %v279_v6  ;;  %v8354_v10 = vrot.slane %v279_v6, %v8348_v5  ;;  %v8357_v11 = vrot.slane %v280_v7, %v8348_v5  ;;  %v371_v12 = vcombine.high %v280_v7, %v280_v7  ;;  %v282_v13 = vld [vmem:[%s8346_s17 + $0x20] sm:$0xff]  ;;  %v283_v41 = vld [vmem:[%s8346_s17 + $0x28] sm:$0xff]  ;;  %v8444_v50 = vld [vmem:[%s8346_s17 + $0x30] sm:$0xff]  ;;  %s8251_s16 = smov 56  }
  0x1d   : > { %v388_v14 = vcombine.high %v281_v8, %v281_v8  ;;  %v8361_v15 = vrot.slane %v281_v8, %v8348_v5  ;;  %v8364_v16 = vrot.slane %v282_v13, %v8348_v5  ;;  %v8366_v17 = vcombine.high %v282_v13, %v282_v13 }
  0x1e   : > { %v8369_v18 = vrot.slane %v355_v9, %v8348_v5  ;;  %v8373_v19 = vcombine.high %v8354_v10, %v8354_v10  ;;  %v8376_v20 = vrot.slane %v371_v12, %v8348_v5  ;;  %v8380_v21 = vcombine.high %v8357_v11, %v8357_v11  ;;  %v278_v12 = vld [vmem:[%s8346_s17] sm:$0xff] }
  0x1f   : > { %13409 = vst [vmem:[#allocation7_spill] sm:$0xff] %v8366_v17  ;;  %v8383_v22 = vrot.slane %v388_v14, %v8348_v5  ;;  %v8387_v23 = vcombine.high %v8361_v15, %v8361_v15  ;;  %v8391_v24 = vrot.slane %v8366_v17, %v8348_v5  ;;  %v8395_v25 = vcombine.high %v8364_v16, %v8364_v16 }
  0x20   : > { %v2132_v26 = vcombine.low %v8373_v19, %v8369_v18  ;;  %v7707_v27 = vcombine.high %v8369_v18, %v8357_v11  ;;  %v8403_v28 = vcombine.high %v8376_v20, %v8376_v20  ;;  %v2668_v29 = vcombine.low %v8357_v11, %v8380_v21 }
  0x21   : > { %v2150_v30 = vcombine.low %v8361_v15, %v8387_v23  ;;  %v2677_v31 = vcombine.low %v8383_v22, %v8364_v16  ;;  %v834_v32 = vcombine.low %v8380_v21, %v8376_v20  ;;  %v851_v33 = vcombine.low %v8387_v23, %v8383_v22 }
  0x22   : > { %v2140_v34 = vrot.slane %v2132_v26, %v8348_v5  ;;  %v2147_v35 = vrot.slane %v7707_v27, %v8348_v5  ;;  %v2149_v36 = vcombine.low %v8376_v20, %v8403_v28  ;;  %v2675_v37 = vrot.slane %v2668_v29, %v8348_v5 }
  0x23   : > { %v8421_v38 = vrot.slane %v2150_v30, %v8348_v5  ;;  %v2684_v39 = vrot.slane %v2677_v31, %v8348_v5  ;;  %v835_v40 = vcombine.low %v8403_v28, %v8361_v15  ;;  %v842_v44 = vrot.slane %v834_v32, %v8348_v5 }
  0x24   : > { %v2148_v42 = vcombine.low %v2140_v34, %v2147_v35  ;;  %v8428_v43 = vrot.slane %v2149_v36, %v8348_v5  ;;  %v7715_v45 = vcombine.high %v8383_v22, %v8364_v16  ;;  %v8435_v47 = vrot.slane %v851_v33, %v8348_v5 }
  0x25   : > { %v849_v46 = vrot.slane %v835_v40, %v8348_v5  ;;  %v8439_v48 = vcombine.high %v8391_v24, %v8391_v24  ;;  %v852_v49 = vcombine.low %v8364_v16, %v8395_v25  ;;  %v2685_v53 = vcombine.low %v8421_v38, %v2684_v39 }
  0x26   : > { %2533 = vrot.lane.b32.xlu1 %v2148_v42, %s8238_s18  ;;  %v2676_v52 = vcombine.low %v2675_v37, %v8428_v43  ;;  %v3478_v54 = vrot.slane %v7715_v45, %v8348_v5  ;;  %v8456_v55 = vcombine.high %v283_v41, %v283_v41  ;;  %v8464_v58 = vrot.slane %v283_v41, %v8348_v5 }
  0x27   : > { %v8459_v56 = vrot.slane %v852_v49, %v8348_v5  ;;  %v868_v57 = vcombine.low %v8391_v24, %v8439_v48  ;;  %v8467_v59 = vcombine.low %v842_v44, %v849_v46  ;;  %v8475_v61 = vrot.slane %v8444_v50, %v8348_v5 }
  0x28   : > { %13412 = vst [vmem:[#allocation8_spill] sm:$0xff] %v8456_v55  ;;  %2828 = vrot.lane.b32.xlu0 %v2676_v52, %s8239_s19  ;;  %v8471_v60 = vrot.slane %v8456_v55, %v8348_v5  ;;  %v3479_v62 = vcombine.low %v8435_v47, %v3478_v54  ;;  %v8486_v0 = vcombine.high %v8464_v58, %v8464_v58  ;;  %v1300_v3 = vrot.slane %v8354_v10, 7 }
  0x29   : > { %v8482_v63 = vrot.slane %v868_v57, %v8348_v5  ;;  %v1268_v2 = vcombine.high %v8369_v18, %v8369_v18  ;;  %v1303_v4 = vrot.slane %v8373_v19, 7  ;;  %v1306_v9 = vrot.slane %v8369_v18, 7  ;;  %1244 = vst.msk [vmem:[#allocation2 + $0x10] sm:$0xff] %vm1241_vm7, %v8467_v59 }
  0x2a   : > { %2830 = vrot.lane.b32.xlu1 %v2685_v53, %s8239_s19  ;;  %v885_v1 = vcombine.low %v8471_v60, %v8475_v61  ;;  %v869_v7 = vcombine.low %v8464_v58, %v8486_v0  ;;  %v1302_v14 = vrot.slane %v1300_v3, 2  ;;  %v7694_v31 = vrot.slane %v8357_v11, 9 }
  0x2b   : > { %v3750_v6 = vcombine.low %v8459_v56, %v8482_v63  ;;  %v1305_v26 = vrot.slane %v1303_v4, 2  ;;  %v1309_v27 = vrot.slane %v1268_v2, 7  ;;  %v1308_v30 = vrot.slane %v1306_v9, 2 }
  0x2c   : > { %3613 = vrot.lane.b32.xlu0 %v8467_v59, %s8240_s20  ;;  %v8508_v13 = vrot.slane %v885_v1, %v8348_v5  ;;  %v8513_v29 = vrot.slane %v869_v7, %v8348_v5  ;;  %v1313_v32 = vrot.slane %v8380_v21, 7  ;;  %v1304_v33 = vsel %vm8499_vm6, %v1302_v14, %v1303_v4 }
  0x2d   : > { %v1307_v34 = vsel %vm8499_vm6, %v1305_v26, %v1306_v9  ;;  %v338_v35 = vcombine.high %v278_v12, %v278_v12  ;;  %v8523_v36 = vrot.slane %v278_v12, %v8348_v5  ;;  %v1310_v39 = vsel %vm8499_vm6, %v1308_v30, %v1309_v27 }
  0x2e   : > { %3615 = vrot.lane.b32.xlu1 %v3479_v62, %s8240_s20  ;;  %v3751_v37 = vcombine.low %v8513_v29, %v8508_v13  ;;  %v8531_v21 = vsel %vm8499_vm6, %v7694_v31, %v1313_v32  ;;  %v1614_v40 = vcombine.low %v1304_v33, %v1307_v34  ;;  %v8546_v49 = vcombine.high %v8383_v22, %v8383_v22 }
  0x2f   : > { %v1615_v41 = vcombine.low %v1310_v39, %v8531_v21  ;;  %v8536_v42 = vrot.slane %v338_v35, %v8348_v5  ;;  %v8540_v44 = vcombine.high %v8523_v36, %v8523_v36  ;;  %v7693_v45 = vrot.slane %v8523_v36, 9 }
  0x30   : > { %3814 = vrot.lane.b32.xlu0 %v3750_v6, %s8241_s21  ;;  %v1622_v46 = vrot.slane %v1614_v40, %v8348_v5  ;;  %v1322_v51 = vrot.slane %v8361_v15, 7  ;;  %v1325_v52 = vrot.slane %v8387_v23, 7  ;;  %v1328_v15 = vrot.slane %v8383_v22, 7 }
  0x31   : > { %v1629_v53 = vrot.slane %v1615_v41, %v8348_v5  ;;  %v8554_v54 = vcombine.high %v8536_v42, %v8536_v42  ;;  %v2115_v57 = vcombine.low %v8540_v44, %v8536_v42  ;;  %v1291_v62 = vrot.slane %v8540_v44, 7 }
  0x32   : > { %3816 = vrot.lane.b32.xlu1 %v3751_v37, %s8241_s21  ;;  %v1294_v1 = vrot.slane %v8536_v42, 7  ;;  %v1324_v2 = vrot.slane %v1322_v51, 2  ;;  %v1327_v4 = vrot.slane %v1325_v52, 2  ;;  %v1330_v33 = vrot.slane %v1328_v15, 2 }
  0x33   : > { %v1630_v23 = vcombine.low %v1622_v46, %v1629_v53  ;;  %v2116_v6 = vcombine.low %v8554_v54, %v8354_v10  ;;  %v2123_v7 = vrot.slane %v2115_v57, %v8348_v5  ;;  %v1292_v9 = vsel %vm8499_vm6, %v7693_v45, %v1291_v62 }
  0x34   : > { %v1293_v12 = vrot.slane %v1291_v62, 2  ;;  %v1296_v14 = vrot.slane %v1294_v1, 2  ;;  %v1297_v26 = vrot.slane %v8554_v54, 7  ;;  %v8569_v27 = vsel %vm8499_vm6, %v1324_v2, %v1325_v52 }
  0x35   : > { %2015 = vrot.lane.b32.xlu0 %v1630_v23, %s8242_s22  ;;  %v2130_v30 = vrot.slane %v2116_v6, %v8348_v5  ;;  %v8575_v31 = vsel %vm8499_vm6, %v1327_v4, %v1328_v15  ;;  %v1331_v34 = vrot.slane %v8546_v49, 7  ;;  %v7695_v40 = vrot.slane %v8364_v16, 9 }
  0x36   : > { %v1295_v35 = vsel %vm8499_vm6, %v1293_v12, %v1294_v1  ;;  %v1298_v37 = vsel %vm8499_vm6, %v1296_v14, %v1297_v26  ;;  %v1299_v39 = vrot.slane %v1297_v26, 2  ;;  %v1335_v52 = vrot.slane %v8395_v25, 7 }
  0x37   : > { %v2131_v41 = vcombine.low %v2123_v7, %v2130_v30  ;;  %v1597_v45 = vcombine.low %v1292_v9, %v1295_v35  ;;  %v8585_v46 = vsel %vm8499_vm6, %v1330_v33, %v1331_v34  ;;  %v2970_v57 = vcombine.low %v8569_v27, %v8575_v31 }
  0x38   : > { %v1301_v53 = vsel %vm8499_vm6, %v1299_v39, %v1300_v3  ;;  %v1315_v62 = vrot.slane %v1313_v32, 2  ;;  %v1316_v1 = vrot.slane %v8376_v20, 7  ;;  %v1336_v4 = vsel %vm8499_vm6, %v7695_v40, %v1335_v52 }
  0x39   : > { %2531 = vrot.lane.b32.xlu1 %v2131_v41, %s8238_s18  ;;  %v1598_v16 = vcombine.low %v1298_v37, %v1301_v53  ;;  %v1605_v2 = vrot.slane %v1597_v45, %v8348_v5  ;;  %v1319_v15 = vrot.slane %v8403_v28, 7  ;;  %v2971_v23 = vcombine.low %v8585_v46, %v1336_v4 }
  0x3a   : > { %v2978_v3 = vrot.slane %v2970_v57, %v8348_v5  ;;  %v8604_v6 = vsel %vm8499_vm6, %v1315_v62, %v1316_v1  ;;  %v1318_v32 = vrot.slane %v1316_v1, 2  ;;  %v8611_v12 = vcombine.high %v8475_v61, %v8475_v61 }
  0x3b   : > { %v1612_v20 = vrot.slane %v1598_v16, %v8348_v5  ;;  %v1321_v7 = vrot.slane %v1319_v15, 2  ;;  %v2953_v9 = vcombine.low %v8531_v21, %v8604_v6  ;;  %v2985_v28 = vrot.slane %v2971_v23, %v8348_v5 }
  0x3c   : > { %v1320_v14 = vsel %vm8499_vm6, %v1318_v32, %v1319_v15  ;;  %v8618_v26 = vcombine.high %v8471_v60, %v8471_v60  ;;  %v1344_v30 = vrot.slane %v8464_v58, 7  ;;  %v1347_v35 = vrot.slane %v8486_v0, 7 }
  0x3d   : > { %v1613_v33 = vcombine.low %v1605_v2, %v1612_v20  ;;  %v1323_v34 = vsel %vm8499_vm6, %v1321_v7, %v1322_v51  ;;  %v2961_v21 = vrot.slane %v2953_v9, %v8348_v5  ;;  %v2986_v37 = vcombine.low %v2978_v3, %v2985_v28 }
  0x3e   : > { %v2954_v39 = vcombine.low %v1320_v14, %v1323_v34  ;;  %v1346_v40 = vrot.slane %v1344_v30, 2  ;;  %v1350_v41 = vrot.slane %v8471_v60, 7  ;;  %v1349_v45 = vrot.slane %v1347_v35, 2 }
  0x3f   : > { %2013 = vrot.lane.b32.xlu0 %v1613_v33, %s8242_s22  ;;  %v1353_v53 = vrot.slane %v8618_v26, 7  ;;  %v7696_v57 = vrot.slane %v8475_v61, 9  ;;  %v1357_v62 = vrot.slane %v8611_v12, 7  ;;  %3371 = vrot.lane.b32.xlu1 %v2986_v37, %s8243_s23  ;;  %v1337_v2 = vrot.slane %v1335_v52, 2 }
  0x40   : > { %v2968_v51 = vrot.slane %v2954_v39, %v8348_v5  ;;  %v8634_v1 = vsel %vm8499_vm6, %v1346_v40, %v1347_v35  ;;  %v1352_v16 = vrot.slane %v1350_v41, 2  ;;  %v8638_v15 = vsel %vm8499_vm6, %v1349_v45, %v1350_v41 }
  0x41   : > { %v8642_v23 = vsel %vm8499_vm6, %v7696_v57, %v1357_v62  ;;  %v1338_v3 = vrot.slane %v8391_v24, 7  ;;  %v1341_v32 = vrot.slane %v8439_v48, 7  ;;  %v1666_v52 = vcombine.low %v8634_v1, %v8638_v15 }
  0x42   : > { %v2969_v20 = vcombine.low %v2961_v21, %v2968_v51  ;;  %v8648_v7 = vsel %vm8499_vm6, %v1352_v16, %v1353_v53  ;;  %v2184_v9 = vcombine.low %v8486_v0, %v8471_v60  ;;  %v7708_v0 = vcombine.high %v8471_v60, %v8475_v61 }
  0x43   : > { %v1682_v28 = vcombine.low %v8648_v7, %v8642_v23  ;;  %v8658_v33 = vsel %vm8499_vm6, %v1337_v2, %v1338_v3  ;;  %v1340_v35 = vrot.slane %v1338_v3, 2  ;;  %v1343_v37 = vrot.slane %v1341_v32, 2 }
  0x44   : > { %3369 = vrot.lane.b32.xlu0 %v2969_v20, %s8243_s23  ;;  %v8662_v21 = vrot.slane %v1666_v52, %v8348_v5  ;;  %v1649_v39 = vcombine.low %v1336_v4, %v8658_v33  ;;  %v8666_v40 = vrot.slane %v2184_v9, %v8348_v5  ;;  %v2167_v57 = vcombine.low %v8395_v25, %v8391_v24 }
  0x45   : > { %v8671_v41 = vrot.slane %v1682_v28, %v8348_v5  ;;  %v1342_v45 = vsel %vm8499_vm6, %v1340_v35, %v1341_v32  ;;  %v1345_v53 = vsel %vm8499_vm6, %v1343_v37, %v1344_v30  ;;  %v8681_v16 = vrot.slane %v7708_v0, %v8348_v5  ;;  %v285_v35 = vld [vmem:[%s8346_s17 + $0x38] sm:$0xff]  ;;  %v286_v37 = vld [vmem:[%s8346_s17 + $0x40] sm:$0xff] }
  0x46   : > { %v1663_v4 = vrot.slane %v1649_v39, %v8348_v5  ;;  %v1665_v51 = vcombine.low %v1342_v45, %v1345_v53  ;;  %v2183_v2 = vcombine.low %v8439_v48, %v8464_v58  ;;  %v1648_v32 = vcombine.low %v8575_v31, %v8585_v46 }
  0x47   : > { %v3940_v3 = vcombine.low %v8662_v21, %v8671_v41  ;;  %v1631_v30 = vcombine.low %v8604_v6, %v1320_v14  ;;  %v2181_v24 = vrot.slane %v2167_v57, %v8348_v5  ;;  %v1632_v52 = vcombine.low %v1323_v34, %v8569_v27 }
  0x48   : > { %v8691_v20 = vrot.slane %v1665_v51, %v8348_v5  ;;  %v8695_v25 = vrot.slane %v2183_v2, %v8348_v5  ;;  %v4121_v48 = vcombine.low %v8666_v40, %v8681_v16  ;;  %v1656_v58 = vrot.slane %v1648_v32, %v8348_v5 }
  0x49   : > { %4021 = vrot.lane.b32.xlu1 %v3940_v3, %s8244_s29  ;;  %v2166_v31 = vcombine.low %v8383_v22, %v8546_v49  ;;  %v1639_v6 = vrot.slane %v1631_v30, %v8348_v5  ;;  %v1646_v14 = vrot.slane %v1632_v52, %v8348_v5  ;;  %v2687_v27 = vcombine.low %v8475_v61, %v8611_v12 }
  0x4a   : > { %v3939_v46 = vcombine.low %v1663_v4, %v8691_v20  ;;  %v8712_v9 = vcombine.high %v8444_v50, %v8444_v50  ;;  %v8716_v28 = vcombine.low %v2181_v24, %v8695_v25  ;;  %v1664_v22 = vcombine.low %v1656_v58, %v1663_v4 }
  0x4b   : > { %v2174_v34 = vrot.slane %v2166_v31, %v8348_v5  ;;  %v1359_v61 = vrot.slane %v1357_v62, 2  ;;  %v1647_v39 = vcombine.low %v1639_v6, %v1646_v14  ;;  %v2694_v50 = vrot.slane %v2687_v27, %v8348_v5 }
  0x4c   : > { %13415 = vst [vmem:[#allocation9_spill] sm:$0xff] %v8712_v9  ;;  %4019 = vrot.lane.b32.xlu0 %v3939_v46, %s8244_s29  ;;  %v8721_v49 = vrot.slane %v8712_v9, %v8348_v5  ;;  %v3004_v51 = vcombine.low %v8638_v15, %v8648_v7  ;;  %v2987_v2 = vcombine.low %v8658_v33, %v1342_v45 }
  0x4d   : > { %4169 = vrot.lane.b32.xlu1 %v4121_v48, %s8245_s8  ;;  %v2182_v0 = vcombine.low %v2174_v34, %v2181_v24  ;;  %v2988_v4 = vcombine.low %v1345_v53, %v8634_v1  ;;  %v8733_v3 = vcombine.high %v285_v35, %v285_v35  ;;  %v8736_v62 = vrot.slane %v285_v35, %v8348_v5 }
  0x4e   : > { %v1360_v57 = vrot.slane %v8721_v49, 7  ;;  %v8739_v32 = vrot.slane %v286_v37, %v8348_v5  ;;  %v886_v7 = vcombine.low %v8611_v12, %v8721_v49  ;;  %v3480_v1 = vcombine.low %v8471_v60, %v8618_v26 }
  0x4f   : > { %13416 = vst [vmem:[#allocation10_spill] sm:$0xff] %v8733_v3  ;;  %v8750_v33 = vcombine.high %v286_v37, %v286_v37  ;;  %v8756_v53 = vrot.slane %v8733_v3, %v8348_v5  ;;  %v8760_v30 = vcombine.high %v8736_v62, %v8736_v62  ;;  %v2165_v60 = vcombine.low %v8428_v43, %v8421_v38 }
  0x50   : > { %4167 = vrot.lane.b32.xlu0 %v8716_v28, %s8245_s8  ;;  %v8744_v15 = vsel %vm8499_vm6, %v1359_v61, %v1360_v57  ;;  %v8764_v24 = vcombine.high %v8739_v32, %v8739_v32  ;;  %v2695_v12 = vcombine.low %v8666_v40, %v2694_v50  ;;  %v3012_v26 = vrot.slane %v3004_v51, %v8348_v5 }
  0x51   : > { %2019 = vrot.lane.b32.xlu1 %v1664_v22, %s8242_s22  ;;  %13417 = vst [vmem:[#allocation11_spill] sm:$0xff] %v8750_v33  ;;  %v3005_v45 = vcombine.low %v8642_v23, %v8744_v15  ;;  %v2995_v23 = vrot.slane %v2987_v2, %v8348_v5  ;;  %v3002_v48 = vrot.slane %v2988_v4, %v8348_v5  ;;  %v1369_v43 = vrot.slane %v8760_v30, 7 }
  0x52   : > { %v8776_v58 = vrot.slane %v8750_v33, %v8348_v5  ;;  %v1271_v31 = vcombine.high %v8756_v53, %v8756_v53  ;;  %v8783_v38 = vcombine.high %v8721_v49, %v8721_v49  ;;  %v1372_v46 = vrot.slane %v8756_v53, 7 }
  0x53   : > { %v3019_v52 = vrot.slane %v3005_v45, %v8348_v5  ;;  %v1379_v6 = vrot.slane %v8764_v24, 7  ;;  %v8789_v14 = vrot.slane %v886_v7, %v8348_v5  ;;  %v3487_v27 = vrot.slane %v3480_v1, %v8348_v5 }
  0x54   : > { %2017 = vrot.lane.b32.xlu0 %v1647_v39, %s8242_s22  ;;  %v1375_v34 = vrot.slane %v1271_v31, 7  ;;  %v7697_v22 = vrot.slane %v8739_v32, 9  ;;  %v903_v61 = vcombine.low %v8760_v30, %v8756_v53  ;;  %v919_v35 = vcombine.low %v8739_v32, %v8764_v24 }
  0x55   : > { %2537 = vrot.lane.b32.xlu1 %v2182_v0, %s8238_s18  ;;  %v1371_v37 = vrot.slane %v1369_v43, 2  ;;  %v1374_v39 = vrot.slane %v1372_v46, 2  ;;  %v3020_v50 = vcombine.low %v3012_v26, %v3019_v52  ;;  %v1381_v0 = vrot.slane %v1379_v6, 2 }
  0x56   : > { %v1382_v51 = vrot.slane %v8776_v58, 7  ;;  %v1362_v2 = vrot.slane %v1360_v57, 2  ;;  %v1363_v1 = vrot.slane %v8783_v38, 7  ;;  %v1366_v45 = vrot.slane %v8736_v62, 7 }
  0x57   : > { %v8802_v4 = vsel %vm8499_vm6, %v1371_v37, %v1372_v46  ;;  %v8806_v7 = vsel %vm8499_vm6, %v1374_v39, %v1375_v34  ;;  %v902_v26 = vcombine.low %v8783_v38, %v8736_v62  ;;  %v3488_v34 = vcombine.low %v3487_v27, %v8789_v14 }
  0x58   : > { %2535 = vrot.lane.b32.xlu0 %v2165_v60, %s8238_s18  ;;  %v8812_v60 = vsel %vm8499_vm6, %v7697_v22, %v1379_v6  ;;  %v8816_v57 = vsel %vm8499_vm6, %v1381_v0, %v1382_v51  ;;  %v1365_v52 = vrot.slane %v1363_v1, 2  ;;  %v1368_v46 = vrot.slane %v1366_v45, 2 }
  0x59   : > { %2834 = vrot.lane.b32.xlu1 %v2695_v12, %s8239_s19  ;;  %v3003_v12 = vcombine.low %v2995_v23, %v3002_v48  ;;  %v8824_v37 = vrot.slane %v903_v61, %v8348_v5  ;;  %v8827_v6 = vrot.slane %v919_v35, %v8348_v5  ;;  %v1700_v22 = vcombine.low %v8802_v4, %v8806_v7 }
  0x5a   : > { %v1716_v23 = vcombine.low %v8812_v60, %v8816_v57  ;;  %v8836_v48 = vsel %vm8499_vm6, %v1362_v2, %v1363_v1  ;;  %v8844_v27 = vsel %vm8499_vm6, %v1368_v46, %v1369_v43  ;;  %v8847_v61 = vrot.slane %v902_v26, %v8348_v5 }
  0x5b   : > { %v8852_v35 = vcombine.low %v8482_v63, %v8513_v29  ;;  %v3753_v39 = vcombine.low %v8824_v37, %v8827_v6  ;;  %v8862_v43 = vrot.slane %v1700_v22, %v8348_v5  ;;  %v2218_v63 = vcombine.low %v8756_v53, %v1271_v31 }
  0x5c   : > { %2832 = vrot.lane.b32.xlu0 %v8716_v28, %s8239_s19  ;;  %v8840_v28 = vsel %vm8499_vm6, %v1365_v52, %v1366_v45  ;;  %v8865_v2 = vrot.slane %v1716_v23, %v8348_v5  ;;  %v2234_v29 = vcombine.low %v8764_v24, %v8776_v58  ;;  %v2217_v31 = vcombine.low %v8736_v62, %v8760_v30 }
  0x5d   : > { %3375 = vrot.lane.b32.xlu1 %v3020_v50, %s8243_s23  ;;  %v1683_v50 = vcombine.low %v8744_v15, %v8836_v48  ;;  %v1699_v0 = vcombine.low %v8840_v28, %v8844_v27  ;;  %v3752_v15 = vcombine.low %v8789_v14, %v8847_v61  ;;  %v8886_v26 = vrot.slane %v2218_v63, %v8348_v5 }
  0x5e   : > { %v3942_v24 = vcombine.low %v8862_v43, %v8865_v2  ;;  %v8889_v52 = vrot.slane %v2234_v29, %v8348_v5  ;;  %v8893_v46 = vcombine.high %v8776_v58, %v8776_v58  ;;  %v1384_v23 = vrot.slane %v1382_v51, 2  ;;  %1246 = vst.msk [vmem:[#allocation2 + $0x20] sm:$0xff] %vm1241_vm7, %v8852_v35 }
  0x5f   : > { %v1697_v1 = vrot.slane %v1683_v50, %v8348_v5  ;;  %v8876_v45 = vrot.slane %v1699_v0, %v8348_v5 }
  0x60   : > { %3373 = vrot.lane.b32.xlu0 %v3003_v12, %s8243_s23  ;;  %v2201_v12 = vcombine.low %v8721_v49, %v8783_v38  ;;  %v288_v49 = vld [vmem:[%s8346_s17 + $0x50] sm:$0xff]  ;;  %v8901_v38 = vrot.slane %v2217_v31, %v8348_v5  ;;  %v4122_v22 = vcombine.low %v8886_v26, %v8889_v52 }
  0x61   : > { %3619 = vrot.lane.b32.xlu1 %v3488_v34, %s8240_s20  ;;  %v287_v34 = vld [vmem:[%s8346_s17 + $0x48] sm:$0xff]  ;;  %v3941_v62 = vcombine.low %v1697_v1, %v8876_v45  ;;  %v8909_v0 = vcombine.high %v288_v49, %v288_v49  ;;  %v8912_v63 = vrot.slane %v288_v49, %v8348_v5  ;;  %v1698_v51 = vcombine.low %v8671_v41, %v1697_v1 }
  0x62   : > { %v2215_v30 = vrot.slane %v2201_v12, %v8348_v5  ;;  %v8907_v50 = vcombine.high %v287_v34, %v287_v34  ;;  %v1681_v41 = vcombine.low %v8691_v20, %v8662_v21  ;;  %v2199_v20 = vcombine.low %v8695_v25, %v8666_v40 }
  0x63   : > { %13419 = vst [vmem:[#allocation13_spill] sm:$0xff] %v8909_v0  ;;  %v8933_v49 = vrot.slane %v8909_v0, %v8348_v5  ;;  %v7716_v40 = vcombine.high %v8756_v53, %v8739_v32  ;;  %v7698_v33 = vrot.slane %v8912_v63, 9 }
  0x64   : > { %3617 = vrot.lane.b32.xlu0 %v8852_v35, %s8240_s20  ;;  %13418 = vst [vmem:[#allocation12_spill] sm:$0xff] %v8907_v50  ;;  %v2696_v29 = vcombine.low %v2215_v30, %v8901_v38  ;;  %v8926_v31 = vrot.slane %v8907_v50, %v8348_v5 }
  0x65   : > { %3820 = vrot.lane.b32.xlu1 %v3753_v39, %s8241_s21  ;;  %v1385_v39 = vrot.slane %v8893_v46, 7 }
  0x66   : > { %v8955_v0 = vcombine.high %v8926_v31, %v8926_v31  ;;  %v1394_v21 = vrot.slane %v8926_v31, 7  ;;  %v937_v9 = vcombine.low %v8926_v31, %v8912_v63 }
  0x67   : > { %v8922_v12 = vsel %vm8499_vm6, %v1384_v23, %v1385_v39  ;;  %v2216_v23 = vcombine.low %v8681_v16, %v2215_v30  ;;  %v1404_v16 = vrot.slane %v8933_v49, 7  ;;  %v3022_v30 = vcombine.low %v8844_v27, %v8802_v4 }
  0x68   : > { %3818 = vrot.lane.b32.xlu0 %v3752_v15, %s8241_s21  ;;  %v2697_v15 = vcombine.low %v8756_v53, %v8739_v32  ;;  %v1397_v4 = vrot.slane %v8955_v0, 7  ;;  %v1387_v17 = vrot.slane %v1385_v39, 2 }
  0x69   : > { %4025 = vrot.lane.b32.xlu1 %v3942_v24, %s8244_s29  ;;  %v8929_v24 = vrot.slane %v287_v34, %v8348_v5  ;;  %v3039_v34 = vcombine.low %v8816_v57, %v8922_v12  ;;  %v3021_v57 = vcombine.low %v8836_v48, %v8840_v28  ;;  %v1396_v48 = vrot.slane %v1394_v21, 2 }
  0x6a   : > { %v2704_v1 = vrot.slane %v2697_v15, %v8348_v5  ;;  %v920_v15 = vcombine.low %v8776_v58, %v8893_v46  ;;  %v1406_v53 = vrot.slane %v1404_v16, 2 }
  0x6b   : > { %v8951_v50 = vcombine.high %v8929_v24, %v8929_v24  ;;  %v3053_v3 = vrot.slane %v3039_v34, %v8348_v5  ;;  %v1388_v58 = vrot.slane %v8929_v24, 7  ;;  %v3496_v34 = vrot.slane %v7716_v40, %v8348_v5 }
  0x6c   : > { %4023 = vrot.lane.b32.xlu0 %v3941_v62, %s8244_s29  ;;  %v8937_v62 = vcombine.high %v8912_v63, %v8912_v63  ;;  %v2705_v25 = vcombine.low %v2704_v1, %v8889_v52  ;;  %v3036_v1 = vrot.slane %v3022_v30, %v8348_v5 }
  0x6d   : > { %4173 = vrot.lane.b32.xlu1 %v4122_v22, %s8245_s8  ;;  %v3038_v22 = vcombine.low %v8806_v7, %v8812_v60  ;;  %v8962_v7 = vcombine.high %v8933_v49, %v8933_v49  ;;  %v1391_v28 = vrot.slane %v8951_v50, 7 }
  0x6e   : > { %v1401_v60 = vrot.slane %v8937_v62, 7  ;;  %v953_v55 = vcombine.low %v8937_v62, %v8933_v49 }
  0x6f   : > { %v1407_v27 = vrot.slane %v8962_v7, 7 }
  0x70   : > { %4171 = vrot.lane.b32.xlu0 %v2696_v29, %s8245_s8  ;;  %v1403_v32 = vrot.slane %v1401_v60, 2  ;;  %v9002_v30 = vsel %vm8499_vm6, %v7698_v33, %v1401_v60  ;;  %v9017_v60 = vrot.slane %v937_v9, %v8348_v5  ;;  %v289_v9 = vld [vmem:[%s8346_s17 + $0x58] sm:$0xff] }
  0x71   : > { %2023 = vrot.lane.b32.xlu1 %v1698_v51, %s8242_s22  ;;  %v3046_v51 = vrot.slane %v3038_v22, %v8348_v5  ;;  %v8987_v22 = vrot.slane %v920_v15, %v8348_v5  ;;  %v1390_v15 = vrot.slane %v1388_v58, 2  ;;  %v9010_v39 = vsel %vm8499_vm6, %v1406_v53, %v1407_v27 }
  0x73   : > { %v3497_v33 = vcombine.low %v3496_v34, %v8987_v22 }
  0x74   : > { %2021 = vrot.lane.b32.xlu0 %v1681_v41, %s8242_s22  ;;  %v3029_v41 = vrot.slane %v3021_v57, %v8348_v5  ;;  %v8998_v57 = vsel %vm8499_vm6, %v1396_v48, %v1397_v4  ;;  %v9027_v4 = vsel %vm8499_vm6, %v1387_v17, %v1388_v58 }
  0x75   : > { %2541 = vrot.lane.b32.xlu1 %v2216_v23, %s8238_s18  ;;  %v3054_v23 = vcombine.low %v3046_v51, %v3053_v3  ;;  %v1393_v3 = vrot.slane %v1391_v28, 2  ;;  %v961_v51 = vrot.slane %v953_v55, %v8348_v5  ;;  %v1717_v58 = vcombine.low %v8922_v12, %v9027_v4 }
  0x76   : > { %v3037_v40 = vcombine.low %v3029_v41, %v3036_v1  ;;  %v7709_v41 = vcombine.high %v8926_v31, %v8912_v63  ;;  %v2268_v12 = vcombine.low %v8933_v49, %v8962_v7  ;;  %v290_v1 = vld [vmem:[%s8346_s17 + $0x60] sm:$0xff] }
  0x77   : > { %v9035_v55 = vsel %vm8499_vm6, %v1393_v3, %v1394_v21  ;;  %v3755_v17 = vcombine.low %v9017_v60, %v961_v51  ;;  %v9050_v21 = vrot.slane %v289_v9, %v8348_v5  ;;  %v9077_v49 = vcombine.high %v290_v1, %v290_v1 }
  0x78   : > { %2539 = vrot.lane.b32.xlu0 %v2199_v20, %s8238_s18  ;;  %v9006_v20 = vsel %vm8499_vm6, %v1403_v32, %v1404_v16  ;;  %v1734_v16 = vcombine.low %v8998_v57, %v9002_v30  ;;  %v918_v32 = vcombine.low %v8847_v61, %v8824_v37 }
  0x79   : > { %2838 = vrot.lane.b32.xlu1 %v2705_v25, %s8239_s19  ;;  %v936_v25 = vcombine.low %v8929_v24, %v8951_v50  ;;  %v1750_v48 = vcombine.low %v9006_v20, %v9010_v39  ;;  %v954_v34 = vcombine.low %v8962_v7, %v9050_v21  ;;  %13420 = vst [vmem:[#allocation14_spill] sm:$0xff] %v9077_v49 }
  0x7a   : > { %v9054_v37 = vrot.slane %v1734_v16, %v8348_v5  ;;  %1248 = vst.msk [vmem:[#allocation2 + $0x30] sm:$0xff] %vm1241_vm7, %v918_v32  ;;  %v3072_v35 = vcombine.low %v9002_v30, %v9006_v20 }
  0x7b   : > { %v9041_v53 = vrot.slane %v936_v25, %v8348_v5  ;;  %v9057_v61 = vrot.slane %v1750_v48, %v8348_v5  ;;  %v9089_v7 = vrot.slane %v954_v34, %v8348_v5  ;;  %v1409_v48 = vrot.slane %v1407_v27, 2 }
  0x7c   : > { %2836 = vrot.lane.b32.xlu0 %v2696_v29, %s8239_s19  ;;  %v9031_v29 = vsel %vm8499_vm6, %v1390_v15, %v1391_v28  ;;  %v2251_v15 = vcombine.low %v8951_v50, %v8926_v31  ;;  %v9086_v50 = vrot.slane %v2268_v12, %v8348_v5  ;;  %v2707_v34 = vcombine.low %v8912_v63, %v8937_v62 }
  0x7d   : > { %3379 = vrot.lane.b32.xlu1 %v3054_v23, %s8243_s23  ;;  %v1733_v28 = vcombine.low %v9031_v29, %v9035_v55  ;;  %v2235_v23 = vcombine.low %v8893_v46, %v8929_v24  ;;  %v3754_v3 = vcombine.low %v8987_v22, %v9041_v53  ;;  %v3944_v46 = vcombine.low %v9054_v37, %v9057_v61 }
  0x7e   : > { %v9083_v24 = vrot.slane %v7709_v41, %v8348_v5  ;;  %v9095_v16 = vrot.slane %v2251_v15, %v8348_v5  ;;  %v9105_v41 = vrot.slane %v9077_v49, %v8348_v5  ;;  %v9118_v15 = vcombine.low %v961_v51, %v9089_v7 }
  0x7f   : > { %v9075_v25 = vrot.slane %v1733_v28, %v8348_v5  ;;  %v9101_v28 = vrot.slane %v290_v1, %v8348_v5  ;;  %v9115_v1 = vcombine.high %v289_v9, %v289_v9  ;;  %v818_v62 = vcombine.low %v8369_v18, %v8357_v11 }
  0x80   : > { %3377 = vrot.lane.b32.xlu0 %v3037_v40, %s8243_s23  ;;  %v1731_v40 = vrot.slane %v1717_v58, %v8348_v5  ;;  %v4123_v12 = vcombine.low %v9083_v24, %v9086_v50  ;;  %1251 = vst.msk [vmem:[#allocation2 + $0x48] sm:$0xff] %vm1241_vm7, %v9118_v15  ;;  %v2714_v9 = vrot.slane %v2707_v34, %v8348_v5  ;;  %v1426_v20 = vrot.slane %v9105_v41, 7 }
  0x81   : > { %3623 = vrot.lane.b32.xlu1 %v3497_v33, %s8240_s20  ;;  %v9092_v33 = vrot.slane %v2235_v23, %v8348_v5  ;;  %v1715_v23 = vcombine.low %v8876_v45, %v8862_v43  ;;  %13421 = vst [vmem:[#allocation15_spill] sm:$0xff] %v9115_v1  ;;  %v9137_v45 = vcombine.high %v9101_v28, %v9101_v28 }
  0x82   : > { %v3943_v58 = vcombine.low %v1731_v40, %v9075_v25  ;;  %v1732_v27 = vcombine.low %v8865_v2, %v1731_v40  ;;  %v800_v11 = vcombine.low %v8523_v36, %v8540_v44  ;;  %v801_v18 = vcombine.low %v8536_v42, %v8554_v54 }
  0x83   : > { %v2250_v51 = vcombine.low %v8889_v52, %v9092_v33  ;;  %v9166_v59 = vrot.slane %v9115_v1, %v8348_v5  ;;  %v832_v52 = vrot.slane %v818_v62, %v8348_v5  ;;  %v3055_v40 = vcombine.low %v9027_v4, %v9031_v29 }
  0x84   : > { %3621 = vrot.lane.b32.xlu0 %v918_v32, %s8240_s20  ;;  %v808_v42 = vrot.slane %v800_v11, %v8348_v5  ;;  %v815_v44 = vrot.slane %v801_v18, %v8348_v5  ;;  %v1423_v30 = vrot.slane %v9137_v45, 7  ;;  %v9190_v4 = vcombine.high %v9050_v21, %v9050_v21 }
  0x85   : > { %3824 = vrot.lane.b32.xlu1 %v3755_v17, %s8241_s21  ;;  %v1410_v17 = vrot.slane %v9050_v21, 7  ;;  %v9211_v62 = vcombine.high %v9166_v59, %v9166_v59  ;;  %v1428_v11 = vrot.slane %v1426_v20, 2 }
  0x87   : > { %v9132_v43 = vsel %vm8499_vm6, %v1409_v48, %v1410_v17 }
  0x88   : > { %3822 = vrot.lane.b32.xlu0 %v3754_v3, %s8241_s21  ;;  %v817_v3 = vcombine.low %v8354_v10, %v8373_v19  ;;  %v9141_v10 = vcombine.high %v9105_v41, %v9105_v41  ;;  %v9144_v19 = vld [vmem:[%s8346_s17 + $0x68] sm:$0xff]  ;;  %v3073_v32 = vcombine.low %v9010_v39, %v9132_v43 }
  0x89   : > { %4029 = vrot.lane.b32.xlu1 %v3944_v46, %s8244_s29  ;;  %v9124_v46 = vcombine.low %v9092_v33, %v9095_v16  ;;  %v9177_v36 = vrot.slane %v9144_v19, %v8348_v5  ;;  %v816_v33 = vcombine.low %v808_v42, %v815_v44  ;;  %v13299_v42 = vmov 0.0  }
  0x8a   : > { %v825_v63 = vrot.slane %v817_v3, %v8348_v5  ;;  %v987_v54 = vcombine.low %v9105_v41, %v9141_v10  ;;  %v1429_v29 = vrot.slane %v9141_v10, 7  ;;  %v3087_v34 = vrot.slane %v3073_v32, %v8348_v5  ;;  %v8125_v3 = vld [vmem:[%s13284_s1] sm:$0xff]   ;;  %7839 = vmatprep.subr.bf16.mxu0 %v13299_v42  ;;  %7981 = vmatprep.subr.bf16.mxu1 %v13299_v42 }
  0x8b   : > { %v9195_v48 = vcombine.high %v9177_v36, %v9177_v36  ;;  %1242 = vst.msk [vmem:[#allocation2] sm:$0xff] %vm1241_vm7, %v816_v33  ;;  %v1413_v32 = vrot.slane %v9190_v4, 7  ;;  %7840 = vmatpush3.bf16.msra.mxu0 %v8125_v3  ;;  %v867_v33 = vcombine.low %v8435_v47, %v8459_v56  ;;  %v8129_v47 = vld [vmem:[%s13284_s1 + $0x10] ss:$0 sps:$4 sm:$0x33]   ;;  %v13422_v56 = vcombine.low %v8901_v38, %v8886_v26 }
  0x8c   : > { %4027 = vrot.lane.b32.xlu0 %v3943_v58, %s8244_s29  ;;  %v833_v39 = vcombine.low %v825_v63, %v832_v52  ;;  %v2715_v58 = vcombine.low %v2714_v9, %v9086_v50  ;;  %v7699_v63 = vrot.slane %v9101_v28, 9  ;;  %v1416_v52 = vrot.slane %v9166_v59, 7  ;;  %7841 = vmatprep.subr.bf16.mxu0 %v13299_v42 }
  0x8d   : > { %4177 = vrot.lane.b32.xlu1 %v4123_v12, %s8245_s8  ;;  %v9199_v12 = vrot.slane %v3072_v35, %v8348_v5  ;;  %v988_v9 = vcombine.low %v9177_v36, %v9195_v48  ;;  %v1431_v35 = vrot.slane %v1429_v29, 2  ;;  %1245 = vst.msk [vmem:[#allocation2 + $0x18] sm:$0xff] %vm1241_vm7, %v867_v33  ;;  %v13423_v38 = vrot.slane %v9177_v36, 7  ;;  %7845 = vmatprep.mubr.msk.bf16.mxu0 %vm8247_vm9, %v13299_v42 }
  0x8e   : > { %1243 = vst.msk [vmem:[#allocation2 + $0x8] sm:$0xff] %vm1241_vm7, %v833_v39  ;;  %v3498_v39 = vcombine.low %v8926_v31, %v8955_v0  ;;  %v9258_v31 = vsel %vm8499_vm6, %v7699_v63, %v1423_v30  ;;  %v1418_v3 = vrot.slane %v1416_v52, 2  ;;  %7919 = vmatprep.mubr.msk.bf16.mxu1 %vm8247_vm9, %v13299_v42 }
  0x8f   : > { %v9226_v44 = vrot.slane %v988_v9, %v8348_v5  ;;  %v3088_v18 = vcombine.low %v9199_v12, %v3087_v34  ;;  %v1419_v12 = vrot.slane %v9211_v62, 7  ;;  %v292_v9 = vld [vmem:[%s8346_s17 + $0x70] sm:$0xff] }
  0x90   : > { %4175 = vrot.lane.b32.xlu0 %v9124_v46, %s8245_s8  ;;  %v3505_v63 = vrot.slane %v3498_v39, %v8348_v5 }
  0x91   : > { %2027 = vrot.lane.b32.xlu1 %v1732_v27, %s8242_s22  ;;  %v3056_v27 = vcombine.low %v9035_v55, %v8998_v57  ;;  %v9218_v57 = vrot.slane %v987_v54, %v8348_v5  ;;  %v1425_v55 = vrot.slane %v1423_v30, 2  ;;  %v9277_v30 = vsel %vm8499_vm6, %v1431_v35, %v13423_v38 }
  0x92   : > { %v4376_v35 = vsel %vm4374_vm8, %v8129_v47, 0  ;;  %v9314_v33 = vsel %vm8499_vm6, %v1418_v3, %v1419_v12 }
  0x93   : > { %v3070_v54 = vrot.slane %v3056_v27, %v8348_v5  ;;  %v1412_v27 = vrot.slane %v1410_v17, 2  ;;  %v9246_v0 = vcombine.low %v9218_v57, %v9226_v44  ;;  %v9262_v17 = vsel %vm8499_vm6, %v1428_v11, %v1429_v29 }
  0x94   : > { %2025 = vrot.lane.b32.xlu0 %v1715_v23, %s8242_s22  ;;  %v3063_v23 = vrot.slane %v3055_v40, %v8348_v5  ;;  %v971_v40 = vcombine.low %v9101_v28, %v9137_v45  ;;  %v9271_v26 = vsel %vm8499_vm6, %v1425_v55, %v1426_v20  ;;  %v1415_v29 = vrot.slane %v1413_v32, 2 }
  0x95   : > { %2545 = vrot.lane.b32.xlu1 %v2250_v51, %s8238_s18  ;;  %v8126_v51 = vld [vmem:[%s13284_s1 + $0x8] sm:$0xff]   ;;  %1253 = vst.msk [vmem:[#allocation2 + $0x58] sm:$0xff] %vm1241_vm7, %v9246_v0  ;;  %v970_v11 = vcombine.low %v9190_v4, %v9166_v59  ;;  %v9301_v39 = vsel %vm8499_vm6, %v1412_v27, %v1413_v32 }
  0x96   : > { %7842 = vmatpush3.bf16.msra.mxu0 %v8126_v51  ;;  %v9287_v55 = vrot.slane %v971_v40, %v8348_v5  ;;  %v9316_v40 = vcombine.high %v292_v9, %v292_v9 }
  0x97   : > { %7843 = vmatprep.subr.bf16.mxu0 %v13299_v42  ;;  %v9321_v32 = vrot.slane %v970_v11, %v8348_v5 }
  0x98   : > { %v9238_v2 = vpop.permute.xlu1 %2533  ;;  %2543 = vrot.lane.b32.xlu0 %v13422_v56, %s8238_s18  ;;  %13424 = vst [vmem:[#allocation16_spill] sm:$0xff] %v9316_v40  ;;  %v3757_v27 = vcombine.low %v9287_v55, %v9218_v57  ;;  %v1751_v56 = vcombine.low %v9132_v43, %v9301_v39  ;;  %v2302_v57 = vcombine.low %v9141_v10, %v9177_v36 }
  0x99   : > { %2842 = vrot.lane.b32.xlu1 %v2715_v58, %s8239_s19  ;;  %v3071_v58 = vcombine.low %v3063_v23, %v3070_v54  ;;  %v1768_v23 = vcombine.low %v9258_v31, %v9271_v26  ;;  %v1784_v54 = vcombine.low %v9262_v17, %v9277_v30  ;;  %13425 = vst [vmem:[#allocation17_spill] sm:$0xff] %v9321_v32 }
  0x9a   : > { %v9267_v34 = vpop.permute.xlu0 %2828  ;;  %7844 = vmatpush3.bf16.msra.mxu0 %v4376_v35  ;;  %v9351_v43 = vrot.slane %v9316_v40, %v8348_v5  ;;  %v3756_v3 = vcombine.low %v9089_v7, %v9321_v32  ;;  %v1765_v10 = vrot.slane %v1751_v56, %v8348_v5  ;;  %v9394_v56 = vrot.slane %v292_v9, %v8348_v5 }
  0x9b   : > { %7897 = vmatprep.subr.bf16.mxu0 %v13299_v42  ;;  %v13427_v9 = vrot.slane %v9177_v36, 7 }
  0x9c   : > { %v9284_v20 = vpop.permute.xlu1 %2830  ;;  %2840 = vrot.lane.b32.xlu0 %v9124_v46, %s8239_s19  ;;  %v9310_v46 = vsel %vm8499_vm6, %v1415_v29, %v1416_v52  ;;  %v3506_v52 = vcombine.low %v9041_v53, %v3505_v63  ;;  %v293_v29 = vld [vmem:[%s8346_s17 + $0x78] sm:$0xff]  ;;  %v2285_v63 = vcombine.low %v9166_v59, %v9211_v62  ;;  %v9380_v62 = vcombine.high %v9351_v43, %v9351_v43 }
  0x9d   : > { %3383 = vrot.lane.b32.xlu1 %v3088_v18, %s8243_s23  ;;  %v2286_v18 = vcombine.low %v9137_v45, %v9105_v41  ;;  %v1767_v12 = vcombine.low %v9310_v46, %v9314_v33  ;;  %v9339_v41 = vrot.slane %v1768_v23, %v8348_v5  ;;  %v9342_v45 = vrot.slane %v1784_v54, %v8348_v5 }
  0x9e   : > { %v9306_v51 = vpop.permute.xlu0 %3613  ;;  %v9367_v35 = vcombine.high %v293_v29, %v293_v29  ;;  %v9370_v7 = vrot.slane %v293_v29, %v8348_v5  ;;  %v9431_v42 = vcombine.high %v9394_v56, %v9394_v56 }
  0x9f   : > { %v9365_v11 = vrot.slane %v1767_v12, %v8348_v5 }
  0xa0   : > { %3381 = vrot.lane.b32.xlu0 %v3071_v58, %s8243_s23  ;;  %v9330_v47 = vpop.permute.xlu1 %3615  ;;  %v2269_v58 = vcombine.low %v9050_v21, %v9190_v4  ;;  %13426 = vst [vmem:[#allocation18_spill] sm:$0xff] %v9367_v35  ;;  %v3946_v21 = vcombine.low %v9339_v41, %v9342_v45  ;;  %v9376_v4 = vrot.slane %v2302_v57, %v8348_v5 }
  0xa1   : > { %3627 = vrot.lane.b32.xlu1 %v9118_v15, %s8240_s20  ;;  %v9356_v15 = vrot.slane %v2286_v18, %v8348_v5  ;;  %v9388_v18 = vrot.slane %v2285_v63, %v8348_v5  ;;  %v9398_v12 = vrot.slane %v9367_v35, %v8348_v5  ;;  %v9402_v57 = vcombine.high %v9370_v7, %v9370_v7 }
  0xa2   : > { %v9344_v38 = vpop.permute.xlu0 %3814  ;;  %v9385_v54 = vrot.slane %v2269_v58, %v8348_v5  ;;  %v13301_v58 = vrot.slane %v9195_v48, 7  ;;  %v1021_v63 = vcombine.low %v9380_v62, %v9370_v7 }
  0xa3   : > { %v9407_v29 = vcombine.low %v9356_v15, %v9376_v4  ;;  %v9738_v40 = vcombine.high %v9398_v12, %v9398_v12 }
  0xa4   : > { %3625 = vrot.lane.b32.xlu0 %v3506_v52, %s8240_s20  ;;  %v9382_v23 = vpop.permute.xlu1 %3816  ;;  %v4124_v36 = vcombine.low %v9385_v54, %v9388_v18 }
  0xa5   : > { %3828 = vrot.lane.b32.xlu1 %v3757_v27, %s8241_s21  ;;  %v3945_v27 = vcombine.low %v1765_v10, %v9365_v11 }
  0xa7   : > { %v2016_v52 = vpop.permute.xlu0 %2015 }
  0xa8   : > { %3826 = vrot.lane.b32.xlu0 %v3756_v3, %s8241_s21  ;;  %2090 = vst.msk [vmem:[#allocation2 + $0x8] sm:$0xff] %vm2088_vm10, %v2016_v52  ;;  %v1434_v3 = vrot.slane %v13427_v9, 2  ;;  %v901_v52 = vcombine.low %v8508_v13, %v8789_v14  ;;  %v9443_v14 = vrot.slane %v1021_v63, %v8348_v5 }
  0xa9   : > { %4033 = vrot.lane.b32.xlu1 %v3946_v21, %s8244_s29  ;;  %2608 = vst.msk [vmem:[#allocation2 + $0x8] sm:$0xff] %vm2606_vm11, %v9238_v2  ;;  %v1022_v21 = vcombine.low %v9402_v57, %v9398_v12  ;;  %v9424_v2 = vcombine.high %v9144_v19, %v9144_v19 }
  0xaa   : > { %2905 = vst.msk [vmem:[#allocation2 + $0x8] sm:$0xff] %vm2903_vm12, %v9284_v20  ;;  %v1766_v20 = vcombine.low %v9057_v61, %v1765_v10  ;;  %v9440_v13 = vsel %vm8499_vm6, %v1434_v3, %v13301_v58  ;;  %v2716_v61 = vcombine.low %v9166_v59, %v9101_v28  ;;  %v3106_v3 = vcombine.low %v9271_v26, %v9262_v17 }
  0xab   : > { %13428 = vst [vmem:[#allocation19_spill] sm:$0xff] %v9424_v2  ;;  %v2532_v9 = vpop.permute.xlu1 %2531  ;;  %v9446_v19 = vrot.slane %v1022_v21, %v8348_v5  ;;  %1247 = vst.msk [vmem:[#allocation2 + $0x28] sm:$0xff] %vm1241_vm7, %v901_v52  ;;  %v3107_v63 = vcombine.low %v9277_v30, %v9440_v13  ;;  %v1445_v21 = vrot.slane %v9431_v42, 7  ;;  %v9468_v52 = vrot.slane %v9424_v2, %v8348_v5 }
  0xac   : > { %4031 = vrot.lane.b32.xlu0 %v3945_v27, %s8244_s29  ;;  %v1749_v27 = vcombine.low %v9075_v25, %v9054_v37  ;;  %v2284_v25 = vcombine.low %v9086_v50, %v9385_v54  ;;  %v1451_v26 = vrot.slane %v9380_v62, 7  ;;  %v1454_v30 = vrot.slane %v9370_v7, 7 }
  0xad   : > { %4181 = vrot.lane.b32.xlu1 %v9407_v29, %s8245_s8  ;;  %v9455_v10 = vcombine.low %v9443_v14, %v9446_v19  ;;  %v2723_v50 = vrot.slane %v2716_v61, %v8348_v5  ;;  %v3090_v58 = vcombine.low %v9314_v33, %v9258_v31  ;;  %v3121_v61 = vrot.slane %v3107_v63, %v8348_v5 }
  0xae   : > { %v1456_v33 = vrot.slane %v1454_v30, 2  ;;  %v7717_v63 = vcombine.high %v9166_v59, %v9101_v28 }
  0xaf   : > { %1255 = vst.msk [vmem:[#allocation2 + $0x68] sm:$0xff] %vm1241_vm7, %v9455_v10 }
  0xb0   : > { %4179 = vrot.lane.b32.xlu0 %v4124_v36, %s8245_s8  ;;  %v1448_v36 = vrot.slane %v9351_v43, 7 }
  0xb1   : > { %2031 = vrot.lane.b32.xlu1 %v1766_v20, %s8242_s22  ;;  %v2014_v37 = vpop.permute.xlu0 %2013  ;;  %v3372_v17 = vpop.permute.xlu1 %3371  ;;  %v3089_v20 = vcombine.low %v9301_v39, %v9310_v46  ;;  %v1447_v39 = vrot.slane %v1445_v21, 2  ;;  %v9499_v46 = vcombine.high %v9468_v52, %v9468_v52 }
  0xb2   : > { %2089 = vst.msk [vmem:[#allocation2] sm:$0xff] %vm2088_vm10, %v2014_v37  ;;  %v3114_v37 = vrot.slane %v3106_v3, %v8348_v5  ;;  %v1450_v31 = vrot.slane %v1448_v36, 2 }
  0xb3   : > { %2607 = vst.msk [vmem:[#allocation2] sm:$0xff] %vm2606_vm11, %v2532_v9  ;;  %v2267_v9 = vcombine.low %v9095_v16, %v9083_v24  ;;  %v1453_v16 = vrot.slane %v1451_v26, 2  ;;  %v3097_v3 = vrot.slane %v3089_v20, %v8348_v5  ;;  %v3514_v20 = vrot.slane %v7717_v63, %v8348_v5 }
  0xb4   : > { %3446 = vst.msk [vmem:[#allocation2 + $0x8] sm:$0xff] %vm3444_vm13, %v3372_v17  ;;  %2029 = vrot.lane.b32.xlu0 %v1749_v27, %s8242_s22  ;;  %v2724_v27 = vcombine.low %v9385_v54, %v2723_v50  ;;  %v1005_v17 = vcombine.low %v9431_v42, %v9351_v43  ;;  %v13429_v54 = vrot.slane %v9195_v48, 7  ;;  %v9526_v28 = vsel %vm8499_vm6, %v1450_v31, %v1451_v26 }
  0xb5   : > { %3690 = vst.msk [vmem:[#allocation2 + $0x8] sm:$0xff] %vm3688_vm14, %v9330_v47  ;;  %2549 = vrot.lane.b32.xlu1 %v2284_v25, %s8238_s18  ;;  %v1457_v47 = vrot.slane %v9402_v57, 7  ;;  %v3122_v25 = vcombine.low %v3114_v37, %v3121_v61  ;;  %v1004_v26 = vcombine.low %v9468_v52, %v9394_v56  ;;  %v9551_v61 = vld [vmem:[%s8346_s17 + $0x80] sm:$0xff] }
  0xb6   : > { %2904 = vst.msk [vmem:[#allocation2] sm:$0xff] %vm2903_vm12, %v9267_v34  ;;  %v1438_v34 = vrot.slane %v9468_v52, 7  ;;  %v3370_v24 = vpop.permute.xlu0 %3369  ;;  %v1437_v50 = vrot.slane %v13429_v54, 2  ;;  %v2320_v54 = vcombine.low %v9351_v43, %v9380_v62  ;;  %v935_v43 = vcombine.low %v8827_v6, %v8987_v22 }
  0xb7   : > { %3891 = vst.msk [vmem:[#allocation2 + $0x8] sm:$0xff] %vm3889_vm15, %v9382_v23  ;;  %v3104_v23 = vrot.slane %v3090_v58, %v8348_v5  ;;  %v7700_v58 = vrot.slane %v9394_v56, 9  ;;  %v9573_v63 = vrot.slane %v1004_v26, %v8348_v5  ;;  %v2303_v62 = vcombine.low %v9195_v48, %v9468_v52  ;;  %v296_v26 = vld [vmem:[%s8346_s17 + $0x90] sm:$0xff] }
  0xb8   : > { %3445 = vst.msk [vmem:[#allocation2] sm:$0xff] %vm3444_vm13, %v3370_v24  ;;  %2547 = vrot.lane.b32.xlu0 %v2267_v9, %s8238_s18  ;;  %v9516_v24 = vsel %vm8499_vm6, %v1447_v39, %v1448_v36  ;;  %v1440_v59 = vrot.slane %v1438_v34, 2  ;;  %v9532_v36 = vsel %vm8499_vm6, %v1453_v16, %v1454_v30  ;;  %v9546_v30 = vrot.slane %v1005_v17, %v8348_v5 }
  0xb9   : > { %3689 = vst.msk [vmem:[#allocation2] sm:$0xff] %vm3688_vm14, %v9306_v51  ;;  %2846 = vrot.lane.b32.xlu1 %v9407_v29, %s8239_s19  ;;  %v1441_v51 = vrot.slane %v9499_v46, 7  ;;  %v9538_v29 = vsel %vm8499_vm6, %v1456_v33, %v1457_v47  ;;  %v3105_v9 = vcombine.low %v3097_v3, %v3104_v23  ;;  %v1802_v37 = vcombine.low %v9516_v24, %v9526_v28 }
  0xba   : > { %3890 = vst.msk [vmem:[#allocation2] sm:$0xff] %vm3889_vm15, %v9344_v38  ;;  %13430 = vst [vmem:[#allocation20_spill] sm:$0xff] %v9546_v30  ;;  %v1818_v39 = vcombine.low %v9532_v36, %v9538_v29  ;;  %v9558_v31 = vsel %vm8499_vm6, %v1437_v50, %v1438_v34  ;;  %v9568_v33 = vsel %vm8499_vm6, %v7700_v58, %v1445_v21  ;;  %v295_v34 = vld [vmem:[%s8346_s17 + $0x88] sm:$0xff] }
  0xbb   : > { %v4022_v38 = vpop.permute.xlu1 %4021  ;;  %v9562_v16 = vsel %vm8499_vm6, %v1440_v59, %v1441_v51  ;;  %v3515_v23 = vcombine.low %v9321_v32, %v3514_v20  ;;  %13431 = vst [vmem:[#allocation21_spill] sm:$0xff] %v9573_v63  ;;  %v1785_v21 = vcombine.low %v9440_v13, %v9558_v31  ;;  %v2336_v50 = vcombine.low %v9370_v7, %v9402_v57 }
  0xbc   : > { %2844 = vrot.lane.b32.xlu0 %v2724_v27, %s8239_s19  ;;  %4096 = vst.msk [vmem:[#allocation2 + $0x8] sm:$0xff] %vm4094_vm0, %v4022_v38  ;;  %v1801_v17 = vcombine.low %v9562_v16, %v9568_v33  ;;  %v3759_v59 = vcombine.low %v9546_v30, %v9443_v14  ;;  %v9595_v51 = vrot.slane %v1802_v37, %v8348_v5 }
  0xbd   : > { %3387 = vrot.lane.b32.xlu1 %v3122_v25, %s8243_s23  ;;  %v9578_v25 = vcombine.high %v9551_v61, %v9551_v61  ;;  %v9598_v13 = vrot.slane %v1818_v39, %v8348_v5  ;;  %v9601_v38 = vrot.slane %v295_v34, %v8348_v5  ;;  %v7710_v14 = vcombine.high %v9468_v52, %v9394_v56 }
  0xbe   : > { %v4020_v27 = vpop.permute.xlu0 %4019  ;;  %v9620_v6 = vrot.slane %v1785_v21, %v8348_v5  ;;  %v9623_v22 = vrot.slane %v1801_v17, %v8348_v5  ;;  %v9626_v48 = vrot.slane %v2320_v54, %v8348_v5  ;;  %1249 = vst.msk [vmem:[#allocation2 + $0x38] sm:$0xff] %vm1241_vm7, %v935_v43  ;;  %v9635_v37 = vcombine.high %v295_v34, %v295_v34 }
  0xbf   : > { %4095 = vst.msk [vmem:[#allocation2] sm:$0xff] %vm4094_vm0, %v4020_v27  ;;  %v4170_v3 = vpop.permute.xlu1 %4169  ;;  %13432 = vst [vmem:[#allocation22_spill] sm:$0xff] %v9578_v25  ;;  %v9614_v20 = vrot.slane %v9578_v25, %v8348_v5  ;;  %v9639_v27 = vcombine.high %v9601_v38, %v9601_v38  ;;  %v9645_v21 = vrot.slane %v2303_v62, %v8348_v5  ;;  %v1460_v62 = vrot.slane %v9398_v12, 7 }
  0xc0   : > { %3385 = vrot.lane.b32.xlu0 %v3105_v9, %s8243_s23  ;;  %4244 = vst.msk [vmem:[#allocation2 + $0x8] sm:$0xff] %vm4242_vm1, %v4170_v3  ;;  %v3948_v9 = vcombine.low %v9595_v51, %v9598_v13  ;;  %13433 = vst [vmem:[#allocation23_spill] sm:$0xff] %v9635_v37  ;;  %v9641_v3 = vcombine.high %v296_v26, %v296_v26  ;;  %v9648_v17 = vrot.slane %v7710_v14, %v8348_v5 }
  0xc1   : > { %3631 = vrot.lane.b32.xlu1 %v9246_v0, %s8240_s20  ;;  %v3758_v0 = vcombine.low %v9226_v44, %v9573_v63  ;;  %v9629_v44 = vrot.slane %v2336_v50, %v8348_v5  ;;  %v9654_v54 = vcombine.high %v9614_v20, %v9614_v20  ;;  %v3947_v50 = vcombine.low %v9620_v6, %v9623_v22 }
  0xc2   : > { %v4168_v58 = vpop.permute.xlu0 %4167  ;;  %13434 = vst [vmem:[#allocation24_spill] sm:$0xff] %v9641_v3  ;;  %v1800_v43 = vcombine.low %v9342_v45, %v9620_v6  ;;  %v9674_v14 = vrot.slane %v9635_v37, %v8348_v5  ;;  %v1479_v6 = vrot.slane %v9639_v27, 7  ;;  %v3140_v45 = vcombine.low %v9526_v28, %v9532_v36 }
  0xc3   : > { %4243 = vst.msk [vmem:[#allocation2] sm:$0xff] %vm4242_vm1, %v4168_v58  ;;  %v2020_v7 = vpop.permute.xlu1 %2019  ;;  %v9662_v58 = vcombine.low %v9626_v48, %v9629_v44  ;;  %v1473_v37 = vrot.slane %v9654_v54, 7  ;;  %v3123_v36 = vcombine.low %v9558_v31, %v9562_v16  ;;  %v2354_v32 = vcombine.low %v9654_v54, %v9601_v38 }
  0xc4   : > { %3629 = vrot.lane.b32.xlu0 %v3515_v23, %s8240_s20  ;;  %2092 = vst.msk [vmem:[#allocation2 + $0x18] sm:$0xff] %vm2088_vm10, %v2020_v7  ;;  %v2726_v7 = vcombine.low %v9394_v56, %v9431_v42  ;;  %v9681_v42 = vrot.slane %v9641_v3, %v8348_v5  ;;  %v9684_v56 = vrot.slane %v296_v26, %v8348_v5  ;;  %v13436_v3 = vmov 0.0  }
  0xc5   : > { %3832 = vrot.lane.b32.xlu1 %v3759_v59, %s8241_s21  ;;  %v4125_v26 = vcombine.low %v9645_v21, %v9648_v17  ;;  %v9732_v35 = vrot.slane %v3140_v45, %v8348_v5  ;;  %v1475_v25 = vrot.slane %v1473_v37, 2 }
  0xc6   : > { %v2018_v39 = vpop.permute.xlu0 %2017  ;;  %v9728_v31 = vcombine.high %v9684_v56, %v9684_v56 }
  0xc7   : > { %2091 = vst.msk [vmem:[#allocation2 + $0x10] sm:$0xff] %vm2088_vm10, %v2018_v39  ;;  %v2538_v23 = vpop.permute.xlu1 %2537  ;;  %v4270_v59 = vld [vmem:[#allocation2 + $0x8] sm:$0xff]  ;;  %v1476_v39 = vrot.slane %v9601_v38, 7 }
  0xc8   : > { %3830 = vrot.lane.b32.xlu0 %v3758_v0, %s8241_s21  ;;  %2610 = vst.msk [vmem:[#allocation2 + $0x18] sm:$0xff] %vm2606_vm11, %v2538_v23  ;;  %v1459_v0 = vrot.slane %v1457_v47, 2 }
  0xc9   : > { %4037 = vrot.lane.b32.xlu1 %v3948_v9, %s8244_s29 }
  0xca   : > { %v2536_v23 = vpop.permute.xlu0 %2535  ;;  %v4269_v34 = vld [vmem:[#allocation2] sm:$0xff]  ;;  %v9710_v28 = vsel %vm8499_vm6, %v1459_v0, %v1460_v62  ;;  %v9724_v0 = vcombine.high %v9681_v42, %v9681_v42 }
  0xcb   : > { %2609 = vst.msk [vmem:[#allocation2 + $0x10] sm:$0xff] %vm2606_vm11, %v2536_v23  ;;  %v4294_v57 = vpack.c.bf16 %v4270_v59, %v4269_v34  ;;  %v2835_v47 = vpop.permute.xlu1 %2834  ;;  %v2318_v34 = vcombine.low %v9376_v4, %v9645_v21  ;;  %v9699_v59 = vrot.slane %v2726_v7, %v8348_v5  ;;  %v9703_v23 = vrot.slane %v9551_v61, %v8348_v5  ;;  %v9716_v7 = vld [vmem:[%s8346_s17 + $0x98] sm:$0xff] }
  0xcc   : > { %4035 = vrot.lane.b32.xlu0 %v3947_v50, %s8244_s29  ;;  %2907 = vst.msk [vmem:[#allocation2 + $0x18] sm:$0xff] %vm2903_vm12, %v2835_v47  ;;  %v1478_v4 = vrot.slane %v1476_v39, 2  ;;  %v1482_v50 = vrot.slane %v9674_v14, 7  ;;  %v13435_v61 = vrot.slane %v9614_v20, 7  ;;  %v3141_v2 = vcombine.low %v9538_v29, %v9710_v28 }
  0xcd   : > { %7846 = vmatmul.mubr.msk.bf16.vlgmr.msra.gmra.mrb[0].mxu0 %vm4334_vm2, %v4294_v57  ;;  %4185 = vrot.lane.b32.xlu1 %v9662_v58, %s8245_s8  ;;  %v1481_v57 = vrot.slane %v1479_v6, 2  ;;  %v9748_v45 = vcombine.high %v9703_v23, %v9703_v23  ;;  %v9762_v29 = vcombine.high %v9674_v14, %v9674_v14  ;;  %v7701_v63 = vrot.slane %v9703_v23, 9 }
  0xce   : > { %v2833_v47 = vpop.permute.xlu0 %2832  ;;  %v1472_v9 = vrot.slane %v13435_v61, 2  ;;  %7849 = vmatprep.mubr.msk.bf16.mxu0 %vm8247_vm9, %v13436_v3  ;;  %v3124_v61 = vcombine.low %v9568_v33, %v9516_v24  ;;  %v9752_v24 = vrot.slane %v9716_v7, %v8348_v5  ;;  %v2734_v33 = vcombine.low %v9645_v21, %v9699_v59 }
  0xcf   : > { %2906 = vst.msk [vmem:[#allocation2 + $0x10] sm:$0xff] %vm2903_vm12, %v2833_v47  ;;  %v3376_v16 = vpop.permute.xlu1 %3375  ;;  %v3516_v47 = vcombine.low %v9468_v52, %v9499_v46  ;;  %v9766_v52 = vsel %vm8499_vm6, %v1478_v4, %v1479_v6  ;;  %v1072_v59 = vcombine.low %v9728_v31, %v9681_v42  ;;  %v9783_v6 = vsel %vm8499_vm6, %v1475_v25, %v1476_v39 }
  0xd0   : > { %4183 = vrot.lane.b32.xlu0 %v4125_v26, %s8245_s8  ;;  %3448 = vst.msk [vmem:[#allocation2 + $0x18] sm:$0xff] %vm3444_vm13, %v3376_v16  ;;  %v9758_v26 = vrot.slane %v3123_v36, %v8348_v5  ;;  %v9770_v16 = vsel %vm8499_vm6, %v1472_v9, %v1473_v37  ;;  %v1073_v21 = vcombine.low %v9724_v0, %v9752_v24  ;;  %v1462_v4 = vrot.slane %v1460_v62, 2 }
  0xd1   : > { %2035 = vrot.lane.b32.xlu1 %v1800_v43, %s8242_s22  ;;  %v9774_v43 = vsel %vm8499_vm6, %v1481_v57, %v1482_v50  ;;  %v1463_v37 = vrot.slane %v9738_v40, 7  ;;  %v13437_v57 = vcombine.low %v9365_v11, %v9339_v41  ;;  %v9795_v49 = vrot.slane %v3124_v61, %v8348_v5 }
  0xd2   : > { %v3374_v46 = vpop.permute.xlu0 %3373  ;;  %v9798_v25 = vrot.slane %v3516_v47, %v8348_v5  ;;  %v1467_v62 = vrot.slane %v9748_v45, 7  ;;  %v1039_v39 = vcombine.low %v9614_v20, %v9654_v54  ;;  %v1055_v41 = vcombine.low %v9601_v38, %v9639_v27 }
  0xd3   : > { %3447 = vst.msk [vmem:[#allocation2 + $0x10] sm:$0xff] %vm3444_vm13, %v3374_v46  ;;  %v3620_v36 = vpop.permute.xlu1 %3619  ;;  %v3155_v46 = vrot.slane %v3141_v2, %v8348_v5  ;;  %v1038_v11 = vcombine.low %v9703_v23, %v9748_v45  ;;  %v1484_v2 = vrot.slane %v1482_v50, 2  ;;  %v1836_v61 = vcombine.low %v9770_v16, %v9783_v6 }
  0xd4   : > { %2033 = vrot.lane.b32.xlu0 %v13437_v57, %s8242_s22  ;;  %3692 = vst.msk [vmem:[#allocation2 + $0x18] sm:$0xff] %vm3688_vm14, %v3620_v36  ;;  %v1852_v47 = vcombine.low %v9766_v52, %v9774_v43  ;;  %v9813_v57 = vrot.slane %v1073_v21, %v8348_v5  ;;  %v1485_v1 = vrot.slane %v9762_v29, 7  ;;  %v9822_v50 = vsel %vm8499_vm6, %v1462_v4, %v1463_v37 }
  0xd5   : > { %2553 = vrot.lane.b32.xlu1 %v2318_v34, %s8238_s18  ;;  %v9816_v34 = vrot.slane %v1072_v59, %v8348_v5  ;;  %v13438_v21 = vcombine.low %v9388_v18, %v9356_v15  ;;  %v1469_v59 = vrot.slane %v1467_v62, 2  ;;  %v952_v37 = vcombine.low %v9041_v53, %v9017_v60 }
  0xd6   : > { %v3618_v36 = vpop.permute.xlu0 %3617  ;;  %v3156_v38 = vcombine.low %v9732_v35, %v3155_v46  ;;  %v9844_v15 = vrot.slane %v1039_v39, %v8348_v5  ;;  %v9847_v18 = vrot.slane %v1055_v41, %v8348_v5  ;;  %v3524_v60 = vcombine.low %v9798_v25, %v9546_v30 }
  0xd7   : > { %3691 = vst.msk [vmem:[#allocation2 + $0x10] sm:$0xff] %vm3688_vm14, %v3618_v36  ;;  %v3821_v9 = vpop.permute.xlu1 %3820  ;;  %v2370_v36 = vcombine.low %v9639_v27, %v9674_v14  ;;  %v9836_v4 = vcombine.low %v9816_v34, %v9813_v57  ;;  %v9850_v27 = vrot.slane %v1038_v11, %v8348_v5  ;;  %v9857_v53 = vrot.slane %v1836_v61, %v8348_v5  ;;  %v298_v11 = vld [vmem:[%s8346_s17 + $0xa0] sm:$0xff] }
  0xd8   : > { %2551 = vrot.lane.b32.xlu0 %v13438_v21, %s8238_s18  ;;  %3893 = vst.msk [vmem:[#allocation2 + $0x18] sm:$0xff] %vm3889_vm15, %v3821_v9  ;;  %v3139_v9 = vcombine.low %v9758_v26, %v9795_v49  ;;  %v9860_v35 = vrot.slane %v1852_v47, %v8348_v5  ;;  %v9868_v49 = vsel %vm8499_vm6, %v1484_v2, %v1485_v1  ;;  %v13441_v39 = vrot.slane %v9614_v20, 7  ;;  %v9919_v21 = vld [vmem:[%s8346_s17 + $0xa8] sm:$0xff] }
  0xd9   : > { %13439 = vst [vmem:[#allocation25_spill] sm:$0xff] %v9836_v4  ;;  %2850 = vrot.lane.b32.xlu1 %v9662_v58, %s8239_s19  ;;  %13440 = vst [vmem:[#allocation26_spill] sm:$0xff] %v9850_v27  ;;  %v1468_v26 = vsel %vm8499_vm6, %v7701_v63, %v1467_v62  ;;  %v1819_v46 = vcombine.low %v9710_v28, %v9822_v50  ;;  %v2337_v25 = vcombine.low %v9398_v12, %v9738_v40 }
  0xda   : > { %v3819_v54 = vpop.permute.xlu0 %3818  ;;  %1258 = vst.msk [vmem:[#allocation2 + $0x80] sm:$0xff] %vm1241_vm7, %v9836_v4  ;;  %1250 = vst.msk [vmem:[#allocation2 + $0x40] sm:$0xff] %vm1241_vm7, %v952_v37  ;;  %v1471_v41 = vsel %vm8499_vm6, %v1469_v59, %v13441_v39  ;;  %v9883_v1 = vrot.slane %v2354_v32, %v8348_v5  ;;  %v9886_v63 = vrot.slane %v2370_v36, %v8348_v5 }
  0xdb   : > { %3892 = vst.msk [vmem:[#allocation2 + $0x10] sm:$0xff] %vm3889_vm15, %v3819_v54  ;;  %v4026_v58 = vpop.permute.xlu1 %4025  ;;  %v2353_v28 = vcombine.low %v9748_v45, %v9614_v20  ;;  %v3761_v40 = vcombine.low %v9844_v15, %v9847_v18  ;;  %v3174_v62 = vcombine.low %v9783_v6, %v9766_v52  ;;  %v9899_v32 = vcombine.high %v9716_v7, %v9716_v7 }
  0xdc   : > { %2848 = vrot.lane.b32.xlu0 %v2734_v33, %s8239_s19  ;;  %4098 = vst.msk [vmem:[#allocation2 + $0x18] sm:$0xff] %vm4094_vm0, %v4026_v58  ;;  %13442 = vst [vmem:[#allocation27_spill] sm:$0xff] %v9886_v63  ;;  %v3760_v33 = vcombine.low %v9446_v19, %v9850_v27  ;;  %v3175_v20 = vcombine.low %v9774_v43, %v9868_v49  ;;  %v3950_v45 = vcombine.low %v9857_v53, %v9860_v35 }
  0xdd   : > { %3391 = vrot.lane.b32.xlu1 %v3156_v38, %s8243_s23  ;;  %13443 = vst [vmem:[#allocation28_spill] sm:$0xff] %v9899_v32  ;;  %v3157_v61 = vcombine.low %v9822_v50, %v1468_v26  ;;  %v9907_v47 = vcombine.high %v298_v11, %v298_v11  ;;  %v9911_v52 = vrot.slane %v1819_v46, %v8348_v5  ;;  %13445 = vst [vmem:[#allocation30_spill] sm:$0xff] %v9919_v21 }
  0xde   : > { %v4024_v2 = vpop.permute.xlu0 %4023  ;;  %v1835_v7 = vcombine.low %v1468_v26, %v1471_v41  ;;  %v9914_v6 = vrot.slane %v2337_v25, %v8348_v5  ;;  %v3158_v50 = vcombine.low %v1471_v41, %v9770_v16  ;;  %v9926_v59 = vcombine.low %v9883_v1, %v9886_v63 }
  0xdf   : > { %13444 = vst [vmem:[#allocation29_spill] sm:$0xff] %v9907_v47  ;;  %4097 = vst.msk [vmem:[#allocation2 + $0x10] sm:$0xff] %vm4094_vm0, %v4024_v2  ;;  %v4174_v19 = vpop.permute.xlu1 %4173  ;;  %v9929_v36 = vrot.slane %v2353_v28, %v8348_v5  ;;  %v9932_v37 = vrot.slane %v298_v11, %v8348_v5  ;;  %v2736_v54 = vcombine.low %v9398_v12, %v9703_v23 }
  0xe0   : > { %3389 = vrot.lane.b32.xlu0 %v3139_v9, %s8243_s23  ;;  %4246 = vst.msk [vmem:[#allocation2 + $0x18] sm:$0xff] %vm4242_vm1, %v4174_v19  ;;  %v9942_v16 = vrot.slane %v9899_v32, %v8348_v5  ;;  %v9946_v9 = vcombine.high %v9752_v24, %v9752_v24  ;;  %v9954_v46 = vrot.slane %v9919_v21, %v8348_v5 }
  0xe1   : > { %3635 = vrot.lane.b32.xlu1 %v9455_v10, %s8240_s20  ;;  %v9958_v25 = vrot.slane %v9907_v47, %v8348_v5  ;;  %v9962_v41 = vrot.slane %v1835_v7, %v8348_v5  ;;  %v9965_v28 = vrot.slane %v3174_v62, %v8348_v5  ;;  %v9968_v11 = vrot.slane %v3175_v20, %v8348_v5 }
  0xe2   : > { %v4172_v58 = vpop.permute.xlu0 %4171  ;;  %v9971_v2 = vrot.slane %v3157_v61, %v8348_v5  ;;  %v1498_v7 = vrot.slane %v9752_v24, 7  ;;  %v9981_v62 = vcombine.high %v9932_v37, %v9932_v37  ;;  %v9985_v20 = vrot.slane %v2736_v54, %v8348_v5 }
  0xe3   : > { %4245 = vst.msk [vmem:[#allocation2 + $0x10] sm:$0xff] %vm4242_vm1, %v4172_v58  ;;  %v2024_v39 = vpop.permute.xlu1 %2023  ;;  %13446 = vst [vmem:[#allocation31_spill] sm:$0xff] %v9968_v11  ;;  %v1501_v61 = vrot.slane %v9946_v9, 7  ;;  %v9994_v38 = vcombine.high %v9942_v16, %v9942_v16  ;;  %v9998_v43 = vcombine.high %v9954_v46, %v9954_v46  ;;  %v3949_v26 = vcombine.low %v9911_v52, %v9962_v41 }
  0xe4   : > { %13447 = vst [vmem:[#allocation32_spill] sm:$0xff] %v9971_v2  ;;  %3633 = vrot.lane.b32.xlu0 %v3524_v60, %s8240_s20  ;;  %2094 = vst.msk [vmem:[#allocation2 + $0x28] sm:$0xff] %vm2088_vm10, %v2024_v39  ;;  %v9988_v60 = vrot.slane %v3158_v50, %v8348_v5  ;;  %v1504_v39 = vrot.slane %v9942_v16, 7  ;;  %v2405_v50 = vcombine.low %v9981_v62, %v9958_v25  ;;  %v1500_v27 = vrot.slane %v1498_v7, 2 }
  0xe5   : > { %13448 = vst [vmem:[#allocation33_spill] sm:$0xff] %v9981_v62  ;;  %3836 = vrot.lane.b32.xlu1 %v3761_v40, %s8241_s21  ;;  %v10002_v40 = vcombine.high %v9958_v25, %v9958_v25  ;;  %v3534_v58 = vcombine.low %v9674_v14, %v9762_v29  ;;  %v7718_v47 = vcombine.high %v9398_v12, %v9703_v23  ;;  %v1503_v29 = vrot.slane %v1501_v61, 2 }
  0xe6   : > { %13449 = vst [vmem:[#allocation34_spill] sm:$0xff] %v9988_v60  ;;  %v2022_v10 = vpop.permute.xlu0 %2021  ;;  %v10020_v30 = vrot.slane %v2405_v50, %v8348_v5  ;;  %v1507_v63 = vrot.slane %v9994_v38, 7  ;;  %v1107_v50 = vcombine.low %v9954_v46, %v9998_v43  ;;  %v1489_v2 = vrot.slane %v9728_v31, 7 }
  0xe7   : > { %13450 = vst [vmem:[#allocation35_spill] sm:$0xff] %v10002_v40  ;;  %2093 = vst.msk [vmem:[#allocation2 + $0x20] sm:$0xff] %vm2088_vm10, %v2022_v10  ;;  %v2542_v54 = vpop.permute.xlu1 %2541  ;;  %v4272_v32 = vld [vmem:[#allocation2 + $0x18] sm:$0xff]  ;;  %v13451_v10 = vrot.slane %v9724_v0, 7  ;;  %v2421_v19 = vcombine.low %v10002_v40, %v9954_v46  ;;  %v1106_v62 = vcombine.low %v9958_v25, %v10002_v40  ;;  %v10040_v60 = vrot.slane %v3534_v58, %v8348_v5 }
  0xe8   : > { %3834 = vrot.lane.b32.xlu0 %v3760_v33, %s8241_s21  ;;  %2612 = vst.msk [vmem:[#allocation2 + $0x28] sm:$0xff] %vm2606_vm11, %v2542_v54  ;;  %13452 = vst [vmem:[#allocation36_spill] sm:$0xff] %v10020_v30  ;;  %v1506_v33 = vrot.slane %v1504_v39, 2  ;;  %v300_v54 = vld [vmem:[%s8346_s17 + $0xb0] sm:$0xff]  ;;  %v1492_v11 = vrot.slane %v9681_v42, 7 }
  0xe9   : > { %v1497_v4 = vrot.slane %v13451_v10, 2  ;;  %4041 = vrot.lane.b32.xlu1 %v3950_v45, %s8244_s29  ;;  %v10036_v45 = vrot.slane %v2421_v19, %v8348_v5  ;;  %v10069_v58 = vcombine.high %v300_v54, %v300_v54 }
  0xea   : > { %v2540_v21 = vpop.permute.xlu0 %2539  ;;  %v4271_v10 = vld [vmem:[#allocation2 + $0x10] sm:$0xff] }
  0xeb   : > { %13453 = vst [vmem:[#allocation37_spill] sm:$0xff] %v10036_v45  ;;  %2611 = vst.msk [vmem:[#allocation2 + $0x20] sm:$0xff] %vm2606_vm11, %v2540_v21  ;;  %v4295_v12 = vpack.c.bf16 %v4272_v32, %v4271_v10  ;;  %v2839_v23 = vpop.permute.xlu1 %2838  ;;  %v10048_v40 = vsel %vm8499_vm6, %v1497_v4, %v1498_v7  ;;  %v10052_v21 = vsel %vm8499_vm6, %v1500_v27, %v1501_v61  ;;  %v7702_v27 = vrot.slane %v9684_v56, 9 }
  0xec   : > { %4039 = vrot.lane.b32.xlu0 %v3949_v26, %s8244_s29  ;;  %2909 = vst.msk [vmem:[#allocation2 + $0x28] sm:$0xff] %vm2903_vm12, %v2839_v23  ;;  %v10055_v32 = vrot.slane %v300_v54, %v8348_v5  ;;  %v10059_v19 = vcombine.low %v10020_v30, %v10036_v45  ;;  %v1089_v4 = vcombine.low %v9946_v9, %v9942_v16  ;;  %13455 = vst [vmem:[#allocation39_spill] sm:$0xff] %v10069_v58  ;;  %v301_v30 = vld [vmem:[%s8346_s17 + $0xb8] sm:$0xff] }
  0xed   : > { %7850 = vmatmul.mubr.msk.bf16.gmra.mrb[4].mxu0 %vm4334_vm2, %v4295_v12  ;;  %4189 = vrot.lane.b32.xlu1 %v9926_v59, %s8245_s8  ;;  %v1056_v26 = vcombine.low %v9674_v14, %v9684_v56  ;;  %v10073_v61 = vsel %vm8499_vm6, %v1503_v29, %v1504_v39  ;;  %v10077_v12 = vsel %vm8499_vm6, %v1506_v33, %v1507_v63  ;;  %v1491_v29 = vrot.slane %v1489_v2, 2 }
  0xee   : > { %13454 = vst [vmem:[#allocation38_spill] sm:$0xff] %v10059_v19  ;;  %v2837_v7 = vpop.permute.xlu0 %2836  ;;  %7853 = vmatprep.mubr.msk.bf16.mxu0 %vm8247_vm9, %v13436_v3  ;;  %v10082_v23 = vrot.slane %v1107_v50, %v8348_v5  ;;  %v10085_v10 = vrot.slane %v1106_v62, %v8348_v5  ;;  %v1870_v39 = vcombine.low %v10048_v40, %v10052_v21  ;;  %v1494_v45 = vrot.slane %v1492_v11, 2 }
  0xef   : > { %2908 = vst.msk [vmem:[#allocation2 + $0x20] sm:$0xff] %vm2903_vm12, %v2837_v7  ;;  %v3380_v54 = vpop.permute.xlu1 %3379  ;;  %v2388_v63 = vcombine.low %v9752_v24, %v9946_v9  ;;  %v13458_v33 = vcombine.low %v9914_v6, %v9929_v36  ;;  %v2404_v62 = vcombine.low %v9942_v16, %v9994_v38  ;;  %v10101_v50 = vcombine.high %v10055_v32, %v10055_v32  ;;  %v13461_v24 = vld [vmem:[#allocation17_spill] sm:$0xff] }
  0xf0   : > { %13456 = vst [vmem:[#allocation40_spill] sm:$0xff] %v10082_v23  ;;  %13457 = vst [vmem:[#allocation41_spill] sm:$0xff] %v10085_v10  ;;  %v10105_v7 = vcombine.low %v10085_v10, %v10082_v23  ;;  %v986_v9 = vcombine.low %v13461_v24, %v9287_v55  ;;  %v1886_v38 = vcombine.low %v10073_v61, %v10077_v12  ;;  %v13477_v23 = vld [vmem:[#allocation34_spill] sm:$0xff] }
  0xf1   : > { %4187 = vrot.lane.b32.xlu0 %v13458_v33, %s8245_s8  ;;  %3450 = vst.msk [vmem:[#allocation2 + $0x28] sm:$0xff] %vm3444_vm13, %v3380_v54  ;;  %13459 = vst [vmem:[#allocation42_spill] sm:$0xff] %v10101_v50  ;;  %v13462_v33 = vcombine.low %v9598_v13, %v9911_v52  ;;  %v10115_v54 = vrot.slane %v7718_v47, %v8348_v5  ;;  %v10121_v19 = vsel %vm8499_vm6, %v7702_v27, %v1489_v2 }
  0xf2   : > { %13460 = vst [vmem:[#allocation43_spill] sm:$0xff] %v10105_v7  ;;  %v10125_v10 = vrot.slane %v10069_v58, %v8348_v5  ;;  %v3378_v55 = vpop.permute.xlu0 %3377  ;;  %v10130_v13 = vrot.slane %v1089_v4, %v8348_v5  ;;  %v10133_v47 = vrot.slane %v1056_v26, %v8348_v5  ;;  %1260 = vst.msk [vmem:[#allocation2 + $0x90] sm:$0xff] %vm1241_vm7, %v10105_v7  ;;  %v13463_v26 = vrot.slane %v9724_v0, 7 }
  0xf3   : > { %2039 = vrot.lane.b32.xlu1 %v13462_v33, %s8242_s22  ;;  %1252 = vst.msk [vmem:[#allocation2 + $0x50] sm:$0xff] %vm1241_vm7, %v986_v9  ;;  %v3624_v2 = vpop.permute.xlu1 %3623  ;;  %v10142_v27 = vrot.slane %v1870_v39, %v8348_v5  ;;  %v10146_v4 = vsel %vm8499_vm6, %v1491_v29, %v1492_v11  ;;  %v10155_v52 = vrot.slane %v301_v30, %v8348_v5 }
  0xf4   : > { %3449 = vst.msk [vmem:[#allocation2 + $0x20] sm:$0xff] %vm3444_vm13, %v3378_v55  ;;  %v10152_v33 = vsel %vm8499_vm6, %v1494_v45, %v13463_v26  ;;  %v13464_v9 = vcombine.low %v9623_v22, %v9595_v51  ;;  %v1853_v11 = vcombine.low %v9868_v49, %v10121_v19  ;;  %v10165_v39 = vrot.slane %v2388_v63, %v8348_v5 }
  0xf5   : > { %3694 = vst.msk [vmem:[#allocation2 + $0x28] sm:$0xff] %vm3688_vm14, %v3624_v2  ;;  %v10168_v29 = vrot.slane %v2404_v62, %v8348_v5  ;;  %v13330_v45 = vrot.slane %v10101_v50, 7  ;;  %v13465_v55 = vcombine.low %v9629_v44, %v9914_v6  ;;  %v10176_v51 = vrot.slane %v1886_v38, %v8348_v5 }
  0xf6   : > { %2037 = vrot.lane.b32.xlu0 %v13464_v9, %s8242_s22  ;;  %v7711_v22 = vcombine.high %v9674_v14, %v9684_v56  ;;  %v1536_v49 = vrot.slane %v10125_v10, 7  ;;  %v10183_v63 = vcombine.high %v10125_v10, %v10125_v10  ;;  %v3622_v62 = vpop.permute.xlu0 %3621  ;;  %v1869_v2 = vcombine.low %v10146_v4, %v10152_v33 }
  0xf7   : > { %2557 = vrot.lane.b32.xlu1 %v13465_v55, %s8238_s18  ;;  %v2387_v44 = vcombine.low %v9681_v42, %v9724_v0  ;;  %v1535_v6 = vrot.slane %v13330_v45, 2  ;;  %v10191_v38 = vcombine.high %v301_v30, %v301_v30  ;;  %3693 = vst.msk [vmem:[#allocation2 + $0x20] sm:$0xff] %vm3688_vm14, %v3622_v62  ;;  %v3825_v14 = vpop.permute.xlu1 %3824  ;;  %v10200_v55 = vcombine.high %v10155_v52, %v10155_v52 }
  0xf8   : > { %v1538_v24 = vrot.slane %v1536_v49, 2  ;;  %v13467_v42 = vcombine.low %v9648_v17, %v9626_v48  ;;  %3895 = vst.msk [vmem:[#allocation2 + $0x28] sm:$0xff] %vm3889_vm15, %v3825_v14  ;;  %v10212_v62 = vrot.slane %v1853_v11, %v8348_v5  ;;  %v10221_v17 = vrot.slane %v7711_v22, %v8348_v5 }
  0xf9   : > { %13466 = vst [vmem:[#allocation17_spill] sm:$0xff] %v10191_v38  ;;  %v1539_v14 = vrot.slane %v10183_v63, 7  ;;  %v10226_v11 = vrot.slane %v1869_v2, %v8348_v5  ;;  %v10229_v0 = vrot.slane %v2387_v44, %v8348_v5  ;;  %v10237_v45 = vrot.slane %v10191_v38, %v8348_v5 }
  0xfa   : > { %2555 = vrot.lane.b32.xlu0 %v13467_v42, %s8238_s18  ;;  %v1542_v42 = vrot.slane %v10155_v52, 7  ;;  %v3823_v9 = vpop.permute.xlu0 %3822  ;;  %v1545_v48 = vrot.slane %v10200_v55, 7  ;;  %v13470_v44 = vcombine.low %v9985_v20, %v9929_v36  ;;  %v7703_v20 = vrot.slane %v9932_v37, 9 }
  0xfb   : > { %2854 = vrot.lane.b32.xlu1 %v9926_v59, %s8239_s19  ;;  %v10233_v59 = vsel %vm8499_vm6, %v1535_v6, %v1536_v49  ;;  %13469 = vst [vmem:[#allocation45_spill] sm:$0xff] %v10237_v45  ;;  %3894 = vst.msk [vmem:[#allocation2 + $0x20] sm:$0xff] %vm3889_vm15, %v3823_v9  ;;  %v4030_v22 = vpop.permute.xlu1 %4029  ;;  %v1540_v2 = vsel %vm8499_vm6, %v1538_v24, %v1539_v14  ;;  %v1541_v30 = vrot.slane %v1539_v14, 2  ;;  %v13471_v14 = vld [vmem:[#allocation31_spill] sm:$0xff] }
  0xfc   : > { %13468 = vst [vmem:[#allocation44_spill] sm:$0xff] %v10233_v59  ;;  %v1544_v26 = vrot.slane %v1542_v42, 2  ;;  %4100 = vst.msk [vmem:[#allocation2 + $0x28] sm:$0xff] %vm4094_vm0, %v4030_v22  ;;  %v2755_v6 = vcombine.low %v9942_v16, %v9932_v37  ;;  %v3208_v9 = vcombine.low %v10052_v21, %v10073_v61  ;;  %v1921_v24 = vcombine.low %v10233_v59, %v1540_v2 }
  0xfd   : > { %v13472_v38 = vcombine.low %v9965_v28, %v13471_v14  ;;  %v1543_v49 = vsel %vm8499_vm6, %v1541_v30, %v1542_v42  ;;  %v1140_v21 = vcombine.low %v10183_v63, %v10155_v52  ;;  %v2439_v28 = vcombine.low %v10125_v10, %v10183_v63  ;;  %v13475_v14 = vld [vmem:[#allocation27_spill] sm:$0xff] }
  0xfe   : > { %2852 = vrot.lane.b32.xlu0 %v13470_v44, %s8239_s19  ;;  %v13473_v44 = vld [vmem:[#allocation33_spill] sm:$0xff]  ;;  %v1546_v58 = vsel %vm8499_vm6, %v1544_v26, %v1545_v48  ;;  %v4028_v7 = vpop.permute.xlu0 %4027  ;;  %v10268_v61 = vrot.slane %v1921_v24, %v8348_v5  ;;  %v1141_v26 = vcombine.low %v10200_v55, %v10237_v45  ;;  %v1547_v42 = vrot.slane %v1545_v48, 2  ;;  %v13476_v24 = vld [vmem:[#allocation32_spill] sm:$0xff] }
  0xff   : > { %3395 = vrot.lane.b32.xlu1 %v13472_v38, %s8243_s23  ;;  %v1937_v59 = vcombine.low %v1543_v49, %v1546_v58  ;;  %4099 = vst.msk [vmem:[#allocation2 + $0x20] sm:$0xff] %vm4094_vm0, %v4028_v7  ;;  %v4178_v38 = vpop.permute.xlu1 %4177  ;;  %v2455_v22 = vcombine.low %v10155_v52, %v10200_v55  ;;  %v13478_v50 = vcombine.low %v13476_v24, %v13477_v23 }
 0x100   : > { %13474 = vst [vmem:[#allocation31_spill] sm:$0xff] %v10268_v61  ;;  %4248 = vst.msk [vmem:[#allocation2 + $0x28] sm:$0xff] %vm4242_vm1, %v4178_v38  ;;  %v13479_v63 = vcombine.low %v9684_v56, %v9728_v31  ;;  %v10296_v52 = vrot.slane %v2439_v28, %v8348_v5  ;;  %v13482_v23 = vcombine.low %v9847_v18, %v10040_v60  ;;  %v13338_v56 = vrot.slane %v10237_v45, 7  ;;  %v13484_v60 = vld [vmem:[#allocation30_spill] sm:$0xff] }
 0x101   : > { %v10293_v48 = vrot.slane %v1937_v59, %v8348_v5  ;;  %v10305_v55 = vrot.slane %v2755_v6, %v8348_v5  ;;  %v10309_v31 = vrot.slane %v2455_v22, %v8348_v5  ;;  %v13483_v28 = vrot.slane %v13473_v44, 7 }
 0x102   : > { %3393 = vrot.lane.b32.xlu0 %v13478_v50, %s8243_s23  ;;  %v10290_v30 = vrot.slane %v13479_v63, %v8348_v5  ;;  %13481 = vst [vmem:[#allocation27_spill] sm:$0xff] %v10296_v52  ;;  %v4176_v59 = vpop.permute.xlu0 %4175  ;;  %v10319_v24 = vcombine.high %v13484_v60, %v13484_v60  ;;  %v10322_v6 = vrot.slane %v1140_v21, %v8348_v5 }
 0x103   : > { %13480 = vst [vmem:[#allocation33_spill] sm:$0xff] %v10293_v48  ;;  %3639 = vrot.lane.b32.xlu1 %v13482_v23, %s8240_s20  ;;  %v10315_v38 = vsel %vm8499_vm6, %v7703_v20, %v13483_v28  ;;  %4247 = vst.msk [vmem:[#allocation2 + $0x20] sm:$0xff] %vm4242_vm1, %v4176_v59  ;;  %v2028_v63 = vpop.permute.xlu1 %2027  ;;  %v10328_v23 = vrot.slane %v1141_v26, %v8348_v5  ;;  %v10334_v20 = vsel %vm8499_vm6, %v1547_v42, %v13338_v56  ;;  %v10353_v56 = vld [vmem:[%s8346_s17 + $0xc8] sm:$0xff] }
 0x104   : > { %13485 = vst [vmem:[#allocation32_spill] sm:$0xff] %v10319_v24  ;;  %13486 = vst [vmem:[#allocation34_spill] sm:$0xff] %v10322_v6  ;;  %v10338_v28 = vcombine.low %v10296_v52, %v10309_v31  ;;  %v3259_v21 = vcombine.low %v1540_v2, %v1543_v49  ;;  %v13490_v60 = vcombine.low %v10115_v54, %v9844_v15  ;;  %v304_v2 = vld [vmem:[%s8346_s17 + $0xd0] sm:$0xff] }
 0x105   : > { %13487 = vst [vmem:[#allocation30_spill] sm:$0xff] %v10328_v23  ;;  %13488 = vst [vmem:[#allocation46_spill] sm:$0xff] %v10334_v20  ;;  %v3191_v26 = vcombine.low %v10121_v19, %v10146_v4  ;;  %v3192_v59 = vcombine.low %v10152_v33, %v10048_v40  ;;  %v7719_v42 = vcombine.high %v9942_v16, %v9932_v37 }
 0x106   : > { %13489 = vst [vmem:[#allocation47_spill] sm:$0xff] %v10338_v28  ;;  %3637 = vrot.lane.b32.xlu0 %v13490_v60, %s8240_s20  ;;  %2096 = vst.msk [vmem:[#allocation2 + $0x38] sm:$0xff] %vm2088_vm10, %v2028_v63  ;;  %v3260_v22 = vcombine.low %v1546_v58, %v10334_v20  ;;  %v13492_v54 = vcombine.low %v9813_v57, %v10130_v13  ;;  %v10363_v19 = vrot.slane %v3208_v9, %v8348_v5  ;;  %v2026_v58 = vpop.permute.xlu0 %2025  ;;  %v13497_v60 = vld [vmem:[#allocation21_spill] sm:$0xff] }
 0x107   : > { %13491 = vst [vmem:[#allocation48_spill] sm:$0xff] %v10353_v56  ;;  %v10366_v40 = vrot.slane %v3259_v21, %v8348_v5  ;;  %v10370_v16 = vcombine.low %v10322_v6, %v10328_v23  ;;  %v3209_v57 = vcombine.low %v10077_v12, %v10315_v38  ;;  %v10378_v33 = vrot.slane %v10319_v24, %v8348_v5  ;;  %v2546_v63 = vpop.permute.xlu1 %2545  ;;  %v13496_v21 = vld [vmem:[#allocation20_spill] sm:$0xff] }
 0x108   : > { %3840 = vrot.lane.b32.xlu1 %v13492_v54, %s8241_s21  ;;  %v10381_v9 = vrot.slane %v3260_v22, %v8348_v5  ;;  %2095 = vst.msk [vmem:[#allocation2 + $0x30] sm:$0xff] %vm2088_vm10, %v2026_v58  ;;  %v1020_v54 = vcombine.low %v13497_v60, %v13496_v21  ;;  %v10390_v49 = vcombine.high %v10353_v56, %v10353_v56  ;;  %v4274_v58 = vld [vmem:[#allocation2 + $0x28] sm:$0xff] }
 0x109   : > { %13493 = vst [vmem:[#allocation49_spill] sm:$0xff] %v10366_v40  ;;  %13494 = vst [vmem:[#allocation50_spill] sm:$0xff] %v10370_v16  ;;  %v10392_v12 = vcombine.high %v304_v2, %v304_v2  ;;  %v10395_v4 = vrot.slane %v304_v2, %v8348_v5  ;;  %v13500_v22 = vcombine.low %v10133_v47, %v9816_v34  ;;  %v1526_v48 = vrot.slane %v10378_v33, 7 }
 0x10a   : > { %13495 = vst [vmem:[#allocation51_spill] sm:$0xff] %v10381_v9  ;;  %1262 = vst.msk [vmem:[#allocation2 + $0xa0] sm:$0xff] %vm1241_vm7, %v10370_v16  ;;  %v10403_v50 = vrot.slane %v3191_v26, %v8348_v5  ;;  %v10406_v21 = vrot.slane %v3192_v59, %v8348_v5  ;;  %v10409_v60 = vrot.slane %v7719_v42, %v8348_v5  ;;  %v4273_v2 = vld [vmem:[#allocation2 + $0x20] sm:$0xff] }
 0x10b   : > { %13498 = vst [vmem:[#allocation20_spill] sm:$0xff] %v10390_v49  ;;  %13499 = vst [vmem:[#allocation21_spill] sm:$0xff] %v10392_v12  ;;  %3838 = vrot.lane.b32.xlu0 %v13500_v22, %s8241_s21  ;;  %v13501_v34 = vcombine.low %v10142_v27, %v10176_v51  ;;  %v10422_v26 = vrot.slane %v10390_v49, %v8348_v5  ;;  %v10426_v59 = vrot.slane %v10392_v12, %v8348_v5  ;;  %v2544_v22 = vpop.permute.xlu0 %2543  ;;  %v2843_v12 = vpop.permute.xlu1 %2842 }
 0x10c   : > { %2614 = vst.msk [vmem:[#allocation2 + $0x38] sm:$0xff] %vm2606_vm11, %v2546_v63  ;;  %v10430_v42 = vcombine.high %v10395_v4, %v10395_v4  ;;  %v7706_v7 = vrot.slane %v10395_v4, 9  ;;  %2613 = vst.msk [vmem:[#allocation2 + $0x30] sm:$0xff] %vm2606_vm11, %v2544_v22  ;;  %v4296_v49 = vpack.c.bf16 %v4274_v58, %v4273_v2  ;;  %v13503_v63 = vcombine.low %v10212_v62, %v10226_v11 }
 0x10d   : > { %4045 = vrot.lane.b32.xlu1 %v13501_v34, %s8244_s29  ;;  %1254 = vst.msk [vmem:[#allocation2 + $0x60] sm:$0xff] %vm1241_vm7, %v1020_v54  ;;  %13502 = vst [vmem:[#allocation52_spill] sm:$0xff] %v10422_v26  ;;  %v10433_v34 = vrot.slane %v3209_v57, %v8348_v5  ;;  %v10437_v54 = vcombine.high %v10378_v33, %v10378_v33  ;;  %v1175_v24 = vcombine.low %v10422_v26, %v10395_v4 }
 0x10e   : > { %v1191_v16 = vcombine.low %v10430_v42, %v10426_v59  ;;  %v10448_v57 = vcombine.high %v10426_v59, %v10426_v59  ;;  %2911 = vst.msk [vmem:[#allocation2 + $0x38] sm:$0xff] %vm2903_vm12, %v2843_v12  ;;  %v1523_v58 = vrot.slane %v9998_v43, 7  ;;  %v10458_v2 = vcombine.high %v10422_v26, %v10422_v26  ;;  %7854 = vmatmul.mubr.msk.bf16.gmra.mrb[8].mxu0 %vm4334_vm2, %v4296_v49 }
 0x10f   : > { %4043 = vrot.lane.b32.xlu0 %v13503_v63, %s8244_s29  ;;  %v1577_v9 = vrot.slane %v10430_v42, 7  ;;  %v13505_v40 = vcombine.low %v10165_v39, %v10168_v29  ;;  %v10468_v63 = vrot.slane %v1175_v24, %v8348_v5  ;;  %v1580_v52 = vrot.slane %v10426_v59, 7  ;;  %v2841_v22 = vpop.permute.xlu0 %2840  ;;  %7857 = vmatprep.mubr.msk.bf16.mxu0 %vm8247_vm9, %v13436_v3  ;;  %v3384_v28 = vpop.permute.xlu1 %3383 }
 0x110   : > { %13504 = vst [vmem:[#allocation53_spill] sm:$0xff] %v10458_v2  ;;  %v10471_v12 = vrot.slane %v1191_v16, %v8348_v5  ;;  %v10479_v49 = vcombine.high %v10237_v45, %v10237_v45  ;;  %v1573_v24 = vrot.slane %v10458_v2, 7  ;;  %2910 = vst.msk [vmem:[#allocation2 + $0x30] sm:$0xff] %vm2903_vm12, %v2841_v22  ;;  %v13510_v61 = vcombine.low %v9860_v35, %v10212_v62 }
 0x111   : > { %4193 = vrot.lane.b32.xlu1 %v13505_v40, %s8245_s8  ;;  %13506 = vst [vmem:[#allocation54_spill] sm:$0xff] %v10468_v63  ;;  %v13507_v40 = vrot.slane %v10422_v26, 7  ;;  %v10486_v16 = vsel %vm8499_vm6, %v7706_v7, %v1577_v9  ;;  %v1579_v6 = vrot.slane %v1577_v9, 2  ;;  %v1582_v23 = vrot.slane %v1580_v52, 2  ;;  %3452 = vst.msk [vmem:[#allocation2 + $0x38] sm:$0xff] %vm3444_vm13, %v3384_v28 }
 0x112   : > { %v2456_v2 = vcombine.low %v10237_v45, %v10479_v49  ;;  %v13511_v28 = vrot.slane %v9954_v46, 7  ;;  %v13512_v22 = vrot.slane %v10448_v57, 7  ;;  %v1525_v20 = vrot.slane %v1523_v58, 2 }
 0x113   : > { %v1572_v56 = vrot.slane %v13507_v40, 2  ;;  %v13508_v40 = vcombine.low %v10221_v17, %v10229_v0  ;;  %v10515_v7 = vsel %vm8499_vm6, %v1579_v6, %v1580_v52  ;;  %v1529_v35 = vrot.slane %v10437_v54, 7  ;;  %v3628_v52 = vpop.permute.xlu1 %3627 }
 0x114   : > { %v10521_v63 = vsel %vm8499_vm6, %v1582_v23, %v13512_v22  ;;  %v1528_v6 = vrot.slane %v1526_v48, 2  ;;  %v1514_v23 = vrot.slane %v9958_v25, 7  ;;  %3696 = vst.msk [vmem:[#allocation2 + $0x38] sm:$0xff] %vm3688_vm14, %v3628_v52  ;;  %v305_v52 = vld [vmem:[%s8346_s17 + $0xd8] sm:$0xff]  ;;  %v10569_v45 = vsel %vm8499_vm6, %v1525_v20, %v1526_v48 }
 0x115   : > { %4191 = vrot.lane.b32.xlu0 %v13508_v40, %s8245_s8  ;;  %v10505_v9 = vsel %vm8499_vm6, %v1572_v56, %v1573_v24  ;;  %2043 = vrot.lane.b32.xlu1 %v13510_v61, %s8242_s22  ;;  %v1522_v40 = vrot.slane %v13511_v28, 2  ;;  %v3382_v24 = vpop.permute.xlu0 %3381  ;;  %v1988_v62 = vcombine.low %v10515_v7, %v10521_v63  ;;  %v7713_v61 = vcombine.high %v10422_v26, %v10395_v4 }
 0x116   : > { %13509 = vst [vmem:[#allocation55_spill] sm:$0xff] %v10505_v9  ;;  %v1972_v56 = vcombine.low %v10505_v9, %v10486_v16  ;;  %3451 = vst.msk [vmem:[#allocation2 + $0x30] sm:$0xff] %vm3444_vm13, %v3382_v24  ;;  %v2506_v28 = vcombine.low %v10426_v59, %v10448_v57  ;;  %v13513_v9 = vcombine.low %v9962_v41, %v9857_v53  ;;  %v7704_v24 = vrot.slane %v10055_v32, 9 }
 0x117   : > { %v10544_v26 = vrot.slane %v2456_v2, %v8348_v5  ;;  %v10547_v25 = vrot.slane %v1988_v62, %v8348_v5  ;;  %v13514_v59 = vcombine.low %v13475_v14, %v10221_v17  ;;  %v1123_v53 = vcombine.low %v10378_v33, %v10055_v32  ;;  %v13515_v2 = vld [vmem:[#allocation35_spill] sm:$0xff] }
 0x118   : > { %v10533_v22 = vrot.slane %v1972_v56, %v8348_v5  ;;  %v10550_v56 = vrot.slane %v7713_v61, %v8348_v5  ;;  %v10560_v41 = vsel %vm8499_vm6, %v1522_v40, %v1523_v58  ;;  %v10564_v62 = vrot.slane %v2506_v28, %v8348_v5  ;;  %v3829_v40 = vpop.permute.xlu1 %3828 }
 0x119   : > { %2041 = vrot.lane.b32.xlu0 %v13513_v9, %s8242_s22  ;;  %2561 = vrot.lane.b32.xlu1 %v13514_v59, %s8238_s18  ;;  %v1517_v9 = vrot.slane %v13515_v2, 7  ;;  %v3626_v61 = vpop.permute.xlu0 %3625  ;;  %v13516_v17 = vrot.slane %v13473_v44, 7  ;;  %v10580_v28 = vsel %vm8499_vm6, %v1528_v6, %v1529_v35  ;;  %v1516_v2 = vrot.slane %v1514_v23, 2  ;;  %3897 = vst.msk [vmem:[#allocation2 + $0x38] sm:$0xff] %vm3889_vm15, %v3829_v40 }
 0x11a   : > { %3695 = vst.msk [vmem:[#allocation2 + $0x30] sm:$0xff] %vm3688_vm14, %v3626_v61  ;;  %v2785_v20 = vcombine.low %v10395_v4, %v10430_v42  ;;  %v13518_v61 = vld [vmem:[#allocation42_spill] sm:$0xff]  ;;  %v10597_v6 = vcombine.high %v305_v52, %v305_v52  ;;  %v10600_v48 = vrot.slane %v305_v52, %v8348_v5  ;;  %v13521_v4 = vrot.slane %v10448_v57, 7 }
 0x11b   : > { %v1513_v14 = vrot.slane %v13516_v17, 2  ;;  %v13517_v17 = vcombine.low %v9929_v36, %v9883_v1  ;;  %v13519_v58 = vrot.slane %v13518_v61, 7  ;;  %v13522_v1 = vcombine.low %v10165_v39, %v10305_v55 }
 0x11c   : > { %13520 = vst [vmem:[#allocation35_spill] sm:$0xff] %v10597_v6  ;;  %v1585_v42 = vrot.slane %v13521_v4, 2  ;;  %v3224_v36 = vcombine.low %v10363_v19, %v10433_v34  ;;  %v1519_v40 = vrot.slane %v1517_v9, 2  ;;  %v1904_v4 = vcombine.low %v10560_v41, %v10569_v45  ;;  %v4034_v19 = vpop.permute.xlu1 %4033 }
 0x11d   : > { %2559 = vrot.lane.b32.xlu0 %v13517_v17, %s8238_s18  ;;  %v10595_v35 = vsel %vm8499_vm6, %v7704_v24, %v13519_v58  ;;  %2858 = vrot.lane.b32.xlu1 %v13522_v1, %s8239_s19  ;;  %v10611_v24 = vrot.slane %v2785_v20, %v8348_v5  ;;  %v3310_v58 = vcombine.low %v10486_v16, %v10515_v7  ;;  %v3827_v52 = vpop.permute.xlu0 %3826  ;;  %v1586_v55 = vrot.slane %v10600_v48, 7 }
 0x11e   : > { %v10616_v17 = vrot.slane %v1123_v53, %v8348_v5  ;;  %v1192_v1 = vcombine.low %v10448_v57, %v10600_v48  ;;  %3896 = vst.msk [vmem:[#allocation2 + $0x30] sm:$0xff] %vm3889_vm15, %v3827_v52  ;;  %v1920_v34 = vcombine.low %v10580_v28, %v10595_v35  ;;  %v10628_v16 = vsel %vm8499_vm6, %v1513_v14, %v1514_v23 }
 0x11f   : > { %v10632_v7 = vsel %vm8499_vm6, %v1516_v2, %v1517_v9  ;;  %v13523_v57 = vcombine.low %v10290_v30, %v10229_v0  ;;  %4102 = vst.msk [vmem:[#allocation2 + $0x38] sm:$0xff] %vm4094_vm0, %v4034_v19  ;;  %v10643_v20 = vrot.slane %v10597_v6, %v8348_v5  ;;  %v10647_v23 = vsel %vm8499_vm6, %v1585_v42, %v1586_v55 }
 0x120   : > { %v10650_v9 = vrot.slane %v1192_v1, %v8348_v5  ;;  %v1071_v14 = vcombine.low %v9847_v18, %v10133_v47  ;;  %v13526_v30 = vrot.slane %v9954_v46, 7  ;;  %v3311_v52 = vcombine.low %v10521_v63, %v10647_v23  ;;  %v13527_v1 = vld [vmem:[#allocation26_spill] sm:$0xff]  ;;  %v4182_v47 = vpop.permute.xlu1 %4181  ;;  %v13528_v63 = vld [vmem:[#allocation40_spill] sm:$0xff] }
 0x121   : > { %2856 = vrot.lane.b32.xlu0 %v13523_v57, %s8239_s19  ;;  %13524 = vst [vmem:[#allocation42_spill] sm:$0xff] %v10643_v20  ;;  %3399 = vrot.lane.b32.xlu1 %v3224_v36, %s8243_s23  ;;  %v10664_v42 = vrot.slane %v3310_v58, %v8348_v5  ;;  %v1054_v19 = vcombine.low %v13527_v1, %v9844_v15  ;;  %v4032_v57 = vpop.permute.xlu0 %4031  ;;  %4250 = vst.msk [vmem:[#allocation2 + $0x38] sm:$0xff] %vm4242_vm1, %v4182_v47  ;;  %v13534_v47 = vld [vmem:[#allocation41_spill] sm:$0xff] }
 0x122   : > { %13525 = vst [vmem:[#allocation56_spill] sm:$0xff] %v10650_v9  ;;  %v10659_v2 = vsel %vm8499_vm6, %v1519_v40, %v13526_v30  ;;  %v10670_v18 = vcombine.low %v10471_v12, %v10650_v9  ;;  %1257 = vst.msk [vmem:[#allocation2 + $0x78] sm:$0xff] %vm1241_vm7, %v1071_v14  ;;  %v10675_v46 = vcombine.high %v10600_v48, %v10600_v48 }
 0x123   : > { %4101 = vst.msk [vmem:[#allocation2 + $0x30] sm:$0xff] %vm4094_vm0, %v4032_v57  ;;  %v3765_v36 = vcombine.low %v13528_v63, %v10616_v17  ;;  %v13529_v15 = vcombine.low %v9932_v37, %v13473_v44  ;;  %v10687_v58 = vrot.slane %v3311_v52, %v8348_v5  ;;  %v13530_v14 = vcombine.low %v10403_v50, %v10406_v21 }
 0x124   : > { %1256 = vst.msk [vmem:[#allocation2 + $0x70] sm:$0xff] %vm1241_vm7, %v1054_v19  ;;  %v1887_v30 = vcombine.low %v10315_v38, %v10628_v16  ;;  %v1903_v37 = vcombine.low %v10632_v7, %v10659_v2  ;;  %v2422_v44 = vcombine.low %v9998_v43, %v10378_v33  ;;  %1265 = vst.msk [vmem:[#allocation2 + $0xb8] sm:$0xff] %vm1241_vm7, %v10670_v18 }
 0x125   : > { %v10684_v40 = vrot.slane %v13529_v15, %v8348_v5  ;;  %3397 = vrot.lane.b32.xlu0 %v13530_v14, %s8243_s23  ;;  %v1208_v52 = vcombine.low %v10675_v46, %v10643_v20  ;;  %v13531_v50 = vcombine.low %v10130_v13, %v10409_v60  ;;  %v10710_v21 = vrot.slane %v1904_v4, %v8348_v5  ;;  %v4180_v19 = vpop.permute.xlu0 %4179  ;;  %v2032_v60 = vpop.permute.xlu1 %2031 }
 0x126   : > { %v10713_v38 = vrot.slane %v1920_v34, %v8348_v5  ;;  %v7712_v43 = vcombine.high %v10378_v33, %v10055_v32  ;;  %4249 = vst.msk [vmem:[#allocation2 + $0x30] sm:$0xff] %vm4242_vm1, %v4180_v19  ;;  %v10725_v4 = vcombine.high %v10643_v20, %v10643_v20  ;;  %v13533_v34 = vld [vmem:[#allocation25_spill] sm:$0xff]  ;;  %v1901_v15 = vrot.slane %v1887_v30, %v8348_v5 }
 0x127   : > { %3643 = vrot.lane.b32.xlu1 %v13531_v50, %s8240_s20  ;;  %v10720_v57 = vrot.slane %v1208_v52, %v8348_v5  ;;  %2098 = vst.msk [vmem:[#allocation2 + $0x48] sm:$0xff] %vm2088_vm10, %v2032_v60  ;;  %v3764_v63 = vcombine.low %v10684_v40, %v13534_v47  ;;  %v10734_v14 = vrot.slane %v1903_v37, %v8348_v5  ;;  %v1589_v30 = vrot.slane %v10675_v46, 7  ;;  %v302_v52 = vld [vmem:[%s8346_s17 + $0xc0] sm:$0xff] }
 0x128   : > { %v3954_v50 = vcombine.low %v10710_v21, %v10713_v38  ;;  %v10742_v19 = vrot.slane %v2422_v44, %v8348_v5  ;;  %v10745_v60 = vrot.slane %v7712_v43, %v8348_v5  ;;  %v1592_v37 = vrot.slane %v10643_v20, 7  ;;  %v4276_v43 = vld [vmem:[#allocation2 + $0x38] sm:$0xff] }
 0x129   : > { %13532 = vst [vmem:[#allocation26_spill] sm:$0xff] %v10720_v57  ;;  %3641 = vrot.lane.b32.xlu0 %v13533_v34, %s8240_s20  ;;  %v1588_v34 = vrot.slane %v1586_v55, 2  ;;  %v2030_v47 = vpop.permute.xlu0 %2029  ;;  %v1595_v1 = vrot.slane %v10725_v4, 7  ;;  %v3953_v44 = vcombine.low %v1901_v15, %v10734_v14  ;;  %v1591_v53 = vrot.slane %v1589_v30, 2 }
 0x12a   : > { %2097 = vst.msk [vmem:[#allocation2 + $0x40] sm:$0xff] %vm2088_vm10, %v2030_v47  ;;  %v1594_v59 = vrot.slane %v1592_v37, 2  ;;  %v4129_v47 = vcombine.low %v10742_v19, %v10745_v60 }
 0x12b   : > { %3844 = vrot.lane.b32.xlu1 %v3765_v36, %s8241_s21  ;;  %v2550_v36 = vpop.permute.xlu1 %2549  ;;  %v10757_v55 = vsel %vm8499_vm6, %v1588_v34, %v1589_v30  ;;  %v10769_v9 = vsel %vm8499_vm6, %v1591_v53, %v1592_v37  ;;  %v13537_v37 = vld [vmem:[#allocation38_spill] sm:$0xff] }
 0x12c   : > { %2616 = vst.msk [vmem:[#allocation2 + $0x48] sm:$0xff] %vm2606_vm11, %v2550_v36  ;;  %13535 = vst [vmem:[#allocation40_spill] sm:$0xff] %v10757_v55  ;;  %v1989_v6 = vcombine.low %v10647_v23, %v10757_v55  ;;  %v10765_v36 = vrot.slane %v302_v52, %v8348_v5  ;;  %v10773_v34 = vsel %vm8499_vm6, %v1594_v59, %v1595_v1 }
 0x12d   : > { %3842 = vrot.lane.b32.xlu0 %v3764_v63, %s8241_s21  ;;  %v2548_v63 = vpop.permute.xlu0 %2547  ;;  %v4275_v57 = vld [vmem:[#allocation2 + $0x30] sm:$0xff]  ;;  %v2005_v20 = vcombine.low %v10769_v9, %v10773_v34  ;;  %v1902_v59 = vcombine.low %v10176_v51, %v1901_v15 }
 0x12e   : > { %2615 = vst.msk [vmem:[#allocation2 + $0x40] sm:$0xff] %vm2606_vm11, %v2548_v63  ;;  %v4297_v30 = vpack.c.bf16 %v4276_v43, %v4275_v57  ;;  %v10779_v55 = vrot.slane %v1989_v6, %v8348_v5  ;;  %v10800_v51 = vcombine.high %v10765_v36, %v10765_v36  ;;  %v10802_v57 = vcombine.high %v302_v52, %v302_v52  ;;  %v13538_v43 = vld [vmem:[#allocation36_spill] sm:$0xff] }
 0x12f   : > { %4049 = vrot.lane.b32.xlu1 %v3954_v50, %s8244_s29  ;;  %v2507_v50 = vcombine.low %v10600_v48, %v10675_v46  ;;  %v2847_v23 = vpop.permute.xlu1 %2846  ;;  %v2765_v48 = vcombine.low %v10055_v32, %v13518_v61  ;;  %v10794_v6 = vrot.slane %v2005_v20, %v8348_v5  ;;  %v1885_v52 = vcombine.low %v10226_v11, %v10142_v27 }
 0x130   : > { %2913 = vst.msk [vmem:[#allocation2 + $0x48] sm:$0xff] %vm2903_vm12, %v2847_v23  ;;  %7858 = vmatmul.mubr.msk.bf16.gmra.mrb[12].mxu0 %vm4334_vm2, %v4297_v30  ;;  %v2004_v46 = vcombine.low %v10547_v25, %v10779_v55  ;;  %13536 = vst [vmem:[#allocation25_spill] sm:$0xff] %v10802_v57  ;;  %v1555_v27 = vrot.slane %v10800_v51, 7 }
 0x131   : > { %4047 = vrot.lane.b32.xlu0 %v3953_v44, %s8244_s29  ;;  %v10787_v53 = vrot.slane %v2507_v50, %v8348_v5  ;;  %v2845_v1 = vpop.permute.xlu0 %2844  ;;  %7861 = vmatprep.mubr.msk.bf16.mxu0 %vm8247_vm9, %v13436_v3  ;;  %v3959_v20 = vcombine.low %v10779_v55, %v10794_v6  ;;  %v3242_v44 = vcombine.low %v10569_v45, %v10580_v28  ;;  %v13539_v50 = vld [vmem:[#allocation44_spill] sm:$0xff] }
 0x132   : > { %2912 = vst.msk [vmem:[#allocation2 + $0x40] sm:$0xff] %vm2903_vm12, %v2845_v1  ;;  %v2772_v63 = vrot.slane %v2765_v48, %v8348_v5  ;;  %v3243_v30 = vcombine.low %v10595_v35, %v13539_v50  ;;  %v10826_v1 = vrot.slane %v10802_v57, %v8348_v5  ;;  %v1105_v45 = vcombine.low %v10130_v13, %v10684_v40 }
 0x133   : > { %4197 = vrot.lane.b32.xlu1 %v4129_v47, %s8245_s8  ;;  %v2522_v15 = vcombine.low %v10564_v62, %v10787_v53  ;;  %v3388_v32 = vpop.permute.xlu1 %3387  ;;  %v2420_v47 = vcombine.low %v10168_v29, %v13538_v43  ;;  %v2403_v29 = vcombine.low %v10229_v0, %v10165_v39  ;;  %v3250_v28 = vrot.slane %v3242_v44, %v8348_v5 }
 0x134   : > { %3454 = vst.msk [vmem:[#allocation2 + $0x48] sm:$0xff] %vm3444_vm13, %v3388_v32  ;;  %v3225_v35 = vcombine.low %v10628_v16, %v10632_v7  ;;  %v3552_v13 = vcombine.low %v10378_v33, %v10437_v54  ;;  %v2773_v39 = vcombine.low %v10742_v19, %v2772_v63  ;;  %v3257_v0 = vrot.slane %v3243_v30, %v8348_v5  ;;  %v13540_v7 = vld [vmem:[#allocation45_spill] sm:$0xff] }
 0x135   : > { %4195 = vrot.lane.b32.xlu0 %v13537_v37, %s8245_s8  ;;  %v3386_v23 = vpop.permute.xlu0 %3385  ;;  %1259 = vst.msk [vmem:[#allocation2 + $0x88] sm:$0xff] %vm1241_vm7, %v1105_v45  ;;  %v1124_v40 = vcombine.low %v13518_v61, %v10125_v10  ;;  %v1551_v48 = vrot.slane %v10479_v49, 7  ;;  %v13541_v32 = vrot.slane %v13540_v7, 7  ;;  %v1557_v33 = vrot.slane %v1555_v27, 2 }
 0x136   : > { %3453 = vst.msk [vmem:[#allocation2 + $0x40] sm:$0xff] %vm3444_vm13, %v3386_v23  ;;  %v1558_v54 = vrot.slane %v10826_v1, 7  ;;  %v3233_v10 = vrot.slane %v3225_v35, %v8348_v5  ;;  %v3258_v61 = vcombine.low %v3250_v28, %v3257_v0  ;;  %v3559_v43 = vrot.slane %v3552_v13, %v8348_v5 }
 0x137   : > { %2047 = vrot.lane.b32.xlu1 %v1902_v59, %s8242_s22  ;;  %v3632_v11 = vpop.permute.xlu1 %3631  ;;  %v3226_v59 = vcombine.low %v10659_v2, %v10560_v41  ;;  %v1550_v41 = vrot.slane %v13541_v32, 2  ;;  %v7705_v2 = vrot.slane %v10765_v36, 9  ;;  %v1138_v44 = vrot.slane %v1124_v40, %v8348_v5 }
 0x138   : > { %3698 = vst.msk [vmem:[#allocation2 + $0x48] sm:$0xff] %vm3688_vm14, %v3632_v11  ;;  %v10874_v23 = vsel %vm8499_vm6, %v1557_v33, %v1558_v54  ;;  %v13545_v33 = vld [vmem:[#allocation34_spill] sm:$0xff] }
 0x139   : > { %2045 = vrot.lane.b32.xlu0 %v1885_v52, %s8242_s22  ;;  %v3630_v16 = vpop.permute.xlu0 %3629  ;;  %v3240_v49 = vrot.slane %v3226_v59, %v8348_v5  ;;  %v10866_v50 = vsel %vm8499_vm6, %v1550_v41, %v1551_v48  ;;  %v10870_v30 = vsel %vm8499_vm6, %v7705_v2, %v1555_v27  ;;  %v13542_v27 = vld [vmem:[#allocation46_spill] sm:$0xff]  ;;  %v13544_v2 = vld [vmem:[#allocation43_spill] sm:$0xff] }
 0x13a   : > { %3697 = vst.msk [vmem:[#allocation2 + $0x40] sm:$0xff] %vm3688_vm14, %v3630_v16  ;;  %v1938_v35 = vcombine.low %v13542_v27, %v10866_v50  ;;  %v1954_v59 = vcombine.low %v10870_v30, %v10874_v23  ;;  %v2472_v16 = vcombine.low %v10800_v51, %v10826_v1  ;;  %v1560_v27 = vrot.slane %v1558_v54, 2 }
 0x13b   : > { %2565 = vrot.lane.b32.xlu1 %v2420_v47, %s8238_s18  ;;  %v3833_v52 = vpop.permute.xlu1 %3832  ;;  %v1157_v47 = vcombine.low %v10765_v36, %v10800_v51  ;;  %v3241_v11 = vcombine.low %v3233_v10, %v3240_v49 }
 0x13c   : > { %3899 = vst.msk [vmem:[#allocation2 + $0x48] sm:$0xff] %vm3889_vm15, %v3833_v52  ;;  %v10895_v40 = vrot.slane %v1938_v35, %v8348_v5  ;;  %v10898_v48 = vrot.slane %v1954_v59, %v8348_v5  ;;  %v3766_v52 = vcombine.low %v1138_v44, %v13545_v33  ;;  %v10911_v49 = vrot.slane %v2472_v16, %v8348_v5  ;;  %v13546_v59 = vld [vmem:[#allocation31_spill] sm:$0xff] }
 0x13d   : > { %2563 = vrot.lane.b32.xlu0 %v2403_v29, %s8238_s18  ;;  %v3831_v63 = vpop.permute.xlu0 %3830  ;;  %v3560_v29 = vcombine.low %v3559_v43, %v1138_v44  ;;  %v10882_v28 = vrot.slane %v1157_v47, %v8348_v5  ;;  %v1139_v43 = vcombine.low %v10616_v17, %v1138_v44  ;;  %v1936_v54 = vcombine.low %v10713_v38, %v13546_v59  ;;  %v13550_v38 = vld [vmem:[#allocation47_spill] sm:$0xff] }
 0x13e   : > { %3898 = vst.msk [vmem:[#allocation2 + $0x40] sm:$0xff] %vm3889_vm15, %v3831_v63  ;;  %v3956_v10 = vcombine.low %v10895_v40, %v10898_v48  ;;  %v1919_v33 = vcombine.low %v10734_v14, %v10710_v21  ;;  %v13552_v14 = vld [vmem:[#allocation37_spill] sm:$0xff] }
 0x13f   : > { %2862 = vrot.lane.b32.xlu1 %v2773_v39, %s8239_s19  ;;  %v4038_v45 = vpop.permute.xlu1 %4037  ;;  %1261 = vst.msk [vmem:[#allocation2 + $0x98] sm:$0xff] %vm1241_vm7, %v1139_v43 }
 0x140   : > { %4104 = vst.msk [vmem:[#allocation2 + $0x48] sm:$0xff] %vm4094_vm0, %v4038_v45  ;;  %v4130_v45 = vcombine.low %v10544_v26, %v10911_v49 }
 0x141   : > { %2860 = vrot.lane.b32.xlu0 %v13537_v37, %s8239_s19  ;;  %v4036_v13 = vpop.permute.xlu0 %4035  ;;  %v13543_v37 = vld [vmem:[#allocation30_spill] sm:$0xff] }
 0x142   : > { %4103 = vst.msk [vmem:[#allocation2 + $0x40] sm:$0xff] %vm4094_vm0, %v4036_v13  ;;  %v3767_v0 = vcombine.low %v13543_v37, %v10882_v28  ;;  %v13547_v13 = vld [vmem:[#allocation33_spill] sm:$0xff]  ;;  %v2775_v37 = vcombine.low %v13540_v7, %v10765_v36 }
 0x143   : > { %3403 = vrot.lane.b32.xlu1 %v3258_v61, %s8243_s23  ;;  %v4186_v39 = vpop.permute.xlu1 %4185  ;;  %v10915_v61 = vcombine.high %v10826_v1, %v10826_v1 }
 0x144   : > { %4252 = vst.msk [vmem:[#allocation2 + $0x48] sm:$0xff] %vm4242_vm1, %v4186_v39  ;;  %v13548_v39 = vcombine.low %v13546_v59, %v13547_v13  ;;  %v2782_v43 = vrot.slane %v2775_v37, %v8348_v5 }
 0x145   : > { %3401 = vrot.lane.b32.xlu0 %v3241_v11, %s8243_s23  ;;  %v4184_v32 = vpop.permute.xlu0 %4183  ;;  %v1561_v17 = vrot.slane %v10915_v61, 7 }
 0x146   : > { %4251 = vst.msk [vmem:[#allocation2 + $0x40] sm:$0xff] %vm4242_vm1, %v4184_v32 }
 0x147   : > { %3647 = vrot.lane.b32.xlu1 %v3560_v29, %s8240_s20  ;;  %v2036_v41 = vpop.permute.xlu1 %2035  ;;  %v1563_v59 = vrot.slane %v1561_v17, 2 }
 0x148   : > { %2100 = vst.msk [vmem:[#allocation2 + $0x58] sm:$0xff] %vm2088_vm10, %v2036_v41  ;;  %v10944_v41 = vsel %vm8499_vm6, %v1560_v27, %v1561_v17 }
 0x149   : > { %3645 = vrot.lane.b32.xlu0 %v13544_v2, %s8240_s20  ;;  %v2034_v51 = vpop.permute.xlu0 %2033 }
 0x14a   : > { %2099 = vst.msk [vmem:[#allocation2 + $0x50] sm:$0xff] %vm2088_vm10, %v2034_v51 }
 0x14b   : > { %3848 = vrot.lane.b32.xlu1 %v3767_v0, %s8241_s21  ;;  %v2554_v47 = vpop.permute.xlu1 %2553  ;;  %v4278_v63 = vld [vmem:[#allocation2 + $0x48] sm:$0xff]  ;;  %v13549_v0 = vld [vmem:[#allocation48_spill] sm:$0xff] }
 0x14c   : > { %2618 = vst.msk [vmem:[#allocation2 + $0x58] sm:$0xff] %vm2606_vm11, %v2554_v47  ;;  %v10940_v16 = vrot.slane %v13549_v0, %v8348_v5  ;;  %v3277_v47 = vcombine.low %v10874_v23, %v10944_v41  ;;  %v7720_v23 = vcombine.high %v13540_v7, %v10765_v36 }
 0x14d   : > { %3846 = vrot.lane.b32.xlu0 %v3766_v52, %s8241_s21  ;;  %v2552_v11 = vpop.permute.xlu0 %2551  ;;  %v4277_v29 = vld [vmem:[#allocation2 + $0x40] sm:$0xff]  ;;  %v3276_v52 = vcombine.low %v10866_v50, %v10870_v30  ;;  %v1158_v30 = vcombine.low %v10826_v1, %v10915_v61 }
 0x14e   : > { %2617 = vst.msk [vmem:[#allocation2 + $0x50] sm:$0xff] %vm2606_vm11, %v2552_v11  ;;  %v4298_v44 = vpack.c.bf16 %v4278_v63, %v4277_v29  ;;  %v10964_v63 = vcombine.high %v10940_v16, %v10940_v16  ;;  %v2783_v11 = vcombine.low %v2782_v43, %v10911_v49  ;;  %v3291_v29 = vrot.slane %v3277_v47, %v8348_v5 }
 0x14f   : > { %4053 = vrot.lane.b32.xlu1 %v3956_v10, %s8244_s29  ;;  %v2851_v35 = vpop.permute.xlu1 %2850  ;;  %v13551_v10 = vld [vmem:[#allocation27_spill] sm:$0xff]  ;;  %v3284_v50 = vrot.slane %v3276_v52, %v8348_v5  ;;  %v1564_v27 = vrot.slane %v10940_v16, 7  ;;  %v1172_v36 = vrot.slane %v1158_v30, %v8348_v5  ;;  %v3568_v1 = vrot.slane %v7720_v23, %v8348_v5  ;;  %v13553_v52 = vld [vmem:[#allocation52_spill] sm:$0xff] }
 0x150   : > { %2915 = vst.msk [vmem:[#allocation2 + $0x58] sm:$0xff] %vm2903_vm12, %v2851_v35  ;;  %7862 = vmatmul.mubr.msk.bf16.gmra.mrb[16].mxu0 %vm4334_vm2, %v4298_v44  ;;  %v2454_v51 = vcombine.low %v10745_v60, %v13551_v10  ;;  %v2437_v60 = vcombine.low %v13552_v14, %v10742_v19  ;;  %v1567_v44 = vrot.slane %v10964_v63, 7  ;;  %v13554_v10 = vrot.slane %v13553_v52, 7 }
 0x151   : > { %4051 = vrot.lane.b32.xlu0 %v13548_v39, %s8244_s29  ;;  %v2849_v32 = vpop.permute.xlu0 %2848  ;;  %7865 = vmatprep.mubr.msk.bf16.mxu0 %vm8247_vm9, %v13436_v3  ;;  %v3292_v7 = vcombine.low %v3284_v50, %v3291_v29  ;;  %v1566_v39 = vrot.slane %v1564_v27, 2  ;;  %v10996_v17 = vsel %vm8499_vm6, %v1563_v59, %v1564_v27  ;;  %v306_v29 = vld [vmem:[%s8346_s17 + $0xe0] sm:$0xff]  ;;  %v13558_v27 = vld [vmem:[#allocation50_spill] sm:$0xff] }
 0x152   : > { %2914 = vst.msk [vmem:[#allocation2 + $0x50] sm:$0xff] %vm2903_vm12, %v2849_v32  ;;  %v1174_v32 = vcombine.low %v10940_v16, %v10964_v63 }
 0x153   : > { %4201 = vrot.lane.b32.xlu1 %v4130_v45, %s8245_s8  ;;  %v3392_v2 = vpop.permute.xlu1 %3391 }
 0x154   : > { %3456 = vst.msk [vmem:[#allocation2 + $0x58] sm:$0xff] %vm3444_vm13, %v3392_v2  ;;  %v3569_v2 = vcombine.low %v3568_v1, %v1172_v36  ;;  %v11010_v47 = vrot.slane %v1174_v32, %v8348_v5  ;;  %v13559_v1 = vld [vmem:[#allocation54_spill] sm:$0xff]  ;;  %v11055_v32 = vrot.slane %v306_v29, %v8348_v5 }
 0x155   : > { %4199 = vrot.lane.b32.xlu0 %v13550_v38, %s8245_s8  ;;  %v3390_v45 = vpop.permute.xlu0 %3389 }
 0x156   : > { %3455 = vst.msk [vmem:[#allocation2 + $0x50] sm:$0xff] %vm3444_vm13, %v3390_v45  ;;  %v13555_v45 = vld [vmem:[#allocation49_spill] sm:$0xff] }
 0x157   : > { %2051 = vrot.lane.b32.xlu1 %v1936_v54, %s8242_s22  ;;  %v3636_v21 = vpop.permute.xlu1 %3635  ;;  %v1569_v54 = vrot.slane %v1567_v44, 2 }
 0x158   : > { %3700 = vst.msk [vmem:[#allocation2 + $0x58] sm:$0xff] %vm3688_vm14, %v3636_v21  ;;  %v13556_v21 = vld [vmem:[#allocation51_spill] sm:$0xff] }
 0x159   : > { %2049 = vrot.lane.b32.xlu0 %v1919_v33, %s8242_s22  ;;  %v3634_v35 = vpop.permute.xlu0 %3633  ;;  %v11000_v33 = vsel %vm8499_vm6, %v1566_v39, %v1567_v44  ;;  %v13557_v14 = vcombine.low %v13555_v45, %v13556_v21  ;;  %v2635_v39 = vcombine.high %v306_v29, %v306_v29  ;;  %v13562_v45 = vcombine.low %v10550_v56, %v10564_v62 }
 0x15a   : > { %3699 = vst.msk [vmem:[#allocation2 + $0x50] sm:$0xff] %vm3688_vm14, %v3634_v35  ;;  %v2473_v35 = vcombine.low %v10915_v61, %v10940_v16 }
 0x15b   : > { %2569 = vrot.lane.b32.xlu1 %v2454_v51, %s8238_s18  ;;  %v3837_v19 = vpop.permute.xlu1 %3836  ;;  %v11006_v51 = vsel %vm8499_vm6, %v1569_v54, %v13554_v10  ;;  %v1173_v54 = vcombine.low %v10882_v28, %v1172_v36 }
 0x15c   : > { %3901 = vst.msk [vmem:[#allocation2 + $0x58] sm:$0xff] %vm3889_vm15, %v3837_v19  ;;  %v1971_v50 = vcombine.low %v11000_v33, %v11006_v51  ;;  %v2489_v19 = vcombine.low %v10964_v63, %v13553_v52  ;;  %v2487_v63 = vrot.slane %v2473_v35, %v8348_v5 }
 0x15d   : > { %2567 = vrot.lane.b32.xlu0 %v2437_v60, %s8238_s18  ;;  %v3835_v37 = vpop.permute.xlu0 %3834  ;;  %v1955_v60 = vcombine.low %v10944_v41, %v10996_v17  ;;  %1263 = vst.msk [vmem:[#allocation2 + $0xa8] sm:$0xff] %vm1241_vm7, %v1173_v54 }
 0x15e   : > { %3900 = vst.msk [vmem:[#allocation2 + $0x50] sm:$0xff] %vm3889_vm15, %v3835_v37  ;;  %v11030_v41 = vrot.slane %v1971_v50, %v8348_v5 }
 0x15f   : > { %2866 = vrot.lane.b32.xlu1 %v2783_v11, %s8239_s19  ;;  %v4042_v0 = vpop.permute.xlu1 %4041  ;;  %v3768_v11 = vcombine.low %v1172_v36, %v11010_v47  ;;  %v1969_v44 = vrot.slane %v1955_v60, %v8348_v5  ;;  %v11072_v60 = vcombine.high %v11055_v32, %v11055_v32 }
 0x160   : > { %4106 = vst.msk [vmem:[#allocation2 + $0x58] sm:$0xff] %vm4094_vm0, %v4042_v0  ;;  %v11047_v0 = vrot.slane %v2489_v19, %v8348_v5 }
 0x161   : > { %2864 = vrot.lane.b32.xlu0 %v13550_v38, %s8239_s19  ;;  %v4040_v38 = vpop.permute.xlu0 %4039  ;;  %v3957_v61 = vcombine.low %v1969_v44, %v11030_v41  ;;  %v1970_v21 = vcombine.low %v10898_v48, %v1969_v44  ;;  %v1953_v48 = vcombine.low %v13547_v13, %v10895_v40  ;;  %v2933_v44 = vrot.slane %v11072_v60, 7 }
 0x162   : > { %4105 = vst.msk [vmem:[#allocation2 + $0x50] sm:$0xff] %vm4094_vm0, %v4040_v38  ;;  %v3293_v40 = vcombine.low %v10996_v17, %v11000_v33 }
 0x163   : > { %3407 = vrot.lane.b32.xlu1 %v3292_v7, %s8243_s23  ;;  %v4190_v43 = vpop.permute.xlu1 %4189  ;;  %v13560_v7 = vcombine.low %v13559_v1, %v10471_v12  ;;  %v13561_v12 = vcombine.low %v10533_v22, %v10547_v25  ;;  %v2935_v54 = vrot.slane %v2933_v44, 2 }
 0x164   : > { %4254 = vst.msk [vmem:[#allocation2 + $0x58] sm:$0xff] %vm4242_vm1, %v4190_v43  ;;  %v2784_v43 = vcombine.low %v2487_v63, %v11047_v0  ;;  %v3301_v33 = vrot.slane %v3293_v40, %v8348_v5 }
 0x165   : > { %3405 = vrot.lane.b32.xlu0 %v13557_v14, %s8243_s23  ;;  %v4188_v30 = vpop.permute.xlu0 %4187 }
 0x166   : > { %4253 = vst.msk [vmem:[#allocation2 + $0x50] sm:$0xff] %vm4242_vm1, %v4188_v30 }
 0x167   : > { %3651 = vrot.lane.b32.xlu1 %v3569_v2, %s8240_s20  ;;  %v2040_v23 = vpop.permute.xlu1 %2039  ;;  %v11058_v2 = vrot.slane %v2635_v39, %v8348_v5 }
 0x168   : > { %2102 = vst.msk [vmem:[#allocation2 + $0x68] sm:$0xff] %vm2088_vm10, %v2040_v23  ;;  %v11082_v23 = vld [vmem:[%s8346_s17 + $0xe8] sm:$0xff] }
 0x169   : > { %3649 = vrot.lane.b32.xlu0 %v13558_v27, %s8240_s20  ;;  %v2038_v59 = vpop.permute.xlu0 %2037  ;;  %v11076_v50 = vcombine.high %v11058_v2, %v11058_v2  ;;  %v11092_v27 = vrot.slane %v11082_v23, %v8348_v5  ;;  %v2936_v35 = vrot.slane %v11058_v2, 7 }
 0x16a   : > { %2101 = vst.msk [vmem:[#allocation2 + $0x60] sm:$0xff] %vm2088_vm10, %v2038_v59  ;;  %v7714_v59 = vrot.slane %v11055_v32, 9 }
 0x16b   : > { %3852 = vrot.lane.b32.xlu1 %v13560_v7, %s8241_s21  ;;  %v2558_v37 = vpop.permute.xlu1 %2557  ;;  %v4280_v16 = vld [vmem:[#allocation2 + $0x58] sm:$0xff]  ;;  %v2939_v19 = vrot.slane %v11076_v50, 7 }
 0x16c   : > { %2620 = vst.msk [vmem:[#allocation2 + $0x68] sm:$0xff] %vm2606_vm11, %v2558_v37  ;;  %v2938_v37 = vrot.slane %v2936_v35, 2 }
 0x16d   : > { %3850 = vrot.lane.b32.xlu0 %v3768_v11, %s8241_s21  ;;  %v2556_v28 = vpop.permute.xlu0 %2555  ;;  %v4279_v36 = vld [vmem:[#allocation2 + $0x50] sm:$0xff]  ;;  %v2488_v11 = vcombine.low %v10911_v49, %v2487_v63  ;;  %v13563_v49 = vld [vmem:[#allocation55_spill] sm:$0xff]  ;;  %v13564_v63 = vcombine.low %v10309_v31, %v10544_v26  ;;  %v11127_v26 = vsel %vm8499_vm6, %v7714_v59, %v2933_v44 }
 0x16e   : > { %2619 = vst.msk [vmem:[#allocation2 + $0x60] sm:$0xff] %vm2606_vm11, %v2556_v28  ;;  %v4299_v10 = vpack.c.bf16 %v4280_v16, %v4279_v36  ;;  %v3294_v13 = vcombine.low %v11006_v51, %v13563_v49  ;;  %v2942_v16 = vrot.slane %v11092_v27, 7  ;;  %v3588_v36 = vcombine.low %v11058_v2, %v11076_v50 }
 0x16f   : > { %4057 = vrot.lane.b32.xlu1 %v13561_v12, %s8244_s29  ;;  %v2855_v38 = vpop.permute.xlu1 %2854  ;;  %v13565_v12 = vld [vmem:[#allocation53_spill] sm:$0xff]  ;;  %v2803_v49 = vcombine.low %v11072_v60, %v11058_v2 }
 0x170   : > { %2917 = vst.msk [vmem:[#allocation2 + $0x68] sm:$0xff] %vm2903_vm12, %v2855_v38  ;;  %7866 = vmatmul.mubr.msk.bf16.gmra.mrb[20].mxu0 %vm4334_vm2, %v4299_v10  ;;  %v3308_v51 = vrot.slane %v3294_v13, %v8348_v5  ;;  %v3570_v28 = vcombine.low %v13553_v52, %v13565_v12  ;;  %v3771_v10 = vcombine.low %v11055_v32, %v11072_v60  ;;  %v13570_v12 = vld [vmem:[#allocation26_spill] sm:$0xff] }
 0x171   : > { %4055 = vrot.lane.b32.xlu0 %v3957_v61, %s8244_s29  ;;  %v2853_v14 = vpop.permute.xlu0 %2852  ;;  %7869 = vmatprep.mubr.msk.bf16.mxu0 %vm8247_vm9, %v13436_v3  ;;  %v2941_v61 = vrot.slane %v2939_v19, 2  ;;  %v13566_v38 = vcombine.low %v10611_v24, %v10564_v62  ;;  %v11135_v52 = vsel %vm8499_vm6, %v2938_v37, %v2939_v19  ;;  %v2804_v13 = vcombine.low %v11076_v50, %v11092_v27 }
 0x172   : > { %2916 = vst.msk [vmem:[#allocation2 + $0x60] sm:$0xff] %vm2903_vm12, %v2853_v14  ;;  %v3309_v14 = vcombine.low %v3301_v33, %v3308_v51  ;;  %v2811_v2 = vrot.slane %v2803_v49, %v8348_v5  ;;  %v13569_v51 = vld [vmem:[#allocation56_spill] sm:$0xff] }
 0x173   : > { %4205 = vrot.lane.b32.xlu1 %v13562_v45, %s8245_s8  ;;  %v3396_v30 = vpop.permute.xlu1 %3395  ;;  %v11131_v45 = vsel %vm8499_vm6, %v2935_v54, %v2936_v35  ;;  %v308_v54 = vld [vmem:[%s8346_s17 + $0xf0] sm:$0xff]  ;;  %v2818_v60 = vrot.slane %v2804_v13, %v8348_v5  ;;  %1267 = vst.msk [vmem:[#allocation2 + $0xc0] sm:$0xf] %vm1266_vm3, %v13570_v12  ;;  %vm6290_vm3 = vcmask 195712  }
 0x174   : > { %3458 = vst.msk [vmem:[#allocation2 + $0x68] sm:$0xff] %vm3444_vm13, %v3396_v30  ;;  %v3577_v30 = vrot.slane %v3570_v28, %v8348_v5  ;;  %v3960_v44 = vcombine.low %v11127_v26, %v11131_v45  ;;  %v3717_v33 = vcombine.high %v308_v54, %v308_v54  ;;  %v13571_v28 = vcombine.low %v13569_v51, %v13570_v12 }
 0x175   : > { %4203 = vrot.lane.b32.xlu0 %v2784_v43, %s8245_s8  ;;  %v3394_v29 = vpop.permute.xlu0 %3393  ;;  %v3344_v49 = vcombine.low %v11131_v45, %v11135_v52 }
 0x176   : > { %3457 = vst.msk [vmem:[#allocation2 + $0x60] sm:$0xff] %vm3444_vm13, %v3394_v29  ;;  %v13567_v29 = vcombine.low %v10664_v42, %v10687_v58  ;;  %v3968_v58 = vrot.slane %v3960_v44, %v8348_v5 }
 0x177   : > { %2055 = vrot.lane.b32.xlu1 %v1970_v21, %s8242_s22  ;;  %v3640_v7 = vpop.permute.xlu1 %3639  ;;  %v11141_v21 = vsel %vm8499_vm6, %v2941_v61, %v2942_v16 }
 0x178   : > { %3702 = vst.msk [vmem:[#allocation2 + $0x68] sm:$0xff] %vm3688_vm14, %v3640_v7  ;;  %v3578_v7 = vcombine.low %v11010_v47, %v3577_v30  ;;  %v11207_v30 = vrot.slane %v308_v54, %v8348_v5 }
 0x179   : > { %2053 = vrot.lane.b32.xlu0 %v1953_v48, %s8242_s22  ;;  %v3638_v39 = vpop.permute.xlu0 %3637  ;;  %v11148_v48 = vrot.slane %v3588_v36, %v8348_v5 }
 0x17a   : > { %3701 = vst.msk [vmem:[#allocation2 + $0x60] sm:$0xff] %vm3688_vm14, %v3638_v39 }
 0x17b   : > { %2573 = vrot.lane.b32.xlu1 %v2488_v11, %s8238_s18  ;;  %v3841_v17 = vpop.permute.xlu1 %3840  ;;  %v3778_v11 = vrot.slane %v3771_v10, %v8348_v5 }
 0x17c   : > { %3903 = vst.msk [vmem:[#allocation2 + $0x68] sm:$0xff] %vm3889_vm15, %v3841_v17  ;;  %v11183_v17 = vcombine.high %v11092_v27, %v11092_v27 }
 0x17d   : > { %2571 = vrot.lane.b32.xlu0 %v13564_v63, %s8238_s18  ;;  %v3839_v31 = vpop.permute.xlu0 %3838  ;;  %v3779_v42 = vcombine.low %v3778_v11, %v11148_v48  ;;  %v1190_v63 = vcombine.low %v11010_v47, %v13559_v1  ;;  %v11210_v11 = vrot.slane %v3717_v33, %v8348_v5 }
 0x17e   : > { %3902 = vst.msk [vmem:[#allocation2 + $0x60] sm:$0xff] %vm3889_vm15, %v3839_v31  ;;  %v2944_v31 = vrot.slane %v2942_v16, 2 }
 0x17f   : > { %2870 = vrot.lane.b32.xlu1 %v13566_v38, %s8239_s19  ;;  %v4046_v24 = vpop.permute.xlu1 %4045  ;;  %1264 = vst.msk [vmem:[#allocation2 + $0xb0] sm:$0xff] %vm1241_vm7, %v1190_v63  ;;  %v11198_v38 = vcombine.low %v2811_v2, %v2818_v60  ;;  %v2505_v2 = vcombine.low %v11047_v0, %v10550_v56  ;;  %v3352_v60 = vrot.slane %v3344_v49, %v8348_v5 }
 0x180   : > { %4108 = vst.msk [vmem:[#allocation2 + $0x68] sm:$0xff] %vm4094_vm0, %v4046_v24  ;;  %v2945_v24 = vrot.slane %v11183_v17, 7 }
 0x181   : > { %2868 = vrot.lane.b32.xlu0 %v2784_v43, %s8239_s19  ;;  %v3961_v43 = vcombine.low %v11135_v52, %v11141_v21  ;;  %v4044_v35 = vpop.permute.xlu0 %4043 }
 0x182   : > { %4107 = vst.msk [vmem:[#allocation2 + $0x60] sm:$0xff] %vm4094_vm0, %v4044_v35 }
 0x183   : > { %3411 = vrot.lane.b32.xlu1 %v13567_v29, %s8243_s23  ;;  %v4194_v19 = vpop.permute.xlu1 %4193  ;;  %v3975_v40 = vrot.slane %v3961_v43, %v8348_v5  ;;  %v2652_v43 = vcombine.high %v11082_v23, %v11082_v23  ;;  %v11241_v23 = vcombine.high %v11210_v11, %v11210_v11 }
 0x184   : > { %4256 = vst.msk [vmem:[#allocation2 + $0x68] sm:$0xff] %vm4242_vm1, %v4194_v19 }
 0x185   : > { %3409 = vrot.lane.b32.xlu0 %v3309_v14, %s8243_s23  ;;  %v3976_v61 = vcombine.low %v3968_v58, %v3975_v40  ;;  %v11204_v14 = vld [vmem:[%s8346_s17 + $0xf8] sm:$0xff]  ;;  %v1987_v40 = vcombine.low %v11030_v41, %v10533_v22  ;;  %v11255_v13 = vrot.slane %v2652_v43, %v8348_v5  ;;  %v3922_v41 = vrot.slane %v11210_v11, 7 }
 0x186   : > { %v11227_v35 = vrot.slane %v11204_v14, %v8348_v5  ;;  %v3925_v45 = vrot.slane %v11241_v23, 7 }
 0x187   : > { %3655 = vrot.lane.b32.xlu1 %v10670_v18, %s8240_s20  ;;  %v4192_v59 = vpop.permute.xlu0 %4191  ;;  %v2044_v39 = vpop.permute.xlu1 %2043  ;;  %v13568_v18 = vld [vmem:[#allocation42_spill] sm:$0xff]  ;;  %v3924_v33 = vrot.slane %v3922_v41, 2 }
 0x188   : > { %4255 = vst.msk [vmem:[#allocation2 + $0x60] sm:$0xff] %vm4242_vm1, %v4192_v59  ;;  %v2523_v37 = vcombine.low %v13568_v18, %v10725_v4  ;;  %v2794_v58 = vcombine.low %v13568_v18, %v11055_v32  ;;  %v11267_v22 = vcombine.high %v11227_v35, %v11227_v35  ;;  %v3927_v63 = vrot.slane %v3925_v45, 2 }
 0x189   : > { %3653 = vrot.lane.b32.xlu0 %v3578_v7, %s8240_s20  ;;  %2104 = vst.msk [vmem:[#allocation2 + $0x78] sm:$0xff] %vm2088_vm10, %v2044_v39  ;;  %v11237_v7 = vcombine.high %v11207_v30, %v11207_v30  ;;  %v3928_v39 = vrot.slane %v11227_v35, 7 }
 0x18a   : > { %v11194_v10 = vrot.slane %v2523_v37, %v8348_v5  ;;  %v2801_v55 = vrot.slane %v2794_v58, %v8348_v5 }
 0x18b   : > { %3856 = vrot.lane.b32.xlu1 %v3779_v42, %s8241_s21  ;;  %v2042_v50 = vpop.permute.xlu0 %2041  ;;  %v2562_v4 = vpop.permute.xlu1 %2561  ;;  %v4282_v36 = vld [vmem:[#allocation2 + $0x68] sm:$0xff]  ;;  %v3919_v37 = vrot.slane %v11237_v7, 7 }
 0x18c   : > { %2103 = vst.msk [vmem:[#allocation2 + $0x70] sm:$0xff] %vm2088_vm10, %v2042_v50  ;;  %v4132_v16 = vcombine.low %v10787_v53, %v11194_v10  ;;  %v7721_v50 = vcombine.high %v13568_v18, %v11055_v32  ;;  %v3931_v32 = vrot.slane %v11267_v22, 7  ;;  %v2802_v62 = vcombine.low %v10787_v53, %v2801_v55  ;;  %v11350_v55 = vld [vmem:[%s13285_s2] ss:$0 sm:$0xff] }
 0x18d   : > { %3854 = vrot.lane.b32.xlu0 %v13571_v28, %s8241_s21  ;;  %2622 = vst.msk [vmem:[#allocation2 + $0x78] sm:$0xff] %vm2606_vm11, %v2562_v4  ;;  %v3921_v0 = vrot.slane %v3919_v37, 2  ;;  %v3789_v28 = vcombine.low %v11237_v7, %v11210_v11  ;;  %v3780_v53 = vcombine.low %v11255_v13, %v11207_v30  ;;  %v3929_v7 = vsel %vm8499_vm6, %v3927_v63, %v3928_v39 }
 0x18e   : > { %v3586_v58 = vrot.slane %v7721_v50, %v8348_v5  ;;  %v4143_v50 = vcombine.low %v11227_v35, %v11267_v22 }
 0x18f   : > { %4061 = vrot.lane.b32.xlu1 %v3976_v61, %s8244_s29  ;;  %v2560_v47 = vpop.permute.xlu0 %2559  ;;  %v4281_v1 = vld [vmem:[#allocation2 + $0x60] sm:$0xff]  ;;  %v2859_v44 = vpop.permute.xlu1 %2858  ;;  %v3589_v61 = vcombine.low %v11092_v27, %v11183_v17  ;;  %v11293_v27 = vcombine.high %v11255_v13, %v11255_v13  ;;  %v3923_v43 = vsel %vm8499_vm6, %v3921_v0, %v3922_v41  ;;  %v3797_v49 = vrot.slane %v3789_v28, %v8348_v5 }
 0x190   : > { %2621 = vst.msk [vmem:[#allocation2 + $0x70] sm:$0xff] %vm2606_vm11, %v2560_v47  ;;  %v4300_v29 = vpack.c.bf16 %v4282_v36, %v4281_v1  ;;  %v3790_v36 = vcombine.low %v11241_v23, %v11227_v35  ;;  %v2947_v47 = vrot.slane %v2945_v24, 2  ;;  %v4157_v28 = vrot.slane %v4143_v50, %v8348_v5 }
 0x191   : > { %4059 = vrot.lane.b32.xlu0 %v3959_v20, %s8244_s29  ;;  %2919 = vst.msk [vmem:[#allocation2 + $0x78] sm:$0xff] %vm2903_vm12, %v2859_v44  ;;  %v11233_v20 = vsel %vm8499_vm6, %v2944_v31, %v2945_v24  ;;  %v11302_v51 = vrot.slane %v3589_v61, %v8348_v5  ;;  %v7722_v44 = vrot.slane %v11207_v30, 9  ;;  %v3587_v61 = vcombine.low %v13570_v12, %v3586_v58 }
 0x192   : > { %7870 = vmatmul.mubr.msk.bf16.gmra.mrb[24].mxu0 %vm4334_vm2, %v4300_v29  ;;  %v3345_v59 = vcombine.low %v11141_v21, %v11233_v20  ;;  %v3328_v21 = vcombine.low %v10773_v34, %v11127_v26  ;;  %v3930_v34 = vrot.slane %v3928_v39, 2  ;;  %v2948_v26 = vrot.slane %v11255_v13, 7 }
 0x193   : > { %4209 = vrot.lane.b32.xlu1 %v11198_v38, %s8245_s8  ;;  %v2857_v19 = vpop.permute.xlu0 %2856  ;;  %7873 = vmatprep.mubr.msk.bf16.mxu0 %vm8247_vm9, %v13436_v3  ;;  %v3400_v42 = vpop.permute.xlu1 %3399  ;;  %v2951_v29 = vrot.slane %v11293_v27, 7 }
 0x194   : > { %2918 = vst.msk [vmem:[#allocation2 + $0x70] sm:$0xff] %vm2903_vm12, %v2857_v19  ;;  %v3342_v4 = vrot.slane %v3328_v21, %v8348_v5  ;;  %v2950_v31 = vrot.slane %v2948_v26, 2  ;;  %v3926_v19 = vsel %vm8499_vm6, %v3924_v33, %v3925_v45  ;;  %v11338_v39 = vsel %vm8499_vm6, %v2947_v47, %v2948_v26 }
 0x195   : > { %4207 = vrot.lane.b32.xlu0 %v4132_v16, %s8245_s8  ;;  %3460 = vst.msk [vmem:[#allocation2 + $0x78] sm:$0xff] %vm3444_vm13, %v3400_v42 }
 0x196   : > { %v11343_v45 = vsel %vm8499_vm6, %v2950_v31, %v2951_v29 }
 0x197   : > { %2059 = vrot.lane.b32.xlu1 %v2004_v46, %s8242_s22  ;;  %v3398_v54 = vpop.permute.xlu0 %3397  ;;  %v13572_v46 = vld [vmem:[#allocation40_spill] sm:$0xff] }
 0x198   : > { %3459 = vst.msk [vmem:[#allocation2 + $0x70] sm:$0xff] %vm3444_vm13, %v3398_v54  ;;  %v3327_v52 = vcombine.low %v13572_v46, %v10769_v9  ;;  %v3359_v9 = vrot.slane %v3345_v59, %v8348_v5  ;;  %v3804_v59 = vrot.slane %v3790_v36, %v8348_v5  ;;  %v3994_v54 = vcombine.low %v3923_v43, %v3926_v19 }
 0x199   : > { %v3644_v25 = vpop.permute.xlu1 %3643  ;;  %2057 = vrot.lane.b32.xlu0 %v1987_v40, %s8242_s22  ;;  %v3604_v40 = vcombine.low %v11148_v48, %v11302_v51  ;;  %v3787_v46 = vrot.slane %v3780_v53, %v8348_v5 }
 0x19a   : > { %3704 = vst.msk [vmem:[#allocation2 + $0x78] sm:$0xff] %vm3688_vm14, %v3644_v25  ;;  %v3360_v1 = vcombine.low %v3352_v60, %v3359_v9  ;;  %v3920_v25 = vsel %vm8499_vm6, %v7722_v44, %v3919_v37  ;;  %v4002_v26 = vrot.slane %v3994_v54, %v8348_v5  ;;  %v3361_v44 = vcombine.low %v11338_v39, %v11343_v45 }
 0x19b   : > { %2577 = vrot.lane.b32.xlu1 %v2522_v15, %s8238_s18  ;;  %v3642_v56 = vpop.permute.xlu0 %3641  ;;  %v3335_v15 = vrot.slane %v3327_v52, %v8348_v5  ;;  %v4142_v52 = vcombine.low %v11210_v11, %v11241_v23  ;;  %v3978_v60 = vcombine.low %v11343_v45, %v3920_v25  ;;  %v2820_v11 = vcombine.low %v11183_v17, %v11255_v13 }
 0x19c   : > { %3703 = vst.msk [vmem:[#allocation2 + $0x70] sm:$0xff] %vm3688_vm14, %v3642_v56  ;;  %v7723_v23 = vcombine.high %v11255_v13, %v11207_v30  ;;  %v3788_v35 = vcombine.low %v11302_v51, %v3787_v46 }
 0x19d   : > { %v3845_v18 = vpop.permute.xlu1 %3844  ;;  %2575 = vrot.lane.b32.xlu0 %v2505_v2, %s8238_s18  ;;  %v3343_v42 = vcombine.low %v3335_v15, %v3342_v4  ;;  %v3977_v2 = vcombine.low %v11233_v20, %v11338_v39  ;;  %v3805_v20 = vcombine.low %v3797_v49, %v3804_v59  ;;  %v4150_v63 = vrot.slane %v4142_v52, %v8348_v5 }
 0x19e   : > { %3905 = vst.msk [vmem:[#allocation2 + $0x78] sm:$0xff] %vm3889_vm15, %v3845_v18  ;;  %v3734_v4 = vcombine.high %v11204_v14, %v11204_v14  ;;  %v3992_v51 = vrot.slane %v3978_v60, %v8348_v5  ;;  %v11384_v36 = vrot.slane %v2820_v11, %v8348_v5  ;;  %v4140_v53 = vrot.slane %v7723_v23, %v8348_v5 }
 0x19f   : > { %2874 = vrot.lane.b32.xlu1 %v11198_v38, %s8239_s19  ;;  %v3843_v16 = vpop.permute.xlu0 %3842  ;;  %v3932_v38 = vsel %vm8499_vm6, %v3930_v34, %v3931_v32  ;;  %v3985_v15 = vrot.slane %v3977_v2, %v8348_v5  ;;  %v4158_v58 = vcombine.low %v4150_v63, %v4157_v28  ;;  %v3933_v63 = vrot.slane %v3931_v32, 2 }
 0x1a0   : > { %3904 = vst.msk [vmem:[#allocation2 + $0x70] sm:$0xff] %vm3889_vm15, %v3843_v16  ;;  %v3995_v41 = vcombine.low %v3929_v7, %v3932_v38  ;;  %v4412_v37 = vpop.f32.mrb[0].mxu0  ;;  %v11402_v38 = vrot.slane %v3734_v4, %v8348_v5 }
 0x1a1   : > { %v4050_v24 = vpop.permute.xlu1 %4049  ;;  %2872 = vrot.lane.b32.xlu0 %v2802_v62, %s8239_s19  ;;  %v4413_v9 = vadd.f32 %v11350_v55, %v4412_v37  ;;  %v7847_v34 = vpop.f32.mrb[1].mxu0 }
 0x1a2   : > { %4110 = vst.msk [vmem:[#allocation2 + $0x78] sm:$0xff] %vm4094_vm0, %v4050_v24  ;;  %v4009_v56 = vrot.slane %v3995_v41, %v8348_v5  ;;  %v4415_v33 = vpop.f32.mrb[2].mxu0  ;;  %v3934_v50 = vrot.slane %v11402_v38, 7  ;;  %v11441_v34 = vcombine.high %v11402_v38, %v11402_v38 }
 0x1a3   : > { %3415 = vrot.lane.b32.xlu1 %v3360_v1, %s8243_s23  ;;  %v4048_v48 = vpop.permute.xlu0 %4047  ;;  %v4514_v17 = vmax.f32 %v4413_v9, 0.0  ;;  %v4416_v30 = vadd.f32 %v11350_v55, %v4415_v33  ;;  %v7848_v18 = vpop.f32.mrb[3].mxu0  ;;  %v3368_v33 = vrot.slane %v3361_v44, %v8348_v5  ;;  %v3605_v44 = vcombine.low %v11255_v13, %v11293_v27 }
 0x1a4   : > { %4109 = vst.msk [vmem:[#allocation2 + $0x70] sm:$0xff] %vm4094_vm0, %v4048_v48  ;;  %v4010_v14 = vcombine.low %v4002_v26, %v4009_v56  ;;  %v3935_v27 = vsel %vm8499_vm6, %v3933_v63, %v3934_v50 }
 0x1a5   : > { %v4198_v21 = vpop.permute.xlu1 %4197  ;;  %3413 = vrot.lane.b32.xlu0 %v3343_v42, %s8243_s23  ;;  %v4564_v47 = vcombine.high %v4514_v17, %v4514_v17  ;;  %v11388_v1 = vrot.slane %v4514_v17, %v8348_v5  ;;  %v4515_v31 = vmax.f32 %v4416_v30, 0.0  ;;  %v3993_v42 = vcombine.low %v3985_v15, %v3992_v51 }
 0x1a6   : > { %4258 = vst.msk [vmem:[#allocation2 + $0x78] sm:$0xff] %vm4242_vm1, %v4198_v21  ;;  %v3937_v51 = vrot.slane %v11441_v34, 7 }
 0x1a7   : > { %3659 = vrot.lane.b32.xlu1 %v3604_v40, %s8240_s20  ;;  %v4196_v0 = vpop.permute.xlu0 %4195  ;;  %v11394_v16 = vrot.slane %v4564_v47, %v8348_v5  ;;  %v11398_v43 = vcombine.high %v11388_v1, %v11388_v1  ;;  %v4581_v19 = vcombine.high %v4515_v31, %v4515_v31  ;;  %v11405_v24 = vrot.slane %v4515_v31, %v8348_v5 }
 0x1a8   : > { %4257 = vst.msk [vmem:[#allocation2 + $0x70] sm:$0xff] %vm4242_vm1, %v4196_v0  ;;  %v4141_v40 = vcombine.low %v11384_v36, %v4140_v53  ;;  %v7741_v59 = vrot.slane %v11388_v1, 9 }
 0x1a9   : > { %v2048_v62 = vpop.permute.xlu1 %2047  ;;  %3657 = vrot.lane.b32.xlu0 %v3587_v61, %s8240_s20  ;;  %v11412_v49 = vcombine.high %v11394_v16, %v11394_v16  ;;  %v5325_v39 = vrot.slane %v11398_v43, 7  ;;  %v5328_v54 = vrot.slane %v11394_v16, 7  ;;  %v11419_v41 = vrot.slane %v4581_v19, %v8348_v5 }
 0x1aa   : > { %2106 = vst.msk [vmem:[#allocation2 + $0x88] sm:$0xff] %vm2088_vm10, %v2048_v62  ;;  %v11423_v45 = vcombine.high %v11405_v24, %v11405_v24  ;;  %v5334_v25 = vrot.slane %v11405_v24, 7  ;;  %v5930_v21 = vcombine.low %v11398_v43, %v11394_v16  ;;  %v4980_v17 = vcombine.low %v11388_v1, %v11398_v43 }
 0x1ab   : > { %3860 = vrot.lane.b32.xlu1 %v3805_v20, %s8241_s21  ;;  %v2046_v29 = vpop.permute.xlu0 %2045  ;;  %v11430_v61 = vsel %vm8499_vm6, %v7741_v59, %v5325_v39  ;;  %v5327_v2 = vrot.slane %v5325_v39, 2  ;;  %v5931_v37 = vcombine.low %v11412_v49, %v11405_v24  ;;  %v5330_v11 = vrot.slane %v5328_v54, 2 }
 0x1ac   : > { %2105 = vst.msk [vmem:[#allocation2 + $0x80] sm:$0xff] %vm2088_vm10, %v2046_v29  ;;  %v5336_v23 = vrot.slane %v5334_v25, 2  ;;  %v5337_v9 = vrot.slane %v11423_v45, 7  ;;  %v5947_v20 = vcombine.low %v11423_v45, %v11419_v41  ;;  %v5340_v30 = vrot.slane %v11419_v41, 7 }
 0x1ad   : > { %v2566_v7 = vpop.permute.xlu1 %2565  ;;  %3858 = vrot.lane.b32.xlu0 %v3788_v35, %s8241_s21  ;;  %v4284_v52 = vld [vmem:[#allocation2 + $0x78] sm:$0xff]  ;;  %v5329_v56 = vsel %vm8499_vm6, %v5327_v2, %v5328_v54  ;;  %v3806_v35 = vcombine.low %v11267_v22, %v11402_v38  ;;  %v3936_v62 = vrot.slane %v3934_v50, 2  ;;  %v5331_v15 = vrot.slane %v11412_v49, 7 }
 0x1ae   : > { %2624 = vst.msk [vmem:[#allocation2 + $0x88] sm:$0xff] %vm2606_vm11, %v2566_v7  ;;  %v5551_v12 = vcombine.low %v11430_v61, %v5329_v56  ;;  %v11466_v22 = vrot.slane %v5930_v21, %v8348_v5  ;;  %v11469_v32 = vrot.slane %v5931_v37, %v8348_v5  ;;  %v5339_v4 = vrot.slane %v5337_v9, 2 }
 0x1af   : > { %4065 = vrot.lane.b32.xlu1 %v4010_v14, %s8244_s29  ;;  %v2564_v48 = vpop.permute.xlu0 %2563  ;;  %v4283_v46 = vld [vmem:[#allocation2 + $0x70] sm:$0xff]  ;;  %v5332_v28 = vsel %vm8499_vm6, %v5330_v11, %v5331_v15  ;;  %v5333_v53 = vrot.slane %v5331_v15, 2  ;;  %v11478_v47 = vsel %vm8499_vm6, %v5336_v23, %v5337_v9  ;;  %v3813_v13 = vrot.slane %v3806_v35, %v8348_v5 }
 0x1b0   : > { %2623 = vst.msk [vmem:[#allocation2 + $0x80] sm:$0xff] %vm2606_vm11, %v2564_v48  ;;  %v4301_v26 = vpack.c.bf16 %v4284_v52, %v4283_v46  ;;  %v11484_v14 = vsel %vm8499_vm6, %v5339_v4, %v5340_v30  ;;  %v4597_v11 = vcombine.high %v11419_v41, %v11419_v41 }
 0x1b1   : > { %v2863_v60 = vpop.permute.xlu1 %2862  ;;  %4063 = vrot.lane.b32.xlu0 %v3993_v42, %s8244_s29  ;;  %v5335_v43 = vsel %vm8499_vm6, %v5333_v53, %v5334_v25  ;;  %v5568_v19 = vcombine.low %v11478_v47, %v11484_v14  ;;  %v3612_v25 = vrot.slane %v3605_v44, %v8348_v5 }
 0x1b2   : > { %2921 = vst.msk [vmem:[#allocation2 + $0x88] sm:$0xff] %vm2903_vm12, %v2863_v60  ;;  %7874 = vmatmul.mubr.msk.bf16.gmra.mrb[28].mxu0 %vm4334_vm2, %v4301_v26  ;;  %v5552_v7 = vcombine.low %v5332_v28, %v5335_v43 }
 0x1b3   : > { %4213 = vrot.lane.b32.xlu1 %v4158_v58, %s8245_s8  ;;  %v2861_v0 = vpop.permute.xlu0 %2860  ;;  %7877 = vmatprep.mubr.msk.bf16.mxu0 %vm8247_vm9, %v13436_v3  ;;  %v3938_v58 = vsel %vm8499_vm6, %v3936_v62, %v3937_v51 }
 0x1b4   : > { %2920 = vst.msk [vmem:[#allocation2 + $0x80] sm:$0xff] %vm2903_vm12, %v2861_v0  ;;  %v11512_v59 = vrot.slane %v5552_v7, %v8348_v5  ;;  %v4011_v48 = vcombine.low %v3935_v27, %v3938_v58 }
 0x1b5   : > { %v3404_v18 = vpop.permute.xlu1 %3403  ;;  %4211 = vrot.lane.b32.xlu0 %v4141_v40, %s8245_s8 }
 0x1b6   : > { %3462 = vst.msk [vmem:[#allocation2 + $0x88] sm:$0xff] %vm3444_vm13, %v3404_v18 }
 0x1b7   : > { %2579 = vrot.lane.b32.xlu1 %v11194_v10, %s8238_s18  ;;  %v3402_v1 = vpop.permute.xlu0 %3401  ;;  %v4981_v10 = vcombine.low %v11394_v16, %v11412_v49  ;;  %v4988_v16 = vrot.slane %v4980_v17, %v8348_v5  ;;  %v11509_v49 = vrot.slane %v5551_v12, %v8348_v5  ;;  %v7742_v17 = vrot.slane %v4597_v11, 9 }
 0x1b8   : > { %3461 = vst.msk [vmem:[#allocation2 + $0x80] sm:$0xff] %vm3444_vm13, %v3402_v1  ;;  %v11549_v1 = vrot.slane %v5947_v20, %v8348_v5 }
 0x1b9   : > { %v3648_v29 = vpop.permute.xlu1 %3647  ;;  %2061 = vrot.lane.b32.xlu0 %v10794_v6, %s8242_s22  ;;  %v4995_v42 = vrot.slane %v4981_v10, %v8348_v5  ;;  %v4159_v6 = vcombine.low %v11402_v38, %v11441_v34  ;;  %v4997_v10 = vcombine.low %v11405_v24, %v11423_v45 }
 0x1ba   : > { %3706 = vst.msk [vmem:[#allocation2 + $0x88] sm:$0xff] %vm3688_vm14, %v3648_v29 }
 0x1bb   : > { %3417 = vrot.lane.b32.xlu1 %v3368_v33, %s8243_s23  ;;  %v3646_v40 = vpop.permute.xlu0 %3645  ;;  %v4996_v39 = vcombine.low %v4988_v16, %v4995_v42  ;;  %v4166_v46 = vrot.slane %v4159_v6, %v8348_v5 }
 0x1bc   : > { %3705 = vst.msk [vmem:[#allocation2 + $0x80] sm:$0xff] %vm3688_vm14, %v3646_v40  ;;  %v11563_v40 = vrot.slane %v5568_v19, %v8348_v5 }
 0x1bd   : > { %v3849_v54 = vpop.permute.xlu1 %3848  ;;  %2876 = vrot.lane.b32.xlu0 %v11384_v36, %s8239_s19  ;;  %5305 = vst.msk [vmem:[#allocation3] sm:$0xff] %vm5304_vm4, %v4996_v39  ;;  %v4018_v36 = vrot.slane %v4011_v48, %v8348_v5  ;;  %s8248_s19 = smov 40  }
 0x1be   : > { %3907 = vst.msk [vmem:[#allocation2 + $0x88] sm:$0xff] %vm3889_vm15, %v3849_v54 }
 0x1bf   : > { %3862 = vrot.lane.b32.xlu1 %v3813_v13, %s8241_s21  ;;  %v3847_v52 = vpop.permute.xlu0 %3846 }
 0x1c0   : > { %3906 = vst.msk [vmem:[#allocation2 + $0x80] sm:$0xff] %vm3889_vm15, %v3847_v52  ;;  %v4420_v37 = vpop.f32.mrb[4].mxu0 }
 0x1c1   : > { %v4054_v21 = vpop.permute.xlu1 %4053  ;;  %3661 = vrot.lane.b32.xlu0 %v3612_v25, %s8240_s20  ;;  %v4421_v60 = vadd.f32 %v11350_v55, %v4420_v37  ;;  %v7851_v50 = vpop.f32.mrb[5].mxu0 }
 0x1c2   : > { %4112 = vst.msk [vmem:[#allocation2 + $0x88] sm:$0xff] %vm4094_vm0, %v4054_v21  ;;  %v4423_v9 = vpop.f32.mrb[6].mxu0 }
 0x1c3   : > { %4215 = vrot.lane.b32.xlu1 %v4166_v46, %s8245_s8  ;;  %v4052_v61 = vpop.permute.xlu0 %4051  ;;  %v4516_v34 = vmax.f32 %v4421_v60, 0.0  ;;  %v4424_v26 = vadd.f32 %v11350_v55, %v4423_v9  ;;  %v7852_v56 = vpop.f32.mrb[7].mxu0 }
 0x1c4   : > { %4111 = vst.msk [vmem:[#allocation2 + $0x80] sm:$0xff] %vm4094_vm0, %v4052_v61 }
 0x1c5   : > { %v4202_v2 = vpop.permute.xlu1 %4201  ;;  %4067 = vrot.lane.b32.xlu0 %v4018_v36, %s8244_s29  ;;  %v4598_v33 = vcombine.high %v4516_v34, %v4516_v34  ;;  %v4605_v35 = vrot.slane %v4516_v34, %v8348_v5  ;;  %v4517_v63 = vmax.f32 %v4424_v26, 0.0  ;;  %s8249_s29 = smov 48  }
 0x1c6   : > { %4260 = vst.msk [vmem:[#allocation2 + $0x88] sm:$0xff] %vm4242_vm1, %v4202_v2 }
 0x1c7   : > { %v4200_v23 = vpop.permute.xlu0 %4199  ;;  %v4612_v18 = vrot.slane %v4598_v33, %v8348_v5  ;;  %v4613_v62 = vcombine.high %v4605_v35, %v4605_v35  ;;  %v4998_v15 = vcombine.low %v4597_v11, %v4605_v35  ;;  %v5344_v12 = vrot.slane %v4605_v35, 7 }
 0x1c8   : > { %4259 = vst.msk [vmem:[#allocation2 + $0x80] sm:$0xff] %vm4242_vm1, %v4200_v23  ;;  %v4615_v51 = vcombine.high %v4517_v63, %v4517_v63  ;;  %v11542_v28 = vrot.slane %v4517_v63, %v8348_v5 }
 0x1c9   : > { %v2052_v0 = vpop.permute.xlu1 %2051  ;;  %v4614_v29 = vcombine.high %v4612_v18, %v4612_v18  ;;  %v5346_v44 = vrot.slane %v5344_v12, 2  ;;  %v5347_v43 = vrot.slane %v4613_v62, 7  ;;  %v5350_v7 = vrot.slane %v4612_v18, 7 }
 0x1ca   : > { %2108 = vst.msk [vmem:[#allocation2 + $0x98] sm:$0xff] %vm2088_vm10, %v2052_v0  ;;  %v5948_v16 = vcombine.low %v4605_v35, %v4613_v62  ;;  %v4629_v42 = vrot.slane %v4615_v51, %v8348_v5  ;;  %v4630_v13 = vcombine.high %v11542_v28, %v11542_v28  ;;  %v5356_v27 = vrot.slane %v11542_v28, 7 }
 0x1cb   : > { %v2050_v30 = vpop.permute.xlu0 %2049  ;;  %v5352_v41 = vrot.slane %v5350_v7, 2  ;;  %v5015_v20 = vcombine.low %v4614_v29, %v11542_v28  ;;  %v11569_v48 = vrot.slane %v4998_v15, %v8348_v5  ;;  %v5014_v52 = vcombine.low %v4613_v62, %v4612_v18 }
 0x1cc   : > { %2107 = vst.msk [vmem:[#allocation2 + $0x90] sm:$0xff] %vm2088_vm10, %v2050_v30  ;;  %v11565_v39 = vcombine.high %v4629_v42, %v4629_v42  ;;  %v5358_v54 = vrot.slane %v5356_v27, 2  ;;  %v5359_v25 = vrot.slane %v4630_v13, 7  ;;  %v7743_v46 = vrot.slane %v4629_v42, 9 }
 0x1cd   : > { %v2570_v4 = vpop.permute.xlu1 %2569  ;;  %v4286_v53 = vld [vmem:[#allocation2 + $0x88] sm:$0xff]  ;;  %v5345_v21 = vsel %vm8499_vm6, %v7742_v17, %v5344_v12  ;;  %v5348_v47 = vsel %vm8499_vm6, %v5346_v44, %v5347_v43  ;;  %v5349_v61 = vrot.slane %v5347_v43, 2  ;;  %v5353_v2 = vrot.slane %v4614_v29, 7 }
 0x1ce   : > { %2626 = vst.msk [vmem:[#allocation2 + $0x98] sm:$0xff] %vm2606_vm11, %v2570_v4  ;;  %v5031_v14 = vcombine.low %v4629_v42, %v11565_v39  ;;  %v5363_v19 = vrot.slane %v11565_v39, 7  ;;  %v11582_v60 = vrot.slane %v5014_v52, %v8348_v5  ;;  %v5569_v50 = vcombine.low %v5345_v21, %v5348_v47 }
 0x1cf   : > { %v2568_v58 = vpop.permute.xlu0 %2567  ;;  %v4285_v6 = vld [vmem:[#allocation2 + $0x80] sm:$0xff]  ;;  %v11585_v11 = vrot.slane %v5948_v16, %v8348_v5  ;;  %v5964_v23 = vcombine.low %v4612_v18, %v4614_v29  ;;  %v5965_v9 = vcombine.low %v11542_v28, %v4630_v13  ;;  %v5351_v34 = vsel %vm8499_vm6, %v5349_v61, %v5350_v7 }
 0x1d0   : > { %2625 = vst.msk [vmem:[#allocation2 + $0x90] sm:$0xff] %vm2606_vm11, %v2568_v58  ;;  %v4302_v24 = vpack.c.bf16 %v4286_v53, %v4285_v6  ;;  %v5354_v26 = vsel %vm8499_vm6, %v5352_v41, %v5353_v2  ;;  %v11594_v56 = vrot.slane %v5031_v14, %v8348_v5  ;;  %v11599_v33 = vrot.slane %v5569_v50, %v8348_v5 }
 0x1d1   : > { %v2867_v45 = vpop.permute.xlu1 %2866  ;;  %v5585_v35 = vcombine.low %v5351_v34, %v5354_v26  ;;  %v11602_v63 = vrot.slane %v5964_v23, %v8348_v5  ;;  %v11608_v30 = vsel %vm8499_vm6, %v7743_v46, %v5363_v19  ;;  %v5355_v62 = vrot.slane %v5353_v2, 2 }
 0x1d2   : > { %2923 = vst.msk [vmem:[#allocation2 + $0x98] sm:$0xff] %vm2903_vm12, %v2867_v45  ;;  %7878 = vmatmul.mubr.msk.bf16.gmra.mrb[32].mxu0 %vm4334_vm2, %v4302_v24  ;;  %v5005_v15 = vrot.slane %v4997_v10, %v8348_v5  ;;  %v11622_v53 = vrot.slane %v5015_v20, %v8348_v5  ;;  %v5360_v29 = vsel %vm8499_vm6, %v5358_v54, %v5359_v25 }
 0x1d3   : > { %v2865_v36 = vpop.permute.xlu0 %2864  ;;  %7881 = vmatprep.mubr.msk.bf16.mxu0 %vm8247_vm9, %v13436_v3  ;;  %v11615_v4 = vrot.slane %v5585_v35, %v8348_v5  ;;  %v5357_v10 = vsel %vm8499_vm6, %v5355_v62, %v5356_v27  ;;  %v11630_v44 = vrot.slane %v5965_v9, %v8348_v5 }
 0x1d4   : > { %2922 = vst.msk [vmem:[#allocation2 + $0x90] sm:$0xff] %vm2903_vm12, %v2865_v36  ;;  %v5013_v43 = vcombine.low %v5005_v15, %v11569_v48  ;;  %v5586_v16 = vcombine.low %v5357_v10, %v5360_v29  ;;  %v5030_v13 = vcombine.low %v11582_v60, %v11622_v53 }
 0x1d5   : > { %v3408_v37 = vpop.permute.xlu1 %3407 }
 0x1d6   : > { %3464 = vst.msk [vmem:[#allocation2 + $0x98] sm:$0xff] %vm3444_vm13, %v3408_v37  ;;  %v11644_v41 = vrot.slane %v5586_v16, %v8348_v5 }
 0x1d7   : > { %v3406_v17 = vpop.permute.xlu0 %3405  ;;  %5306 = vst.msk [vmem:[#allocation3 + $0x8] sm:$0xff] %vm5304_vm4, %v5013_v43  ;;  %5307 = vst.msk [vmem:[#allocation3 + $0x10] sm:$0xff] %vm5304_vm4, %v5030_v13 }
 0x1d8   : > { %3463 = vst.msk [vmem:[#allocation2 + $0x90] sm:$0xff] %vm3444_vm13, %v3406_v17 }
 0x1d9   : > { %v3652_v12 = vpop.permute.xlu1 %3651 }
 0x1da   : > { %3708 = vst.msk [vmem:[#allocation2 + $0x98] sm:$0xff] %vm3688_vm14, %v3652_v12  ;;  %v5365_v12 = vrot.slane %v5363_v19, 2 }
 0x1db   : > { %v3650_v58 = vpop.permute.xlu0 %3649 }
 0x1dc   : > { %3707 = vst.msk [vmem:[#allocation2 + $0x90] sm:$0xff] %vm3688_vm14, %v3650_v58 }
 0x1dd   : > { %v3853_v6 = vpop.permute.xlu1 %3852 }
 0x1de   : > { %3909 = vst.msk [vmem:[#allocation2 + $0x98] sm:$0xff] %vm3889_vm15, %v3853_v6 }
 0x1df   : > { %v3851_v24 = vpop.permute.xlu0 %3850 }
 0x1e0   : > { %3908 = vst.msk [vmem:[#allocation2 + $0x90] sm:$0xff] %vm3889_vm15, %v3851_v24 }
 0x1e1   : > { %v4058_v45 = vpop.permute.xlu1 %4057  ;;  %v4428_v46 = vpop.f32.mrb[8].mxu0 }
 0x1e2   : > { %4114 = vst.msk [vmem:[#allocation2 + $0x98] sm:$0xff] %vm4094_vm0, %v4058_v45  ;;  %v4429_v52 = vadd.f32 %v11350_v55, %v4428_v46  ;;  %v7855_v21 = vpop.f32.mrb[9].mxu0 }
 0x1e3   : > { %v4056_v54 = vpop.permute.xlu0 %4055  ;;  %v4431_v14 = vpop.f32.mrb[10].mxu0 }
 0x1e4   : > { %4113 = vst.msk [vmem:[#allocation2 + $0x90] sm:$0xff] %vm4094_vm0, %v4056_v54  ;;  %v4518_v36 = vmax.f32 %v4429_v52, 0.0  ;;  %v4432_v61 = vadd.f32 %v11350_v55, %v4431_v14  ;;  %v7856_v2 = vpop.f32.mrb[11].mxu0 }
 0x1e5   : > { %v4206_v25 = vpop.permute.xlu1 %4205 }
 0x1e6   : > { %4262 = vst.msk [vmem:[#allocation2 + $0x98] sm:$0xff] %vm4242_vm1, %v4206_v25  ;;  %v4632_v50 = vcombine.high %v4518_v36, %v4518_v36  ;;  %v4639_v23 = vrot.slane %v4518_v36, %v8348_v5  ;;  %v4519_v9 = vmax.f32 %v4432_v61, 0.0 }
 0x1e7   : > { %v4204_v47 = vpop.permute.xlu0 %4203 }
 0x1e8   : > { %4261 = vst.msk [vmem:[#allocation2 + $0x90] sm:$0xff] %vm4242_vm1, %v4204_v47  ;;  %v4646_v26 = vrot.slane %v4632_v50, %v8348_v5  ;;  %v4647_v35 = vcombine.high %v4639_v23, %v4639_v23  ;;  %v5366_v17 = vrot.slane %v4639_v23, 7  ;;  %v5981_v62 = vcombine.low %v11565_v39, %v4639_v23 }
 0x1e9   : > { %v2056_v37 = vpop.permute.xlu1 %2055  ;;  %v4649_v10 = vcombine.high %v4519_v9, %v4519_v9  ;;  %v4656_v29 = vrot.slane %v4519_v9, %v8348_v5 }
 0x1ea   : > { %2110 = vst.msk [vmem:[#allocation2 + $0xa8] sm:$0xff] %vm2088_vm10, %v2056_v37  ;;  %v5032_v16 = vcombine.low %v4639_v23, %v4647_v35  ;;  %v5368_v13 = vrot.slane %v5366_v17, 2  ;;  %v5369_v58 = vrot.slane %v4647_v35, 7  ;;  %v5372_v6 = vrot.slane %v4646_v26, 7 }
 0x1eb   : > { %v2054_v34 = vpop.permute.xlu0 %2053  ;;  %v4648_v24 = vcombine.high %v4646_v26, %v4646_v26  ;;  %v11667_v45 = vrot.slane %v4649_v10, %v8348_v5  ;;  %v4664_v54 = vcombine.high %v4656_v29, %v4656_v29  ;;  %v5378_v25 = vrot.slane %v4656_v29, 7 }
 0x1ec   : > { %2109 = vst.msk [vmem:[#allocation2 + $0xa0] sm:$0xff] %vm2088_vm10, %v2054_v34  ;;  %v5374_v39 = vrot.slane %v5372_v6, 2  ;;  %v11671_v47 = vrot.slane %v5032_v16, %v8348_v5  ;;  %v5367_v14 = vsel %vm8499_vm6, %v5365_v12, %v5366_v17  ;;  %v5370_v34 = vsel %vm8499_vm6, %v5368_v13, %v5369_v58 }
 0x1ed   : > { %v2574_v15 = vpop.permute.xlu1 %2573  ;;  %v4288_v43 = vld [vmem:[#allocation2 + $0x98] sm:$0xff]  ;;  %v11677_v36 = vcombine.high %v11667_v45, %v11667_v45  ;;  %v5049_v61 = vcombine.low %v4664_v54, %v11667_v45  ;;  %v5375_v2 = vrot.slane %v4648_v24, 7  ;;  %v7744_v37 = vrot.slane %v4664_v54, 9 }
 0x1ee   : > { %2628 = vst.msk [vmem:[#allocation2 + $0xa8] sm:$0xff] %vm2606_vm11, %v2574_v15  ;;  %v5382_v50 = vrot.slane %v11667_v45, 7  ;;  %v5998_v23 = vcombine.low %v4648_v24, %v4656_v29  ;;  %v11685_v9 = vcombine.low %v11594_v56, %v11671_v47  ;;  %v5371_v12 = vrot.slane %v5369_v58, 2 }
 0x1ef   : > { %v2572_v46 = vpop.permute.xlu0 %2571  ;;  %v4287_v52 = vld [vmem:[#allocation2 + $0x90] sm:$0xff]  ;;  %v5377_v17 = vrot.slane %v5375_v2, 2  ;;  %v5602_v10 = vcombine.low %v11608_v30, %v5367_v14  ;;  %v11696_v54 = vrot.slane %v5981_v62, %v8348_v5  ;;  %v5048_v13 = vcombine.low %v4646_v26, %v4648_v24 }
 0x1f0   : > { %2627 = vst.msk [vmem:[#allocation2 + $0xa0] sm:$0xff] %vm2606_vm11, %v2572_v46  ;;  %v4303_v19 = vpack.c.bf16 %v4288_v43, %v4287_v52  ;;  %v5982_v43 = vcombine.low %v4647_v35, %v4646_v26  ;;  %v5384_v16 = vrot.slane %v5382_v50, 2  ;;  %v5376_v46 = vsel %vm8499_vm6, %v5374_v39, %v5375_v2 }
 0x1f1   : > { %v2871_v21 = vpop.permute.xlu1 %2870  ;;  %5308 = vst.msk [vmem:[#allocation3 + $0x18] sm:$0xff] %vm5304_vm4, %v11685_v9  ;;  %v5379_v58 = vsel %vm8499_vm6, %v5377_v17, %v5378_v25  ;;  %v5373_v30 = vsel %vm8499_vm6, %v5371_v12, %v5372_v6  ;;  %v11706_v35 = vrot.slane %v5602_v10, %v8348_v5  ;;  %v11712_v26 = vrot.slane %v5048_v13, %v8348_v5 }
 0x1f2   : > { %2925 = vst.msk [vmem:[#allocation2 + $0xa8] sm:$0xff] %vm2903_vm12, %v2871_v21  ;;  %7882 = vmatmul.mubr.msk.bf16.gmra.mrb[36].mxu0 %vm4334_vm2, %v4303_v19  ;;  %v11709_v52 = vrot.slane %v5982_v43, %v8348_v5  ;;  %v5603_v62 = vcombine.low %v5370_v34, %v5373_v30  ;;  %v5619_v39 = vcombine.low %v5376_v46, %v5379_v58  ;;  %v5385_v10 = vrot.slane %v11677_v36, 7 }
 0x1f3   : > { %v2869_v15 = vpop.permute.xlu0 %2868  ;;  %7885 = vmatprep.mubr.msk.bf16.mxu0 %vm8247_vm9, %v13436_v3  ;;  %v11723_v21 = vrot.slane %v5049_v61, %v8348_v5  ;;  %v11726_v14 = vrot.slane %v5998_v23, %v8348_v5  ;;  %v5383_v12 = vsel %vm8499_vm6, %v7744_v37, %v5382_v50  ;;  %v5999_v43 = vcombine.low %v11667_v45, %v11677_v36 }
 0x1f4   : > { %2924 = vst.msk [vmem:[#allocation2 + $0xa0] sm:$0xff] %vm2903_vm12, %v2869_v15  ;;  %13573 = vst [vmem:[#allocation41_spill] sm:$0xff] %v11709_v52  ;;  %v11718_v19 = vcombine.low %v11696_v54, %v11709_v52  ;;  %v11730_v34 = vrot.slane %v5603_v62, %v8348_v5  ;;  %v11735_v15 = vrot.slane %v5619_v39, %v8348_v5 }
 0x1f5   : > { %v3412_v29 = vpop.permute.xlu1 %3411  ;;  %13574 = vst [vmem:[#allocation38_spill] sm:$0xff] %v11723_v21  ;;  %13575 = vst [vmem:[#allocation36_spill] sm:$0xff] %v11726_v14  ;;  %v11742_v61 = vcombine.low %v11712_v26, %v11723_v21  ;;  %v5386_v13 = vsel %vm8499_vm6, %v5384_v16, %v5385_v10  ;;  %v11760_v46 = vrot.slane %v5999_v43, %v8348_v5 }
 0x1f6   : > { %3466 = vst.msk [vmem:[#allocation2 + $0xa8] sm:$0xff] %vm3444_vm13, %v3412_v29  ;;  %13576 = vst [vmem:[#allocation44_spill] sm:$0xff] %v11735_v15  ;;  %v11751_v29 = vcombine.low %v11706_v35, %v11730_v34  ;;  %v5620_v58 = vcombine.low %v5383_v12, %v5386_v13 }
 0x1f7   : > { %v3410_v25 = vpop.permute.xlu0 %3409  ;;  %13577 = vst [vmem:[#allocation45_spill] sm:$0xff] %v11742_v61  ;;  %5309 = vst.msk [vmem:[#allocation3 + $0x20] sm:$0xff] %vm5304_vm4, %v11742_v61  ;;  %v11766_v30 = vcombine.low %v11726_v14, %v11760_v46 }
 0x1f8   : > { %3465 = vst.msk [vmem:[#allocation2 + $0xa0] sm:$0xff] %vm3444_vm13, %v3410_v25  ;;  %13578 = vst [vmem:[#allocation46_spill] sm:$0xff] %v11760_v46  ;;  %v11769_v62 = vrot.slane %v5620_v58, %v8348_v5 }
 0x1f9   : > { %v3656_v2 = vpop.permute.xlu1 %3655  ;;  %13579 = vst [vmem:[#allocation30_spill] sm:$0xff] %v11766_v30 }
 0x1fa   : > { %3710 = vst.msk [vmem:[#allocation2 + $0xa8] sm:$0xff] %vm3688_vm14, %v3656_v2  ;;  %13580 = vst [vmem:[#allocation43_spill] sm:$0xff] %v11769_v62  ;;  %v11774_v25 = vcombine.low %v11735_v15, %v11769_v62 }
 0x1fb   : > { %v3654_v50 = vpop.permute.xlu0 %3653 }
 0x1fc   : > { %3709 = vst.msk [vmem:[#allocation2 + $0xa0] sm:$0xff] %vm3688_vm14, %v3654_v50  ;;  %13581 = vst [vmem:[#allocation34_spill] sm:$0xff] %v11774_v25 }
 0x1fd   : > { %v3857_v45 = vpop.permute.xlu1 %3856 }
 0x1fe   : > { %3911 = vst.msk [vmem:[#allocation2 + $0xa8] sm:$0xff] %vm3889_vm15, %v3857_v45 }
 0x1ff   : > { %v3855_v39 = vpop.permute.xlu0 %3854 }
 0x200   : > { %3910 = vst.msk [vmem:[#allocation2 + $0xa0] sm:$0xff] %vm3889_vm15, %v3855_v39 }
 0x201   : > { %v4062_v16 = vpop.permute.xlu1 %4061 }
 0x202   : > { %4116 = vst.msk [vmem:[#allocation2 + $0xa8] sm:$0xff] %vm4094_vm0, %v4062_v16 }
 0x203   : > { %v4060_v2 = vpop.permute.xlu0 %4059  ;;  %v4436_v43 = vpop.f32.mrb[12].mxu0 }
 0x204   : > { %4115 = vst.msk [vmem:[#allocation2 + $0xa0] sm:$0xff] %vm4094_vm0, %v4060_v2  ;;  %v4437_v50 = vadd.f32 %v11350_v55, %v4436_v43  ;;  %v7859_v13 = vpop.f32.mrb[13].mxu0 }
 0x205   : > { %v4210_v12 = vpop.permute.xlu1 %4209  ;;  %v4439_v58 = vpop.f32.mrb[14].mxu0 }
 0x206   : > { %4264 = vst.msk [vmem:[#allocation2 + $0xa8] sm:$0xff] %vm4242_vm1, %v4210_v12  ;;  %v4520_v39 = vmax.f32 %v4437_v50, 0.0  ;;  %v4440_v23 = vadd.f32 %v11350_v55, %v4439_v58  ;;  %v7860_v37 = vpop.f32.mrb[15].mxu0 }
 0x207   : > { %v4208_v45 = vpop.permute.xlu0 %4207 }
 0x208   : > { %4263 = vst.msk [vmem:[#allocation2 + $0xa0] sm:$0xff] %vm4242_vm1, %v4208_v45  ;;  %v4666_v16 = vcombine.high %v4520_v39, %v4520_v39  ;;  %v4673_v2 = vrot.slane %v4520_v39, %v8348_v5  ;;  %v4521_v17 = vmax.f32 %v4440_v23, 0.0 }
 0x209   : > { %v2060_v24 = vpop.permute.xlu1 %2059 }
 0x20a   : > { %2112 = vst.msk [vmem:[#allocation2 + $0xb8] sm:$0xff] %vm2088_vm10, %v2060_v24  ;;  %v11785_v12 = vrot.slane %v4666_v16, %v8348_v5  ;;  %v4681_v43 = vcombine.high %v4673_v2, %v4673_v2  ;;  %v5065_v13 = vcombine.low %v11677_v36, %v4673_v2  ;;  %v5388_v50 = vrot.slane %v4673_v2, 7 }
 0x20b   : > { %v2058_v6 = vpop.permute.xlu0 %2057  ;;  %v4683_v58 = vcombine.high %v4521_v17, %v4521_v17  ;;  %v4690_v37 = vrot.slane %v4521_v17, %v8348_v5  ;;  %v5387_v16 = vrot.slane %v5385_v10, 2 }
 0x20c   : > { %2111 = vst.msk [vmem:[#allocation2 + $0xb0] sm:$0xff] %vm2088_vm10, %v2058_v6  ;;  %v4682_v23 = vcombine.high %v11785_v12, %v11785_v12  ;;  %v5394_v39 = vrot.slane %v11785_v12, 7  ;;  %v5390_v27 = vrot.slane %v5388_v50, 2  ;;  %v6015_v42 = vcombine.low %v4673_v2, %v4681_v43 }
 0x20d   : > { %v2578_v45 = vpop.permute.xlu1 %2577  ;;  %v4290_v24 = vld [vmem:[#allocation2 + $0xa8] sm:$0xff]  ;;  %v11795_v36 = vrot.slane %v4683_v58, %v8348_v5  ;;  %v4698_v20 = vcombine.high %v4690_v37, %v4690_v37  ;;  %v5391_v28 = vrot.slane %v4681_v43, 7  ;;  %v5066_v7 = vcombine.low %v4681_v43, %v11785_v12 }
 0x20e   : > { %2630 = vst.msk [vmem:[#allocation2 + $0xb8] sm:$0xff] %vm2606_vm11, %v2578_v45  ;;  %v5396_v51 = vrot.slane %v5394_v39, 2  ;;  %v5397_v0 = vrot.slane %v4682_v23, 7  ;;  %v11807_v38 = vrot.slane %v5065_v13, %v8348_v5  ;;  %v5389_v43 = vsel %vm8499_vm6, %v5387_v16, %v5388_v50 }
 0x20f   : > { %v2576_v6 = vpop.permute.xlu0 %2575  ;;  %v4289_v18 = vld [vmem:[#allocation2 + $0xa0] sm:$0xff]  ;;  %v11801_v10 = vcombine.high %v11795_v36, %v11795_v36  ;;  %v5082_v2 = vcombine.low %v4690_v37, %v4698_v20  ;;  %v5401_v31 = vrot.slane %v4698_v20, 7  ;;  %v6032_v58 = vcombine.low %v4698_v20, %v11795_v36 }
 0x210   : > { %2629 = vst.msk [vmem:[#allocation2 + $0xb0] sm:$0xff] %vm2606_vm11, %v2576_v6  ;;  %v4304_v17 = vpack.c.bf16 %v4290_v24, %v4289_v18  ;;  %13582 = vst [vmem:[#allocation31_spill] sm:$0xff] %v11807_v38  ;;  %v11810_v18 = vrot.slane %v5066_v7, %v8348_v5  ;;  %v7745_v24 = vrot.slane %v4690_v37, 9  ;;  %v5404_v57 = vrot.slane %v11795_v36, 7 }
 0x211   : > { %v2875_v45 = vpop.permute.xlu1 %2874  ;;  %v5403_v6 = vrot.slane %v5401_v31, 2  ;;  %v5083_v13 = vcombine.low %v11795_v36, %v11801_v10  ;;  %v11821_v7 = vrot.slane %v5082_v2, %v8348_v5  ;;  %v11831_v16 = vrot.slane %v6032_v58, %v8348_v5 }
 0x212   : > { %2927 = vst.msk [vmem:[#allocation2 + $0xb8] sm:$0xff] %vm2903_vm12, %v2875_v45  ;;  %7886 = vmatmul.mubr.msk.bf16.gmra.mrb[40].mxu0 %vm4334_vm2, %v4304_v17  ;;  %13583 = vst [vmem:[#allocation33_spill] sm:$0xff] %v11810_v18  ;;  %v11825_v50 = vcombine.low %v11807_v38, %v11810_v18  ;;  %v5402_v37 = vsel %vm8499_vm6, %v7745_v24, %v5401_v31  ;;  %v5392_v36 = vsel %vm8499_vm6, %v5390_v27, %v5391_v28  ;;  %vm2631_vm10 = vcmask 93248  }
 0x213   : > { %v2873_v30 = vpop.permute.xlu0 %2872  ;;  %7889 = vmatprep.mubr.msk.bf16.mxu0 %vm8247_vm9, %v13436_v3  ;;  %13584 = vst [vmem:[#allocation48_spill] sm:$0xff] %v11821_v7  ;;  %13586 = vst [vmem:[#allocation27_spill] sm:$0xff] %v11831_v16  ;;  %v11838_v45 = vrot.slane %v5083_v13, %v8348_v5  ;;  %v5393_v2 = vrot.slane %v5391_v28, 2  ;;  %v5398_v31 = vsel %vm8499_vm6, %v5396_v51, %v5397_v0  ;;  %vm2928_vm11 = vcmask 126048  }
 0x214   : > { %2926 = vst.msk [vmem:[#allocation2 + $0xb0] sm:$0xff] %vm2903_vm12, %v2873_v30  ;;  %13585 = vst [vmem:[#allocation47_spill] sm:$0xff] %v11825_v50  ;;  %v5405_v30 = vsel %vm8499_vm6, %v5403_v6, %v5404_v57  ;;  %v5636_v58 = vcombine.low %v5389_v43, %v5392_v36  ;;  %v11846_v6 = vrot.slane %v6015_v42, %v8348_v5  ;;  %vm3469_vm12 = vcmask 158848  }
 0x215   : > { %v3416_v20 = vpop.permute.xlu1 %3415  ;;  %v5653_v17 = vcombine.low %v5402_v37, %v5405_v30  ;;  %13587 = vst [vmem:[#allocation37_spill] sm:$0xff] %v11838_v45  ;;  %5310 = vst.msk [vmem:[#allocation3 + $0x28] sm:$0xff] %vm5304_vm4, %v11825_v50  ;;  %v11856_v28 = vcombine.low %v11821_v7, %v11838_v45  ;;  %v5395_v0 = vsel %vm8499_vm6, %v5393_v2, %v5394_v39 }
 0x216   : > { %3468 = vst.msk [vmem:[#allocation2 + $0xb8] sm:$0xff] %vm3444_vm13, %v3416_v20  ;;  %v6016_v20 = vcombine.low %v11785_v12, %v4682_v23  ;;  %13588 = vst [vmem:[#allocation52_spill] sm:$0xff] %v11846_v6  ;;  %v5637_v42 = vcombine.low %v5395_v0, %v5398_v31  ;;  %v11864_v12 = vrot.slane %v5636_v58, %v8348_v5 }
 0x217   : > { %v3414_v24 = vpop.permute.xlu0 %3413  ;;  %v11852_v37 = vrot.slane %v5653_v17, %v8348_v5  ;;  %13590 = vst [vmem:[#allocation51_spill] sm:$0xff] %v11856_v28  ;;  %5311 = vst.msk [vmem:[#allocation3 + $0x30] sm:$0xff] %vm5304_vm4, %v11856_v28 }
 0x218   : > { %3467 = vst.msk [vmem:[#allocation2 + $0xb0] sm:$0xff] %vm3444_vm13, %v3414_v24  ;;  %13591 = vst [vmem:[#allocation50_spill] sm:$0xff] %v11864_v12  ;;  %v11867_v23 = vrot.slane %v6016_v20, %v8348_v5  ;;  %v11874_v39 = vrot.slane %v5637_v42, %v8348_v5  ;;  %vm3713_vm13 = vcmask 191648  }
 0x219   : > { %v3660_v13 = vpop.permute.xlu1 %3659  ;;  %13589 = vst [vmem:[#allocation49_spill] sm:$0xff] %v11852_v37 }
 0x21a   : > { %3712 = vst.msk [vmem:[#allocation2 + $0xb8] sm:$0xff] %vm3688_vm14, %v3660_v13  ;;  %13592 = vst [vmem:[#allocation54_spill] sm:$0xff] %v11867_v23  ;;  %v11878_v36 = vcombine.low %v11846_v6, %v11867_v23  ;;  %v11888_v24 = vcombine.low %v11864_v12, %v11874_v39 }
 0x21b   : > { %v3658_v30 = vpop.permute.xlu0 %3657  ;;  %13593 = vst [vmem:[#allocation55_spill] sm:$0xff] %v11874_v39 }
 0x21c   : > { %13594 = vst [vmem:[#allocation53_spill] sm:$0xff] %v11878_v36  ;;  %3711 = vst.msk [vmem:[#allocation2 + $0xb0] sm:$0xff] %vm3688_vm14, %v3658_v30  ;;  %vm3914_vm14 = vcmask 224448  }
 0x21d   : > { %v3861_v31 = vpop.permute.xlu1 %3860  ;;  %13595 = vst [vmem:[#allocation42_spill] sm:$0xff] %v11888_v24 }
 0x21e   : > { %3913 = vst.msk [vmem:[#allocation2 + $0xb8] sm:$0xff] %vm3889_vm15, %v3861_v31 }
 0x21f   : > { %v3859_v20 = vpop.permute.xlu0 %3858 }
 0x220   : > { %3912 = vst.msk [vmem:[#allocation2 + $0xb0] sm:$0xff] %vm3889_vm15, %v3859_v20  ;;  %vm4119_vm15 = vcmask 257248  }
 0x221   : > { %v4066_v13 = vpop.permute.xlu1 %4065 }
 0x222   : > { %4118 = vst.msk [vmem:[#allocation2 + $0xb8] sm:$0xff] %vm4094_vm0, %v4066_v13  ;;  %v5406_v13 = vrot.slane %v5404_v57, 2 }
 0x223   : > { %v4064_v0 = vpop.permute.xlu0 %4063  ;;  %v4444_v30 = vpop.f32.mrb[16].mxu0 }
 0x224   : > { %4117 = vst.msk [vmem:[#allocation2 + $0xb0] sm:$0xff] %vm4094_vm0, %v4064_v0  ;;  %v4445_v31 = vadd.f32 %v11350_v55, %v4444_v30  ;;  %v7863_v2 = vpop.f32.mrb[17].mxu0  ;;  %v5407_v0 = vrot.slane %v11801_v10, 7  ;;  %vm4267_vm0 = vcmask 290048  }
 0x225   : > { %v4214_v42 = vpop.permute.xlu1 %4213  ;;  %v4447_v51 = vpop.f32.mrb[18].mxu0 }
 0x226   : > { %4266 = vst.msk [vmem:[#allocation2 + $0xb8] sm:$0xff] %vm4242_vm1, %v4214_v42  ;;  %v4522_v17 = vmax.f32 %v4445_v31, 0.0  ;;  %v4448_v20 = vadd.f32 %v11350_v55, %v4447_v51  ;;  %v7864_v58 = vpop.f32.mrb[19].mxu0 }
 0x227   : > { %v4212_v43 = vpop.permute.xlu0 %4211 }
 0x228   : > { %4265 = vst.msk [vmem:[#allocation2 + $0xb0] sm:$0xff] %vm4242_vm1, %v4212_v43  ;;  %v4700_v23 = vcombine.high %v4522_v17, %v4522_v17  ;;  %v11901_v28 = vrot.slane %v4522_v17, %v8348_v5  ;;  %v4523_v42 = vmax.f32 %v4448_v20, 0.0  ;;  %v5408_v20 = vsel %vm8499_vm6, %v5406_v13, %v5407_v0 }
 0x229   : > { %v2580_v27 = vpop.permute.xlu1 %2579  ;;  %vm7090_vm1 = vcmask 1043456  }
 0x22a   : > { %v4714_v43 = vrot.slane %v4700_v23, %v8348_v5  ;;  %v11906_v55 = vcombine.high %v11901_v28, %v11901_v28  ;;  %v5410_v57 = vrot.slane %v11901_v28, 7  ;;  %v6033_v51 = vcombine.low %v11801_v10, %v11901_v28 }
 0x22b   : > { %v2062_v2 = vpop.permute.xlu0 %2061  ;;  %v4717_v58 = vcombine.high %v4523_v42, %v4523_v42  ;;  %v4724_v30 = vrot.slane %v4523_v42, %v8348_v5  ;;  %v5409_v23 = vrot.slane %v5407_v0, 2 }
 0x22c   : > { %2114 = vst.msk [vmem:[#allocation2 + $0xc0] sm:$0xf] %vm2113_vm5, %v2062_v2  ;;  %v4716_v39 = vcombine.high %v4714_v43, %v4714_v43  ;;  %v5412_v6 = vrot.slane %v5410_v57, 2  ;;  %v5413_v46 = vrot.slane %v11906_v55, 7  ;;  %v5416_v7 = vrot.slane %v4714_v43, 7 }
 0x22d   : > { %v3418_v17 = vpop.permute.xlu1 %3417  ;;  %2632 = vst.msk [vmem:[#allocation2 + $0xc0] sm:$0xf] %vm2631_vm10, %v2580_v27  ;;  %v4292_v31 = vld [vmem:[#allocation2 + $0xb8] sm:$0xff]  ;;  %v6049_v10 = vcombine.low %v11906_v55, %v4714_v43  ;;  %v4731_v2 = vrot.slane %v4717_v58, %v8348_v5  ;;  %v4732_v18 = vcombine.high %v4724_v30, %v4724_v30  ;;  %v5420_v12 = vrot.slane %v4724_v30, 7 }
 0x22e   : > { %v7746_v62 = vrot.slane %v4716_v39, 9  ;;  %v5100_v38 = vcombine.low %v4716_v39, %v4724_v30  ;;  %v11919_v0 = vrot.slane %v6033_v51, %v8348_v5  ;;  %v5414_v14 = vsel %vm8499_vm6, %v5412_v6, %v5413_v46 }
 0x22f   : > { %v2877_v42 = vpop.permute.xlu0 %2876  ;;  %v4291_v27 = vld [vmem:[#allocation2 + $0xb0] sm:$0xff]  ;;  %v11921_v36 = vcombine.high %v4731_v2, %v4731_v2  ;;  %v5422_v24 = vrot.slane %v5420_v12, 2  ;;  %v5423_v50 = vrot.slane %v4732_v18, 7  ;;  %v5426_v43 = vrot.slane %v4731_v2, 7 }
 0x230   : > { %2929 = vst.msk [vmem:[#allocation2 + $0xc0] sm:$0xf] %vm2928_vm11, %v2877_v42  ;;  %v4305_v13 = vpack.c.bf16 %v4292_v31, %v4291_v27  ;;  %13596 = vst [vmem:[#allocation56_spill] sm:$0xff] %v11919_v0  ;;  %v6050_v58 = vcombine.low %v4724_v30, %v4732_v18  ;;  %v11927_v39 = vcombine.low %v11831_v16, %v11919_v0  ;;  %vm6405_vm5 = vcmask 261312  }
 0x231   : > { %v3863_v21 = vpop.permute.xlu1 %3862  ;;  %3470 = vst.msk [vmem:[#allocation2 + $0xc0] sm:$0xf] %vm3469_vm12, %v3418_v17  ;;  %v5411_v31 = vsel %vm8499_vm6, %v5409_v23, %v5410_v57  ;;  %v11932_v51 = vrot.slane %v6049_v10, %v8348_v5  ;;  %v5428_v42 = vrot.slane %v5426_v43, 2  ;;  %v5415_v17 = vrot.slane %v5413_v46, 2 }
 0x232   : > { %7890 = vmatmul.mubr.msk.bf16.gmra.mrb[44].mxu0 %vm4334_vm2, %v4305_v13  ;;  %13597 = vst [vmem:[#allocation26_spill] sm:$0xff] %v11927_v39  ;;  %v5654_v25 = vcombine.low %v5408_v20, %v5411_v31  ;;  %6248 = vrot.lane.b32.xlu0 %v11927_v39, %s8243_s23  ;;  %v6064_v57 = vrot.slane %v6050_v58, %v8348_v5  ;;  %vm6539_vm10 = vcmask 326912   ;;  %vm6654_vm11 = vcmask 392512  }
 0x233   : > { %13598 = vst [vmem:[#allocation40_spill] sm:$0xff] %v11932_v51  ;;  %v3662_v27 = vpop.permute.xlu0 %3661  ;;  %7893 = vmatprep.mubr.msk.bf16.mxu0 %vm8247_vm9, %v13436_v3  ;;  %v5421_v30 = vsel %vm8499_vm6, %v7746_v62, %v5420_v12  ;;  %v5424_v20 = vsel %vm8499_vm6, %v5422_v24, %v5423_v50  ;;  %v5114_v23 = vrot.slane %v5100_v38, %v8348_v5  ;;  %v5425_v24 = vrot.slane %v5423_v50, 2 }
 0x234   : > { %3714 = vst.msk [vmem:[#allocation2 + $0xc0] sm:$0xf] %vm3713_vm13, %v3662_v27  ;;  %v11949_v46 = vrot.slane %v5654_v25, %v8348_v5  ;;  %v5417_v6 = vsel %vm8499_vm6, %v5415_v17, %v5416_v7  ;;  %v5671_v10 = vcombine.low %v5421_v30, %v5424_v20  ;;  %v5116_v13 = vcombine.low %v4732_v18, %v4731_v2 }
 0x235   : > { %3915 = vst.msk [vmem:[#allocation2 + $0xc0] sm:$0xf] %vm3914_vm14, %v3863_v21  ;;  %v11954_v58 = vcombine.low %v11932_v51, %v6064_v57  ;;  %v4216_v31 = vpop.permute.xlu1 %4215  ;;  %v5670_v62 = vcombine.low %v5414_v14, %v5417_v6  ;;  %v6066_v12 = vcombine.low %v4731_v2, %v11921_v36  ;;  %v5429_v18 = vrot.slane %v11921_v36, 7 }
 0x236   : > { %13599 = vst [vmem:[#allocation57_spill] sm:$0xff] %v11949_v46  ;;  %v11959_v38 = vcombine.low %v11852_v37, %v11949_v46  ;;  %v5685_v25 = vrot.slane %v5671_v10, %v8348_v5  ;;  %v11963_v27 = vrot.slane %v5116_v13, %v8348_v5  ;;  %v5427_v7 = vsel %vm8499_vm6, %v5425_v24, %v5426_v43 }
 0x237   : > { %13600 = vst [vmem:[#allocation58_spill] sm:$0xff] %v11954_v58  ;;  %v4068_v21 = vpop.permute.xlu0 %4067  ;;  %6250 = vrot.lane.b32.xlu1 %v11954_v58, %s8243_s23  ;;  %v11970_v14 = vrot.slane %v5670_v62, %v8348_v5  ;;  %v5430_v2 = vsel %vm8499_vm6, %v5428_v42, %v5429_v18  ;;  %v5099_v17 = vcombine.low %v11901_v28, %v11906_v55  ;;  %v5431_v0 = vrot.slane %v5429_v18, 2 }
 0x238   : > { %13601 = vst [vmem:[#allocation59_spill] sm:$0xff] %v11959_v38  ;;  %4120 = vst.msk [vmem:[#allocation2 + $0xc0] sm:$0xf] %vm4119_vm15, %v4068_v21  ;;  %5869 = vrot.lane.b32.xlu0 %v11959_v38, %s8238_s18  ;;  %v6315_v50 = vcombine.low %v5114_v23, %v11963_v27  ;;  %v5687_v20 = vcombine.low %v5427_v7, %v5430_v2  ;;  %v11986_v6 = vrot.slane %v6066_v12, %v8348_v5  ;;  %vm6754_vm12 = vcmask 458112  }
 0x239   : > { %13602 = vst [vmem:[#allocation60_spill] sm:$0xff] %v11970_v14  ;;  %4268 = vst.msk [vmem:[#allocation2 + $0xc0] sm:$0xf] %vm4267_vm0, %v4216_v31  ;;  %v11983_v30 = vcombine.low %v11970_v14, %v5685_v25  ;;  %v11989_v43 = vrot.slane %v5099_v17, %v8348_v5  ;;  %vm6873_vm13 = vcmask 523712   ;;  %vm6973_vm14 = vcmask 589312  }
 0x23a   : > { %v11996_v42 = vrot.slane %v5687_v20, %v8348_v5  ;;  %v6564_v62 = vcombine.low %v6064_v57, %v11986_v6  ;;  %v12018_v57 = vld [vmem:[%s13285_s2] ss:$0 sm:$0xff] }
 0x23b   : > { %13603 = vst [vmem:[#allocation61_spill] sm:$0xff] %v11983_v30  ;;  %13604 = vst [vmem:[#allocation62_spill] sm:$0xff] %v11989_v43  ;;  %5871 = vrot.lane.b32.xlu1 %v11983_v30, %s8238_s18  ;;  %v12002_v55 = vcombine.low %v11989_v43, %v5114_v23 }
 0x23c   : > { %6363 = vrot.lane.b32.xlu0 %v6315_v50, %s8241_s21  ;;  %v6449_v31 = vcombine.low %v5685_v25, %v11996_v42 }
 0x23d   : > { %13605 = vst [vmem:[#allocation63_spill] sm:$0xff] %v12002_v55  ;;  %5312 = vst.msk [vmem:[#allocation3 + $0x38] sm:$0xff] %vm5304_vm4, %v12002_v55 }
 0x240   : > { %v4293_v12 = vld [vmem:[#allocation2 + $0xc0] sm:$0xf]  ;;  %6612 = vrot.lane.b32.xlu0 %v6564_v62, %s8248_s19 }
 0x241   : > { %v4306_v24 = vpack.c.bf16 %v4293_v12, %v4293_v12 }
 0x243   : > { %7894 = vmatmul.mubr.msk.bf16.gmra.mrb[48].mxu0 %vm4334_vm2, %v4306_v24  ;;  %v4452_v23 = vpop.f32.mrb[20].mxu0  ;;  %vm5911_vm2 = vcmask 130112  }
 0x244   : > { %7907 = vmatprep.mubr.msk.bf16.mxu0 %vm8247_vm9, %v13436_v3  ;;  %6497 = vrot.lane.b32.xlu0 %v6449_v31, %s8245_s8  ;;  %v4453_v21 = vadd.f32 %v12018_v57, %v4452_v23  ;;  %v7867_v25 = vpop.f32.mrb[21].mxu0 }
 0x245   : > { %v4455_v7 = vpop.f32.mrb[22].mxu0 }
 0x246   : > { %v4524_v50 = vmax.f32 %v4453_v21, 0.0  ;;  %v4456_v2 = vadd.f32 %v12018_v57, %v4455_v7  ;;  %v7868_v17 = vpop.f32.mrb[23].mxu0 }
 0x248   : > { %v4734_v20 = vcombine.high %v4524_v50, %v4524_v50  ;;  %v4741_v62 = vrot.slane %v4524_v50, %v8348_v5  ;;  %v4525_v12 = vmax.f32 %v4456_v2, 0.0 }
 0x24a   : > { %v4748_v31 = vrot.slane %v4734_v20, %v8348_v5  ;;  %v4749_v24 = vcombine.high %v4741_v62, %v4741_v62  ;;  %v5117_v28 = vcombine.low %v11921_v36, %v4741_v62  ;;  %v5432_v10 = vrot.slane %v4741_v62, 7 }
 0x24b   : > { %v4751_v13 = vcombine.high %v4525_v12, %v4525_v12  ;;  %v4758_v51 = vrot.slane %v4525_v12, %v8348_v5 }
 0x24c   : > { %v4750_v23 = vcombine.high %v4748_v31, %v4748_v31  ;;  %v5434_v25 = vrot.slane %v5432_v10, 2  ;;  %v6067_v21 = vcombine.low %v4741_v62, %v4749_v24  ;;  %v5435_v2 = vrot.slane %v4749_v24, 7 }
 0x24d   : > { %v12027_v7 = vrot.slane %v4751_v13, %v8348_v5  ;;  %v4766_v17 = vcombine.high %v4758_v51, %v4758_v51  ;;  %v5442_v14 = vrot.slane %v4758_v51, 7  ;;  %v7747_v43 = vrot.slane %v4748_v31, 9 }
 0x24e   : > { %v5133_v50 = vcombine.low %v4748_v31, %v4750_v23  ;;  %v5439_v46 = vrot.slane %v4750_v23, 7  ;;  %v6083_v20 = vcombine.low %v4750_v23, %v4758_v51  ;;  %v5131_v58 = vrot.slane %v5117_v28, %v8348_v5 }
 0x24f   : > { %v5134_v45 = vcombine.low %v4758_v51, %v4766_v17  ;;  %v5445_v36 = vrot.slane %v4766_v17, 7  ;;  %v6081_v18 = vrot.slane %v6067_v21, %v8348_v5  ;;  %v5444_v13 = vrot.slane %v5442_v14, 2 }
 0x250   : > { %v5441_v30 = vrot.slane %v5439_v46, 2  ;;  %v5141_v12 = vrot.slane %v5133_v50, %v8348_v5  ;;  %v6091_v62 = vrot.slane %v6083_v20, %v8348_v5  ;;  %v6084_v55 = vcombine.low %v4766_v17, %v12027_v7 }
 0x251   : > { %v5148_v39 = vrot.slane %v5134_v45, %v8348_v5  ;;  %v5433_v24 = vsel %vm8499_vm6, %v5431_v0, %v5432_v10  ;;  %v5436_v28 = vsel %vm8499_vm6, %v5434_v25, %v5435_v2  ;;  %v5440_v23 = vsel %vm8499_vm6, %v7747_v43, %v5439_v46 }
 0x252   : > { %v6316_v31 = vcombine.low %v5131_v58, %v5141_v12  ;;  %v6565_v51 = vcombine.low %v6081_v18, %v6091_v62  ;;  %v12042_v21 = vrot.slane %v6084_v55, %v8348_v5  ;;  %v5443_v45 = vsel %vm8499_vm6, %v5441_v30, %v5442_v14 }
 0x253   : > { %v5149_v50 = vcombine.low %v5141_v12, %v5148_v39  ;;  %v5688_v20 = vcombine.low %v5433_v24, %v5436_v28  ;;  %v5448_v17 = vrot.slane %v12027_v7, 7  ;;  %v5704_v0 = vcombine.low %v5440_v23, %v5443_v45 }
 0x254   : > { %6365 = vrot.lane.b32.xlu1 %v6316_v31, %s8241_s21  ;;  %v5447_v10 = vrot.slane %v5445_v36, 2  ;;  %v12050_v25 = vcombine.low %v6091_v62, %v12042_v21  ;;  %v12054_v43 = vcombine.low %v11986_v6, %v6081_v18  ;;  %v5446_v30 = vsel %vm8499_vm6, %v5444_v13, %v5445_v36 }
 0x255   : > { %6712 = vrot.lane.b32.xlu0 %v5149_v50, %s8249_s29  ;;  %v5702_v46 = vrot.slane %v5688_v20, %v8348_v5  ;;  %5314 = vst.msk [vmem:[#allocation3 + $0x48] sm:$0xff] %vm5304_vm4, %v5149_v50  ;;  %v5712_v14 = vrot.slane %v5704_v0, %v8348_v5  ;;  %v12072_v18 = vcombine.low %v11963_v27, %v5131_v58  ;;  %v5450_v20 = vrot.slane %v5448_v17, 2 }
 0x256   : > { %13606 = vst [vmem:[#allocation64_spill] sm:$0xff] %v12054_v43  ;;  %v5449_v55 = vsel %vm8499_vm6, %v5447_v10, %v5448_v17  ;;  %v4767_v13 = vcombine.high %v12027_v7, %v12027_v7 }
 0x257   : > { %v5705_v2 = vcombine.low %v5446_v30, %v5449_v55  ;;  %v12063_v12 = vcombine.low %v11996_v42, %v5702_v46  ;;  %v6450_v62 = vcombine.low %v5702_v46, %v5712_v14  ;;  %13608 = vst [vmem:[#allocation66_spill] sm:$0xff] %v12072_v18  ;;  %5313 = vst.msk [vmem:[#allocation3 + $0x40] sm:$0xff] %vm5304_vm4, %v12072_v18 }
 0x258   : > { %6614 = vrot.lane.b32.xlu1 %v6565_v51, %s8248_s19  ;;  %v5150_v42 = vcombine.low %v12027_v7, %v4767_v13  ;;  %v5451_v51 = vrot.slane %v4767_v13, 7 }
 0x259   : > { %13607 = vst [vmem:[#allocation65_spill] sm:$0xff] %v12063_v12  ;;  %6931 = vrot.lane.b32.xlu0 %v12050_v25, %s8250_s15  ;;  %v12069_v6 = vrot.slane %v5705_v2, %v8348_v5 }
 0x25a   : > { %v5158_v27 = vrot.slane %v5150_v42, %v8348_v5  ;;  %v5452_v17 = vsel %vm8499_vm6, %v5450_v20, %v5451_v51 }
 0x25b   : > { %v5720_v36 = vcombine.low %v5712_v14, %v12069_v6  ;;  %v5453_v14 = vrot.slane %v5451_v51, 2 }
 0x25c   : > { %6499 = vrot.lane.b32.xlu1 %v6450_v62, %s8245_s8  ;;  %v6317_v45 = vcombine.low %v5148_v39, %v5158_v27 }
 0x25d   : > { %6831 = vrot.lane.b32.xlu0 %v5720_v36, %s8251_s16 }
 0x260   : > { %5875 = vrot.lane.b32.xlu1 %v5720_v36, %s8238_s18 }
 0x261   : > { %5873 = vrot.lane.b32.xlu0 %v12063_v12, %s8238_s18  ;;  %v8143_v12 = vld [vmem:[%s13286_s3 + $0x8] sm:$0xff]  }
 0x265   : > { %v4460_v58 = vpop.f32.mrb[24].mxu0  ;;  %6252 = vrot.lane.b32.xlu0 %v12054_v43, %s8243_s23 }
 0x266   : > { %v4461_v24 = vadd.f32 %v12018_v57, %v4460_v58  ;;  %v7871_v31 = vpop.f32.mrb[25].mxu0 }
 0x267   : > { %v4463_v28 = vpop.f32.mrb[26].mxu0 }
 0x268   : > { %v4526_v23 = vmax.f32 %v4461_v24, 0.0  ;;  %v4464_v50 = vadd.f32 %v12018_v57, %v4463_v28  ;;  %v7872_v7 = vpop.f32.mrb[27].mxu0 }
 0x269   : > { %6367 = vrot.lane.b32.xlu0 %v6317_v45, %s8241_s21 }
 0x26a   : > { %v4768_v0 = vcombine.high %v4526_v23, %v4526_v23  ;;  %v4775_v10 = vrot.slane %v4526_v23, %v8348_v5  ;;  %v4527_v46 = vmax.f32 %v4464_v50, 0.0 }
 0x26c   : > { %v4782_v30 = vrot.slane %v4768_v0, %v8348_v5  ;;  %v4783_v55 = vcombine.high %v4775_v10, %v4775_v10  ;;  %v5454_v2 = vrot.slane %v4775_v10, 7  ;;  %v6100_v62 = vcombine.low %v4767_v13, %v4775_v10  ;;  %v8142_v10 = vld [vmem:[%s13286_s3] sm:$0xff]  }
 0x26d   : > { %v4785_v36 = vcombine.high %v4527_v46, %v4527_v46  ;;  %v4792_v42 = vrot.slane %v4527_v46, %v8348_v5  ;;  %7986 = vmatpush3.bf16.msra.mxu1 %v8142_v10  ;;  %7898 = vmatpush3.bf16.msra.mxu0 %v8142_v10 }
 0x26e   : > { %v4784_v58 = vcombine.high %v4782_v30, %v4782_v30  ;;  %v5151_v24 = vcombine.low %v4783_v55, %v4782_v30  ;;  %v5455_v39 = vsel %vm8499_vm6, %v5453_v14, %v5454_v2  ;;  %v5458_v31 = vrot.slane %v4782_v30, 7  ;;  %7982 = vmatprep.subr.bf16.mxu1 %v13436_v3  ;;  %7899 = vmatprep.subr.bf16.mxu0 %v13436_v3 }
 0x26f   : > { %v12099_v28 = vrot.slane %v4785_v36, %v8348_v5  ;;  %v4800_v23 = vcombine.high %v4792_v42, %v4792_v42  ;;  %v5464_v50 = vrot.slane %v4792_v42, 7  ;;  %v5721_v45 = vcombine.low %v5452_v17, %v5455_v39 }
 0x270   : > { %v5167_v7 = vcombine.low %v4784_v58, %v4792_v42  ;;  %v12102_v13 = vrot.slane %v5151_v24, %v8348_v5  ;;  %v6101_v0 = vcombine.low %v4782_v30, %v4784_v58  ;;  %v7748_v46 = vrot.slane %v4783_v55, 9 }
 0x271   : > { %v5460_v14 = vrot.slane %v5458_v31, 2  ;;  %v12109_v51 = vcombine.high %v12099_v28, %v12099_v28  ;;  %v5466_v20 = vrot.slane %v5464_v50, 2  ;;  %v5467_v2 = vrot.slane %v4800_v23, 7  ;;  %7987 = vmatpush3.bf16.msra.mxu1 %v8143_v12  ;;  %7900 = vmatpush3.bf16.msra.mxu0 %v8143_v12  ;;  %v8146_v12 = vld [vmem:[%s13286_s3 + $0x20] ss:$0 sps:$4 sm:$0xff]  }
 0x272   : > { %v5470_v36 = vrot.slane %v12099_v28, 7  ;;  %v5166_v43 = vcombine.low %v5158_v27, %v12102_v13  ;;  %v5729_v24 = vrot.slane %v5721_v45, %v8348_v5  ;;  %v6117_v39 = vcombine.low %v4792_v42, %v4800_v23  ;;  %7983 = vmatprep.subr.bf16.mxu1 %v13436_v3  ;;  %7901 = vmatprep.subr.bf16.mxu0 %v13436_v3 }
 0x273   : > { %v5473_v30 = vrot.slane %v12109_v51, 7  ;;  %v6108_v55 = vrot.slane %v6100_v62, %v8348_v5  ;;  %v12117_v17 = vrot.slane %v6101_v0, %v8348_v5  ;;  %v5461_v10 = vrot.slane %v4784_v58, 7 }
 0x274   : > { %v5472_v27 = vrot.slane %v5470_v36, 2  ;;  %6714 = vrot.lane.b32.xlu1 %v5166_v43, %s8249_s29  ;;  %v6451_v45 = vcombine.low %v12069_v6, %v5729_v24  ;;  %v5168_v42 = vcombine.low %v4800_v23, %v12099_v28  ;;  %5315 = vst.msk [vmem:[#allocation3 + $0x50] sm:$0xff] %vm5304_vm4, %v5166_v43  ;;  %v5459_v18 = vsel %vm8499_vm6, %v7748_v46, %v5458_v31 }
 0x275   : > { %v12129_v62 = vcombine.low %v6108_v55, %v12117_v17  ;;  %v6566_v0 = vcombine.low %v12042_v21, %v6108_v55  ;;  %v5175_v38 = vrot.slane %v5167_v7, %v8348_v5  ;;  %v5462_v6 = vsel %vm8499_vm6, %v5460_v14, %v5461_v10  ;;  %v8144_v21 = vld [vmem:[%s13286_s3 + $0x10] sm:$0xff]  }
 0x276   : > { %6501 = vrot.lane.b32.xlu0 %v6451_v45, %s8245_s8  ;;  %v12139_v58 = vrot.slane %v5168_v42, %v8348_v5  ;;  %v5463_v23 = vrot.slane %v5461_v10, 2  ;;  %v5469_v43 = vrot.slane %v5467_v2, 2  ;;  %v5722_v55 = vcombine.low %v5459_v18, %v5462_v6  ;;  %7988 = vmatpush3.bf16.msra.mxu1 %v8144_v21 }
 0x277   : > { %v5468_v31 = vsel %vm8499_vm6, %v5466_v20, %v5467_v2  ;;  %v5474_v7 = vsel %vm8499_vm6, %v5472_v27, %v5473_v30  ;;  %v6318_v46 = vcombine.low %v12102_v13, %v5175_v38  ;;  %v6125_v20 = vrot.slane %v6117_v39, %v8348_v5  ;;  %7984 = vmatprep.subr.bf16.mxu1 %v13436_v3 }
 0x278   : > { %6933 = vrot.lane.b32.xlu1 %v12129_v62, %s8250_s15  ;;  %v5183_v14 = vcombine.low %v5175_v38, %v12139_v58  ;;  %v5465_v45 = vsel %vm8499_vm6, %v5463_v23, %v5464_v50  ;;  %v5471_v18 = vsel %vm8499_vm6, %v5469_v43, %v5470_v36  ;;  %v5736_v2 = vrot.slane %v5722_v55, %v8348_v5  ;;  %v8145_v38 = vld [vmem:[%s13286_s3 + $0x18] sm:$0xff]  }
 0x279   : > { %v5738_v30 = vcombine.low %v5465_v45, %v5468_v31  ;;  %v5739_v27 = vcombine.low %v5471_v18, %v5474_v7  ;;  %v6567_v13 = vcombine.low %v12117_v17, %v6125_v20  ;;  %v6118_v17 = vcombine.low %v12099_v28, %v12109_v51  ;;  %7902 = vmatpush3.bf16.msra.mxu0 %v8144_v21 }
 0x27a   : > { %6616 = vrot.lane.b32.xlu0 %v6566_v0, %s8248_s19  ;;  %5316 = vst.msk [vmem:[#allocation3 + $0x58] sm:$0xff] %vm5304_vm4, %v5183_v14  ;;  %v5737_v50 = vcombine.low %v5729_v24, %v5736_v2  ;;  %7989 = vmatpush3.bf16.msra.mxu1 %v8145_v38  ;;  %v7092_v42 = vsel %vm7090_vm1, %v8146_v12, 0 }
 0x27b   : > { %v5746_v36 = vrot.slane %v5738_v30, %v8348_v5  ;;  %v12167_v39 = vrot.slane %v5739_v27, %v8348_v5  ;;  %7985 = vmatprep.subr.bf16.mxu1 %v13436_v3  ;;  %7903 = vmatprep.subr.bf16.mxu0 %v13436_v3  ;;  %v12184_v28 = vrot.slane %v6118_v17, %v8348_v5 }
 0x27c   : > { %6833 = vrot.lane.b32.xlu1 %v5737_v50, %s8251_s16 }
 0x27d   : > { %v12178_v24 = vcombine.low %v5746_v36, %v12167_v39  ;;  %v6452_v10 = vcombine.low %v5736_v2, %v5746_v36  ;;  %7904 = vmatpush3.bf16.msra.mxu0 %v8145_v38  ;;  %v12193_v51 = vcombine.low %v6125_v20, %v12184_v28 }
 0x27e   : > { %6716 = vrot.lane.b32.xlu0 %v5183_v14, %s8249_s29  ;;  %7990 = vmatpush3.bf16.msra.mxu1 %v7092_v42 }
 0x27f   : > { %7943 = vmatprep.subr.bf16.mxu1 %v13436_v3  ;;  %7905 = vmatprep.subr.bf16.mxu0 %v13436_v3 }
 0x280   : > { %6254 = vrot.lane.b32.xlu1 %v12050_v25, %s8243_s23 }
 0x281   : > { %7906 = vmatpush3.bf16.msra.mxu0 %v7092_v42 }
 0x282   : > { %6835 = vrot.lane.b32.xlu0 %v12178_v24, %s8251_s16 }
 0x284   : > { %6369 = vrot.lane.b32.xlu1 %v6318_v46, %s8241_s21 }
 0x285   : > { %v4468_v0 = vpop.f32.mrb[28].mxu0 }
 0x286   : > { %6935 = vrot.lane.b32.xlu0 %v12193_v51, %s8250_s15  ;;  %v4469_v25 = vadd.f32 %v12018_v57, %v4468_v0  ;;  %v7875_v6 = vpop.f32.mrb[29].mxu0 }
 0x287   : > { %v4471_v23 = vpop.f32.mrb[30].mxu0 }
 0x288   : > { %6503 = vrot.lane.b32.xlu1 %v6452_v10, %s8245_s8  ;;  %v4528_v43 = vmax.f32 %v4469_v25, 0.0  ;;  %v4472_v21 = vadd.f32 %v12018_v57, %v4471_v23  ;;  %v7876_v55 = vpop.f32.mrb[31].mxu0 }
 0x28a   : > { %5877 = vrot.lane.b32.xlu0 %v5737_v50, %s8238_s18  ;;  %v4802_v31 = vcombine.high %v4528_v43, %v4528_v43  ;;  %v4809_v7 = vrot.slane %v4528_v43, %v8348_v5  ;;  %v4529_v46 = vmax.f32 %v4472_v21, 0.0 }
 0x28c   : > { %6618 = vrot.lane.b32.xlu1 %v6567_v13, %s8248_s19  ;;  %v4816_v14 = vrot.slane %v4802_v31, %v8348_v5  ;;  %v4817_v45 = vcombine.high %v4809_v7, %v4809_v7  ;;  %v4819_v18 = vcombine.high %v4529_v46, %v4529_v46  ;;  %v7749_v20 = vrot.slane %v4809_v7, 9 }
 0x28d   : > { %v4826_v2 = vrot.slane %v4529_v46, %v8348_v5 }
 0x28e   : > { %6256 = vrot.lane.b32.xlu0 %v12129_v62, %s8243_s23  ;;  %v4818_v30 = vcombine.high %v4816_v14, %v4816_v14  ;;  %v5184_v27 = vcombine.low %v4809_v7, %v4817_v45  ;;  %v5477_v38 = vrot.slane %v4817_v45, 7  ;;  %v5480_v50 = vrot.slane %v4816_v14, 7 }
 0x28f   : > { %v4833_v36 = vrot.slane %v4819_v18, %v8348_v5  ;;  %v4834_v12 = vcombine.high %v4826_v2, %v4826_v2  ;;  %v5486_v17 = vrot.slane %v4826_v2, 7  ;;  %v6134_v10 = vcombine.low %v4817_v45, %v4816_v14 }
 0x290   : > { %v5479_v13 = vrot.slane %v5477_v38, 2  ;;  %v6135_v42 = vcombine.low %v4818_v30, %v4826_v2  ;;  %v5478_v0 = vsel %vm8499_vm6, %v7749_v20, %v5477_v38  ;;  %v5482_v25 = vrot.slane %v5480_v50, 2 }
 0x291   : > { %v5201_v6 = vcombine.low %v4826_v2, %v4834_v12  ;;  %v5488_v62 = vrot.slane %v5486_v17, 2  ;;  %v5489_v23 = vrot.slane %v4834_v12, 7  ;;  %v5192_v43 = vrot.slane %v5184_v27, %v8348_v5 }
 0x292   : > { %v5185_v21 = vcombine.low %v4816_v14, %v4818_v30  ;;  %v6151_v55 = vcombine.low %v4834_v12, %v4833_v36  ;;  %v5481_v31 = vsel %vm8499_vm6, %v5479_v13, %v5480_v50  ;;  %v5483_v7 = vrot.slane %v4818_v30, 7 }
 0x293   : > { %v6142_v46 = vrot.slane %v6134_v10, %v8348_v5  ;;  %v6319_v45 = vcombine.low %v12139_v58, %v5192_v43  ;;  %v5755_v20 = vcombine.low %v5478_v0, %v5481_v31  ;;  %v12220_v2 = vrot.slane %v6135_v42, %v8348_v5 }
 0x294   : > { %v12217_v18 = vrot.slane %v5185_v21, %v8348_v5  ;;  %v5492_v38 = vrot.slane %v4833_v36, 7  ;;  %v5485_v16 = vrot.slane %v5483_v7, 2  ;;  %v12224_v27 = vrot.slane %v5201_v6, %v8348_v5 }
 0x295   : > { %v6568_v14 = vcombine.low %v12184_v28, %v6142_v46  ;;  %6371 = vrot.lane.b32.xlu0 %v6319_v45, %s8241_s21  ;;  %v5763_v58 = vrot.slane %v5755_v20, %v8348_v5  ;;  %v5484_v50 = vsel %vm8499_vm6, %v5482_v25, %v5483_v7  ;;  %v12232_v12 = vcombine.low %v6142_v46, %v12220_v2 }
 0x296   : > { %v5200_v30 = vcombine.low %v5192_v43, %v12217_v18  ;;  %v5487_v10 = vsel %vm8499_vm6, %v5485_v16, %v5486_v17  ;;  %v6320_v28 = vcombine.low %v12217_v18, %v12224_v27  ;;  %v5491_v13 = vrot.slane %v5489_v23, 2 }
 0x297   : > { %v12239_v42 = vrot.slane %v6151_v55, %v8348_v5  ;;  %v6453_v0 = vcombine.low %v12167_v39, %v5763_v58  ;;  %v5756_v6 = vcombine.low %v5484_v50, %v5487_v10  ;;  %v5490_v25 = vsel %vm8499_vm6, %v5488_v62, %v5489_v23 }
 0x298   : > { %6718 = vrot.lane.b32.xlu1 %v5200_v30, %s8249_s29  ;;  %5317 = vst.msk [vmem:[#allocation3 + $0x60] sm:$0xff] %vm5304_vm4, %v5200_v30  ;;  %v5493_v16 = vsel %vm8499_vm6, %v5491_v13, %v5492_v38 }
 0x299   : > { %6505 = vrot.lane.b32.xlu0 %v6453_v0, %s8245_s8  ;;  %v12252_v43 = vrot.slane %v5756_v6, %v8348_v5  ;;  %v5772_v21 = vcombine.low %v5490_v25, %v5493_v16 }
 0x29b   : > { %v12255_v39 = vcombine.low %v5763_v58, %v12252_v43  ;;  %v12258_v55 = vrot.slane %v5772_v21, %v8348_v5 }
 0x29d   : > { %6837 = vrot.lane.b32.xlu1 %v12255_v39, %s8251_s16  ;;  %6620 = vrot.lane.b32.xlu0 %v6568_v14, %s8248_s19  ;;  %v6454_v62 = vcombine.low %v12252_v43, %v12258_v55  ;;  %v4835_v14 = vcombine.high %v4833_v36, %v4833_v36 }
 0x2a1   : > { %6937 = vrot.lane.b32.xlu1 %v12232_v12, %s8250_s15 }
 0x2a4   : > { %v6249_v31 = vpop.permute.xlu0 %6248 }
 0x2a5   : > { %v4476_v23 = vpop.f32.mrb[32].mxu0  ;;  %5879 = vrot.lane.b32.xlu1 %v12178_v24, %s8238_s18  ;;  %v7750_v24 = vrot.slane %v4835_v14, 9 }
 0x2a6   : > { %v4477_v7 = vadd.f32 %v12018_v57, %v4476_v23  ;;  %v7879_v46 = vpop.f32.mrb[33].mxu0 }
 0x2a7   : > { %v4479_v45 = vpop.f32.mrb[34].mxu0 }
 0x2a8   : > { %v4530_v18 = vmax.f32 %v4477_v7, 0.0  ;;  %v4480_v20 = vadd.f32 %v12018_v57, %v4479_v45  ;;  %v7880_v38 = vpop.f32.mrb[35].mxu0 }
 0x2a9   : > { %v6251_v10 = vpop.permute.xlu1 %6250  ;;  %6258 = vrot.lane.b32.xlu1 %v12193_v51, %s8243_s23 }
 0x2aa   : > { %v4836_v30 = vcombine.high %v4530_v18, %v4530_v18  ;;  %v4843_v58 = vrot.slane %v4530_v18, %v8348_v5  ;;  %v4531_v50 = vmax.f32 %v4480_v20, 0.0  ;;  %v5870_v13 = vpop.permute.xlu0 %5869 }
 0x2ab   : > { %5918 = vst.msk [vmem:[#allocation3 + $0x30] sm:$0xff] %vm5911_vm2, %v5870_v13 }
 0x2ac   : > { %v4850_v0 = vrot.slane %v4836_v30, %v8348_v5  ;;  %v4851_v6 = vcombine.high %v4843_v58, %v4843_v58  ;;  %v5202_v25 = vcombine.low %v4835_v14, %v4843_v58  ;;  %v5496_v16 = vrot.slane %v4843_v58, 7  ;;  %6297 = vst.msk [vmem:[#allocation3 + $0x30] sm:$0xff] %vm6290_vm3, %v6249_v31 }
 0x2ad   : > { %v4853_v36 = vcombine.high %v4531_v50, %v4531_v50  ;;  %v4860_v43 = vrot.slane %v4531_v50, %v8348_v5  ;;  %v5872_v45 = vpop.permute.xlu1 %5871  ;;  %6373 = vrot.lane.b32.xlu1 %v6320_v28, %s8241_s21 }
 0x2ae   : > { %v4852_v21 = vcombine.high %v4850_v0, %v4850_v0  ;;  %v5498_v23 = vrot.slane %v5496_v16, 2  ;;  %v5499_v7 = vrot.slane %v4851_v6, 7  ;;  %v5502_v46 = vrot.slane %v4850_v0, 7  ;;  %5919 = vst.msk [vmem:[#allocation3 + $0x38] sm:$0xff] %vm5911_vm2, %v5872_v45  ;;  %v6364_v51 = vpop.permute.xlu0 %6363 }
 0x2af   : > { %v12279_v18 = vrot.slane %v4853_v36, %v8348_v5  ;;  %v4868_v20 = vcombine.high %v4860_v43, %v4860_v43  ;;  %v6152_v38 = vcombine.low %v4843_v58, %v4851_v6  ;;  %6412 = vst.msk [vmem:[#allocation3 + $0x30] sm:$0xff] %vm6405_vm5, %v6364_v51  ;;  %v12286_v31 = vrot.slane %v5202_v25, %v8348_v5 }
 0x2b0   : > { %v5219_v14 = vcombine.low %v4852_v21, %v4860_v43  ;;  %6298 = vst.msk [vmem:[#allocation3 + $0x38] sm:$0xff] %vm6290_vm3, %v6251_v10  ;;  %v5497_v30 = vsel %vm8499_vm6, %v7750_v24, %v5496_v16  ;;  %v5508_v13 = vrot.slane %v4860_v43, 7  ;;  %v5504_v58 = vrot.slane %v5502_v46, 2 }
 0x2b1   : > { %v12292_v50 = vcombine.high %v12279_v18, %v12279_v18  ;;  %v5217_v28 = vcombine.low %v12224_v27, %v12286_v31  ;;  %v5500_v10 = vsel %vm8499_vm6, %v5498_v23, %v5499_v7  ;;  %v5218_v36 = vcombine.low %v4851_v6, %v4850_v0  ;;  %6507 = vrot.lane.b32.xlu1 %v6454_v62, %s8245_s8 }
 0x2b2   : > { %v6169_v45 = vcombine.low %v4860_v43, %v4868_v20  ;;  %v6613_v16 = vpop.permute.xlu0 %6612  ;;  %v5773_v24 = vcombine.low %v5497_v30, %v5500_v10  ;;  %v12301_v51 = vrot.slane %v5219_v14, %v8348_v5  ;;  %v12308_v23 = vrot.slane %v6152_v38, %v8348_v5 }
 0x2b3   : > { %v5235_v25 = vcombine.low %v12279_v18, %v12292_v50  ;;  %6720 = vrot.lane.b32.xlu0 %v5217_v28, %s8249_s29  ;;  %5318 = vst.msk [vmem:[#allocation3 + $0x68] sm:$0xff] %vm5304_vm4, %v5217_v28  ;;  %v5226_v27 = vrot.slane %v5218_v36, %v8348_v5  ;;  %v5501_v6 = vrot.slane %v5499_v7, 2  ;;  %v5505_v17 = vrot.slane %v4852_v21, 7 }
 0x2b4   : > { %v5510_v37 = vrot.slane %v5508_v13, 2  ;;  %v5511_v43 = vrot.slane %v4868_v20, 7  ;;  %v12311_v30 = vrot.slane %v5773_v24, %v8348_v5  ;;  %v6168_v14 = vcombine.low %v4850_v0, %v4852_v21 }
 0x2b5   : > { %v5234_v10 = vcombine.low %v5226_v27, %v12301_v51  ;;  %v6167_v62 = vcombine.low %v12239_v42, %v12308_v23  ;;  %v5503_v28 = vsel %vm8499_vm6, %v5501_v6, %v5502_v46  ;;  %v5506_v38 = vsel %vm8499_vm6, %v5504_v58, %v5505_v17 }
 0x2b6   : > { %v6498_v36 = vpop.permute.xlu0 %6497  ;;  %v5788_v7 = vcombine.low %v12258_v55, %v12311_v30  ;;  %v5507_v20 = vrot.slane %v5505_v17, 2  ;;  %v5789_v52 = vcombine.low %v5503_v28, %v5506_v38  ;;  %v12323_v24 = vrot.slane %v6168_v14, %v8348_v5 }
 0x2b7   : > { %v13609_v0 = vcombine.low %v12220_v2, %v12239_v42  ;;  %6546 = vst.msk [vmem:[#allocation3 + $0x30] sm:$0xff] %vm6539_vm10, %v6498_v36  ;;  %v12332_v21 = vrot.slane %v6169_v45, %v8348_v5  ;;  %v6321_v46 = vcombine.low %v12286_v31, %v5226_v27  ;;  %v12336_v17 = vrot.slane %v5235_v25, %v8348_v5 }
 0x2b8   : > { %5319 = vst.msk [vmem:[#allocation3 + $0x70] sm:$0xff] %vm5304_vm4, %v5234_v10  ;;  %6839 = vrot.lane.b32.xlu0 %v5788_v7, %s8251_s16  ;;  %v5509_v55 = vsel %vm8499_vm6, %v5507_v20, %v5508_v13  ;;  %v5512_v2 = vsel %vm8499_vm6, %v5510_v37, %v5511_v43  ;;  %v5797_v42 = vrot.slane %v5789_v52, %v8348_v5  ;;  %v5515_v27 = vrot.slane %v12292_v50, 7 }
 0x2b9   : > { %6622 = vrot.lane.b32.xlu1 %v13609_v0, %s8248_s19  ;;  %6661 = vst.msk [vmem:[#allocation3 + $0x30] sm:$0xff] %vm6654_vm11, %v6613_v16  ;;  %v5790_v58 = vcombine.low %v5509_v55, %v5512_v2  ;;  %v12347_v45 = vcombine.low %v12323_v24, %v12332_v21  ;;  %v6322_v31 = vcombine.low %v12301_v51, %v12336_v17  ;;  %v7751_v36 = vrot.slane %v12279_v18, 9 }
 0x2ba   : > { %v6455_v25 = vcombine.low %v12311_v30, %v5797_v42  ;;  %v5517_v20 = vrot.slane %v5515_v27, 2  ;;  %v6570_v18 = vcombine.low %v12308_v23, %v12323_v24 }
 0x2bb   : > { %v12354_v13 = vrot.slane %v5790_v58, %v8348_v5 }
 0x2bc   : > { %6939 = vrot.lane.b32.xlu0 %v6167_v62, %s8250_s15 }
 0x2bd   : > { %6722 = vrot.lane.b32.xlu1 %v5234_v10, %s8249_s29  ;;  %v12358_v52 = vcombine.low %v5797_v42, %v12354_v13 }
 0x2c0   : > { %5881 = vrot.lane.b32.xlu0 %v12255_v39, %s8238_s18 }
 0x2c1   : > { %6841 = vrot.lane.b32.xlu1 %v12358_v52, %s8251_s16 }
 0x2c4   : > { %6260 = vrot.lane.b32.xlu0 %v12232_v12, %s8243_s23 }
 0x2c5   : > { %6941 = vrot.lane.b32.xlu1 %v12347_v45, %s8250_s15  ;;  %v4484_v37 = vpop.f32.mrb[36].mxu0 }
 0x2c6   : > { %v4485_v16 = vadd.f32 %v12018_v57, %v4484_v37  ;;  %v7883_v51 = vpop.f32.mrb[37].mxu0  ;;  %v6366_v39 = vpop.permute.xlu1 %6365 }
 0x2c7   : > { %v4487_v6 = vpop.f32.mrb[38].mxu0  ;;  %6413 = vst.msk [vmem:[#allocation3 + $0x38] sm:$0xff] %vm6405_vm5, %v6366_v39  ;;  %v6713_v12 = vpop.permute.xlu0 %6712 }
 0x2c8   : > { %v4532_v43 = vmax.f32 %v4485_v16, 0.0  ;;  %v4488_v30 = vadd.f32 %v12018_v57, %v4487_v6  ;;  %v7884_v14 = vpop.f32.mrb[39].mxu0  ;;  %6375 = vrot.lane.b32.xlu0 %v6321_v46, %s8241_s21  ;;  %6761 = vst.msk [vmem:[#allocation3 + $0x30] sm:$0xff] %vm6754_vm12, %v6713_v12  ;;  %v5516_v16 = vsel %vm8499_vm6, %v7751_v36, %v5515_v27 }
 0x2c9   : > { %5883 = vrot.lane.b32.xlu1 %v5788_v7, %s8238_s18 }
 0x2ca   : > { %v4870_v10 = vcombine.high %v4532_v43, %v4532_v43  ;;  %v4877_v28 = vrot.slane %v4532_v43, %v8348_v5  ;;  %v4533_v38 = vmax.f32 %v4488_v30, 0.0  ;;  %v6615_v2 = vpop.permute.xlu1 %6614 }
 0x2cb   : > { %v6932_v37 = vpop.permute.xlu0 %6931 }
 0x2cc   : > { %v4884_v7 = vrot.slane %v4870_v10, %v8348_v5  ;;  %v4885_v0 = vcombine.high %v4877_v28, %v4877_v28  ;;  %v5518_v55 = vrot.slane %v4877_v28, 7  ;;  %v6185_v46 = vcombine.low %v12292_v50, %v4877_v28  ;;  %6509 = vrot.lane.b32.xlu0 %v6455_v25, %s8245_s8 }
 0x2cd   : > { %6262 = vrot.lane.b32.xlu1 %v6167_v62, %s8243_s23  ;;  %v4887_v42 = vcombine.high %v4533_v38, %v4533_v38  ;;  %v12381_v58 = vrot.slane %v4533_v38, %v8348_v5 }
 0x2ce   : > { %v5236_v51 = vcombine.low %v4877_v28, %v4885_v0  ;;  %v5520_v6 = vrot.slane %v5518_v55, 2  ;;  %v5521_v43 = vrot.slane %v4885_v0, 7  ;;  %v5524_v50 = vrot.slane %v4884_v7, 7  ;;  %v6500_v12 = vpop.permute.xlu1 %6499 }
 0x2cf   : > { %v4886_v30 = vcombine.high %v4884_v7, %v4884_v7  ;;  %v4901_v62 = vrot.slane %v4887_v42, %v8348_v5  ;;  %v4902_v39 = vcombine.high %v12381_v58, %v12381_v58  ;;  %v5530_v14 = vrot.slane %v12381_v58, 7  ;;  %6547 = vst.msk [vmem:[#allocation3 + $0x38] sm:$0xff] %vm6539_vm10, %v6500_v12  ;;  %v6832_v42 = vpop.permute.xlu0 %6831 }
 0x2d0   : > { %v5526_v25 = vrot.slane %v5524_v50, 2  ;;  %v12394_v23 = vrot.slane %v5236_v51, %v8348_v5  ;;  %v5519_v24 = vsel %vm8499_vm6, %v5517_v20, %v5518_v55  ;;  %v6193_v27 = vrot.slane %v6185_v46, %v8348_v5  ;;  %6624 = vrot.lane.b32.xlu0 %v6570_v18, %s8248_s19  ;;  %6662 = vst.msk [vmem:[#allocation3 + $0x38] sm:$0xff] %vm6654_vm11, %v6615_v2 }
 0x2d1   : > { %6377 = vrot.lane.b32.xlu1 %v6322_v31, %s8241_s21  ;;  %v12399_v10 = vcombine.high %v4901_v62, %v4901_v62  ;;  %v5253_v28 = vcombine.low %v4902_v39, %v4901_v62  ;;  %v5527_v38 = vrot.slane %v4886_v30, 7  ;;  %v7752_v36 = vrot.slane %v4902_v39, 9  ;;  %6880 = vst.msk [vmem:[#allocation3 + $0x30] sm:$0xff] %vm6873_vm13, %v6832_v42 }
 0x2d2   : > { %v5534_v31 = vrot.slane %v4901_v62, 7  ;;  %v6202_v61 = vcombine.low %v4886_v30, %v12381_v58  ;;  %v5251_v20 = vcombine.low %v12336_v17, %v12394_v23  ;;  %v5806_v55 = vcombine.low %v5516_v16, %v5519_v24  ;;  %6980 = vst.msk [vmem:[#allocation3 + $0x30] sm:$0xff] %vm6973_vm14, %v6932_v37  ;;  %v5876_v15 = vpop.permute.xlu1 %5875 }
 0x2d3   : > { %v5529_v46 = vrot.slane %v5527_v38, 2  ;;  %v6571_v51 = vcombine.low %v12332_v21, %v6193_v27  ;;  %v5522_v18 = vsel %vm8499_vm6, %v5520_v6, %v5521_v43  ;;  %v5523_v39 = vrot.slane %v5521_v43, 2  ;;  %5921 = vst.msk [vmem:[#allocation3 + $0x48] sm:$0xff] %vm5911_vm2, %v5876_v15  ;;  %v5874_v37 = vpop.permute.xlu0 %5873 }
 0x2d4   : > { %v5536_v12 = vrot.slane %v5534_v31, 2  ;;  %5320 = vst.msk [vmem:[#allocation3 + $0x78] sm:$0xff] %vm5304_vm4, %v5251_v20  ;;  %v5814_v2 = vrot.slane %v5806_v55, %v8348_v5  ;;  %v6186_v58 = vcombine.low %v4885_v0, %v4884_v7  ;;  %v5252_v42 = vcombine.low %v4884_v7, %v4886_v30  ;;  %6724 = vrot.lane.b32.xlu0 %v5251_v20, %s8249_s29 }
 0x2d5   : > { %v5531_v17 = vsel %vm8499_vm6, %v5529_v46, %v5530_v14  ;;  %v5525_v21 = vsel %vm8499_vm6, %v5523_v39, %v5524_v50  ;;  %v12421_v16 = vrot.slane %v5253_v28, %v8348_v5  ;;  %v5528_v6 = vsel %vm8499_vm6, %v5526_v25, %v5527_v38  ;;  %5920 = vst.msk [vmem:[#allocation3 + $0x40] sm:$0xff] %vm5911_vm2, %v5874_v37 }
 0x2d6   : > { %v6456_v7 = vcombine.low %v12354_v13, %v5814_v2  ;;  %v5807_v0 = vcombine.low %v5522_v18, %v5525_v21  ;;  %v12428_v43 = vrot.slane %v6186_v58, %v8348_v5  ;;  %v5260_v15 = vrot.slane %v5252_v42, %v8348_v5 }
 0x2d7   : > { %v5537_v30 = vrot.slane %v12399_v10, 7  ;;  %v5823_v14 = vcombine.low %v5528_v6, %v5531_v17  ;;  %v6203_v50 = vcombine.low %v4901_v62, %v12399_v10  ;;  %v12442_v28 = vrot.slane %v6202_v61, %v8348_v5  ;;  %v6253_v38 = vpop.permute.xlu0 %6252 }
 0x2d8   : > { %6511 = vrot.lane.b32.xlu1 %v6456_v7, %s8245_s8  ;;  %v12435_v24 = vrot.slane %v5807_v0, %v8348_v5  ;;  %v12438_v25 = vcombine.low %v6193_v27, %v12428_v43  ;;  %v5268_v13 = vcombine.low %v5260_v15, %v12421_v16  ;;  %v5535_v20 = vsel %vm8499_vm6, %v7752_v36, %v5534_v31 }
 0x2d9   : > { %v5538_v62 = vsel %vm8499_vm6, %v5536_v12, %v5537_v30  ;;  %v5831_v55 = vrot.slane %v5823_v14, %v8348_v5  ;;  %v12452_v46 = vrot.slane %v6203_v50, %v8348_v5  ;;  %6299 = vst.msk [vmem:[#allocation3 + $0x40] sm:$0xff] %vm6290_vm3, %v6253_v38  ;;  %v6572_v36 = vcombine.low %v12428_v43, %v12442_v28 }
 0x2da   : > { %v5822_v27 = vcombine.low %v5814_v2, %v12435_v24  ;;  %5321 = vst.msk [vmem:[#allocation3 + $0x80] sm:$0xff] %vm5304_vm4, %v5268_v13  ;;  %v5824_v61 = vcombine.low %v5535_v20, %v5538_v62 }
 0x2db   : > { %v12461_v31 = vcombine.low %v12442_v28, %v12452_v46  ;;  %v6457_v18 = vcombine.low %v12435_v24, %v5831_v55  ;;  %v6368_v12 = vpop.permute.xlu0 %6367  ;;  %v6323_v24 = vcombine.low %v12394_v23, %v5260_v15 }
 0x2dc   : > { %6626 = vrot.lane.b32.xlu1 %v6571_v51, %s8248_s19  ;;  %6843 = vrot.lane.b32.xlu0 %v5822_v27, %s8251_s16  ;;  %v12467_v39 = vrot.slane %v5824_v61, %v8348_v5  ;;  %6414 = vst.msk [vmem:[#allocation3 + $0x40] sm:$0xff] %vm6405_vm5, %v6368_v12 }
 0x2de   : > { %v12471_v2 = vcombine.low %v5831_v55, %v12467_v39 }
 0x2e0   : > { %6943 = vrot.lane.b32.xlu0 %v12438_v25, %s8250_s15  ;;  %6726 = vrot.lane.b32.xlu1 %v5268_v13, %s8249_s29 }
 0x2e4   : > { %5885 = vrot.lane.b32.xlu0 %v12358_v52, %s8238_s18  ;;  %6845 = vrot.lane.b32.xlu1 %v12471_v2, %s8251_s16 }
 0x2e5   : > { %v4492_v51 = vpop.f32.mrb[40].mxu0 }
 0x2e6   : > { %v4493_v58 = vadd.f32 %v12018_v57, %v4492_v51  ;;  %v6715_v42 = vpop.permute.xlu1 %6714  ;;  %v7887_v17 = vpop.f32.mrb[41].mxu0 }
 0x2e7   : > { %6762 = vst.msk [vmem:[#allocation3 + $0x38] sm:$0xff] %vm6754_vm12, %v6715_v42  ;;  %v4495_v37 = vpop.f32.mrb[42].mxu0 }
 0x2e8   : > { %6264 = vrot.lane.b32.xlu0 %v12347_v45, %s8243_s23  ;;  %6945 = vrot.lane.b32.xlu1 %v12461_v31, %s8250_s15  ;;  %v4534_v21 = vmax.f32 %v4493_v58, 0.0  ;;  %v6502_v6 = vpop.permute.xlu0 %6501  ;;  %v4496_v52 = vadd.f32 %v12018_v57, %v4495_v37  ;;  %v7888_v7 = vpop.f32.mrb[43].mxu0 }
 0x2e9   : > { %6548 = vst.msk [vmem:[#allocation3 + $0x40] sm:$0xff] %vm6539_vm10, %v6502_v6 }
 0x2ea   : > { %v4904_v0 = vcombine.high %v4534_v21, %v4534_v21  ;;  %v4911_v14 = vrot.slane %v4534_v21, %v8348_v5  ;;  %v4535_v50 = vmax.f32 %v4496_v52, 0.0  ;;  %v6934_v13 = vpop.permute.xlu1 %6933 }
 0x2ec   : > { %v12491_v38 = vrot.slane %v4904_v0, %v8348_v5  ;;  %v4919_v45 = vcombine.high %v4911_v14, %v4911_v14  ;;  %v5269_v20 = vcombine.low %v12399_v10, %v4911_v14  ;;  %v5540_v62 = vrot.slane %v4911_v14, 7  ;;  %6379 = vrot.lane.b32.xlu0 %v6323_v24, %s8241_s21  ;;  %5887 = vrot.lane.b32.xlu1 %v5822_v27, %s8238_s18  ;;  %v6617_v57 = vpop.permute.xlu0 %6616 }
 0x2ed   : > { %v4921_v55 = vcombine.high %v4535_v50, %v4535_v50  ;;  %v4928_v61 = vrot.slane %v4535_v50, %v8348_v5  ;;  %6663 = vst.msk [vmem:[#allocation3 + $0x40] sm:$0xff] %vm6654_vm11, %v6617_v57  ;;  %v5539_v27 = vrot.slane %v5537_v30, 2 }
 0x2ee   : > { %v4920_v23 = vcombine.high %v12491_v38, %v12491_v38  ;;  %v5542_v15 = vrot.slane %v5540_v62, 2  ;;  %v5543_v12 = vrot.slane %v4919_v45, 7  ;;  %v5546_v51 = vrot.slane %v12491_v38, 7  ;;  %v6834_v37 = vpop.permute.xlu1 %6833 }
 0x2ef   : > { %v6219_v58 = vcombine.low %v4911_v14, %v4919_v45  ;;  %v12502_v42 = vrot.slane %v4921_v55, %v8348_v5  ;;  %v4936_v17 = vcombine.high %v4928_v61, %v4928_v61  ;;  %6881 = vst.msk [vmem:[#allocation3 + $0x38] sm:$0xff] %vm6873_vm13, %v6834_v37  ;;  %v5277_v7 = vrot.slane %v5269_v20, %v8348_v5 }
 0x2f0   : > { %v5548_v21 = vrot.slane %v5546_v51, 2  ;;  %v5549_v6 = vrot.slane %v4920_v23, 7  ;;  %6513 = vrot.lane.b32.xlu0 %v6457_v18, %s8245_s8  ;;  %6266 = vrot.lane.b32.xlu1 %v12438_v25, %s8243_s23  ;;  %v6717_v52 = vpop.permute.xlu0 %6716  ;;  %v5270_v0 = vcombine.low %v4919_v45, %v12491_v38  ;;  %v7753_v50 = vrot.slane %v4928_v61, 9  ;;  %6981 = vst.msk [vmem:[#allocation3 + $0x38] sm:$0xff] %vm6973_vm14, %v6934_v13 }
 0x2f1   : > { %v6325_v14 = vcombine.low %v4928_v61, %v4936_v17  ;;  %v6426_v24 = vrot.slane %v4936_v17, 7  ;;  %6763 = vst.msk [vmem:[#allocation3 + $0x40] sm:$0xff] %vm6754_vm12, %v6717_v52  ;;  %v6324_v10 = vcombine.low %v12421_v16, %v5277_v7  ;;  %v5541_v25 = vsel %vm8499_vm6, %v5539_v27, %v5540_v62 }
 0x2f2   : > { %v12516_v30 = vrot.slane %v5270_v0, %v8348_v5  ;;  %v5544_v18 = vsel %vm8499_vm6, %v5542_v15, %v5543_v12  ;;  %v12524_v45 = vcombine.high %v12502_v42, %v12502_v42  ;;  %v6429_v13 = vrot.slane %v12502_v42, 7  ;;  %v6255_v57 = vpop.permute.xlu1 %6254 }
 0x2f3   : > { %v6428_v20 = vrot.slane %v6426_v24, 2  ;;  %v5840_v55 = vcombine.low %v5541_v25, %v5544_v18  ;;  %6300 = vst.msk [vmem:[#allocation3 + $0x48] sm:$0xff] %vm6290_vm3, %v6255_v57  ;;  %v5545_v61 = vrot.slane %v5543_v12, 2  ;;  %v5550_v15 = vsel %vm8499_vm6, %v5548_v21, %v5549_v6 }
 0x2f4   : > { %6628 = vrot.lane.b32.xlu0 %v6572_v36, %s8248_s19  ;;  %6381 = vrot.lane.b32.xlu1 %v6324_v10, %s8241_s21  ;;  %v6836_v16 = vpop.permute.xlu0 %6835  ;;  %v5285_v62 = vcombine.low %v5277_v7, %v12516_v30  ;;  %v6227_v37 = vrot.slane %v6219_v58, %v8348_v5  ;;  %v6427_v27 = vsel %vm8499_vm6, %v7753_v50, %v6426_v24 }
 0x2f5   : > { %6882 = vst.msk [vmem:[#allocation3 + $0x40] sm:$0xff] %vm6873_vm13, %v6836_v16  ;;  %v5848_v43 = vrot.slane %v5840_v55, %v8348_v5  ;;  %v6220_v28 = vcombine.low %v12491_v38, %v4920_v23  ;;  %v12543_v36 = vrot.slane %v6325_v14, %v8348_v5  ;;  %v5547_v12 = vsel %vm8499_vm6, %v5545_v61, %v5546_v51  ;;  %v6998_v51 = vld [vmem:[#allocation3 + $0x30] sm:$0xff] }
 0x2f6   : > { %5322 = vst.msk [vmem:[#allocation3 + $0x88] sm:$0xff] %vm5304_vm4, %v5285_v62  ;;  %v6573_v21 = vcombine.low %v12452_v46, %v6227_v37  ;;  %v6430_v58 = vsel %vm8499_vm6, %v6428_v20, %v6429_v13  ;;  %v6574_v6 = vcombine.low %v4936_v17, %v12502_v42  ;;  %v6370_v52 = vpop.permute.xlu1 %6369  ;;  %v5841_v23 = vcombine.low %v5547_v12, %v5550_v15 }
 0x2f7   : > { %v6458_v38 = vcombine.low %v12467_v39, %v5848_v43  ;;  %v12556_v7 = vrot.slane %v6220_v28, %v8348_v5  ;;  %v6334_v0 = vcombine.low %v12502_v42, %v12524_v45  ;;  %6415 = vst.msk [vmem:[#allocation3 + $0x48] sm:$0xff] %vm6405_vm5, %v6370_v52  ;;  %v6999_v14 = vld [vmem:[#allocation3 + $0x38] sm:$0xff]  ;;  %vm7062_vm4 = vcmask 588800  }
 0x2f8   : > { %6728 = vrot.lane.b32.xlu0 %v5285_v62, %s8249_s29  ;;  %v6936_v46 = vpop.permute.xlu0 %6935  ;;  %v6333_v17 = vcombine.low %v12516_v30, %v12543_v36  ;;  %v6459_v50 = vcombine.low %v6427_v27, %v6430_v58  ;;  %v12565_v39 = vrot.slane %v6574_v6, %v8348_v5  ;;  %v12570_v24 = vrot.slane %v5841_v23, %v8348_v5 }
 0x2f9   : > { %6982 = vst.msk [vmem:[#allocation3 + $0x40] sm:$0xff] %vm6973_vm14, %v6936_v46  ;;  %6515 = vrot.lane.b32.xlu1 %v6458_v38, %s8245_s8  ;;  %v7013_v10 = vpack.c.bf16 %v6999_v14, %v6998_v51  ;;  %v12582_v57 = vrot.slane %v6334_v0, %v8348_v5  ;;  %v12594_v62 = vcombine.low %v6227_v37, %v12556_v7  ;;  %v12608_v37 = vld [vmem:[%s13285_s2] ss:$0 sm:$0xff]  ;;  %v6431_v52 = vrot.slane %v6429_v13, 2 }
 0x2fa   : > { %v12573_v25 = vrot.slane %v6459_v50, %v8348_v5  ;;  %v6582_v18 = vcombine.low %v12556_v7, %v12565_v39  ;;  %v12578_v30 = vcombine.low %v5848_v43, %v12570_v24  ;;  %v6504_v20 = vpop.permute.xlu1 %6503 }
 0x2fb   : > { %7920 = vmatmul.mubr.msk.bf16.vlgmr.msra.gmra.mrb[0].mxu1 %vm7062_vm4, %v7013_v10  ;;  %6549 = vst.msk [vmem:[#allocation3 + $0x48] sm:$0xff] %vm6539_vm10, %v6504_v20  ;;  %v6673_v15 = vcombine.low %v12543_v36, %v12582_v57 }
 0x2fc   : > { %v5878_v55 = vpop.permute.xlu0 %5877  ;;  %v6467_v16 = vcombine.low %v12570_v24, %v12573_v25  ;;  %7923 = vmatprep.mubr.msk.bf16.mxu1 %vm8247_vm9, %v13436_v3  ;;  %6847 = vrot.lane.b32.xlu0 %v12578_v30, %s8251_s16 }
 0x2fd   : > { %5922 = vst.msk [vmem:[#allocation3 + $0x50] sm:$0xff] %vm5911_vm2, %v5878_v55  ;;  %6630 = vrot.lane.b32.xlu1 %v6573_v21, %s8248_s19 }
 0x2fe   : > { %v6619_v61 = vpop.permute.xlu1 %6618 }
 0x2ff   : > { %6664 = vst.msk [vmem:[#allocation3 + $0x48] sm:$0xff] %vm6654_vm11, %v6619_v61 }
 0x300   : > { %v6257_v27 = vpop.permute.xlu0 %6256  ;;  %6947 = vrot.lane.b32.xlu0 %v12594_v62, %s8250_s15 }
 0x301   : > { %6301 = vst.msk [vmem:[#allocation3 + $0x50] sm:$0xff] %vm6290_vm3, %v6257_v27  ;;  %6730 = vrot.lane.b32.xlu1 %v6673_v15, %s8249_s29 }
 0x304   : > { %5889 = vrot.lane.b32.xlu0 %v12471_v2, %s8238_s18  ;;  %v6432_v2 = vrot.slane %v12524_v45, 7 }
 0x305   : > { %v4500_v43 = vpop.f32.mrb[44].mxu0 }
 0x306   : > { %v4501_v28 = vadd.f32 %v12608_v37, %v4500_v43  ;;  %v7891_v36 = vpop.f32.mrb[45].mxu0  ;;  %v6434_v27 = vrot.slane %v6432_v2, 2 }
 0x307   : > { %v4503_v12 = vpop.f32.mrb[46].mxu0  ;;  %v6372_v0 = vpop.permute.xlu0 %6371 }
 0x308   : > { %v4536_v21 = vmax.f32 %v4501_v28, 0.0  ;;  %v4504_v58 = vadd.f32 %v12608_v37, %v4503_v12  ;;  %v7892_v6 = vpop.f32.mrb[47].mxu0  ;;  %6268 = vrot.lane.b32.xlu0 %v12461_v31, %s8243_s23  ;;  %6416 = vst.msk [vmem:[#allocation3 + $0x50] sm:$0xff] %vm6405_vm5, %v6372_v0  ;;  %v6433_v31 = vsel %vm8499_vm6, %v6431_v52, %v6432_v2 }
 0x30a   : > { %v4938_v38 = vcombine.high %v4536_v21, %v4536_v21  ;;  %v4945_v23 = vrot.slane %v4536_v21, %v8348_v5  ;;  %v4537_v46 = vmax.f32 %v4504_v58, 0.0  ;;  %v6719_v42 = vpop.permute.xlu1 %6718 }
 0x30b   : > { %6764 = vst.msk [vmem:[#allocation3 + $0x48] sm:$0xff] %vm6754_vm12, %v6719_v42  ;;  %v6506_v15 = vpop.permute.xlu0 %6505 }
 0x30c   : > { %v4952_v51 = vrot.slane %v4938_v38, %v8348_v5  ;;  %v4953_v14 = vcombine.high %v4945_v23, %v4945_v23  ;;  %v6435_v50 = vrot.slane %v4945_v23, 7  ;;  %v6583_v24 = vcombine.low %v12524_v45, %v4945_v23  ;;  %6383 = vrot.lane.b32.xlu0 %v6333_v17, %s8241_s21  ;;  %6550 = vst.msk [vmem:[#allocation3 + $0x50] sm:$0xff] %vm6539_vm10, %v6506_v15 }
 0x30d   : > { %v4955_v13 = vcombine.high %v4537_v46, %v4537_v46  ;;  %v4962_v10 = vrot.slane %v4537_v46, %v8348_v5 }
 0x30e   : > { %v4954_v20 = vcombine.high %v4952_v51, %v4952_v51  ;;  %v6335_v55 = vcombine.low %v4945_v23, %v4953_v14  ;;  %v6437_v61 = vrot.slane %v6435_v50, 2  ;;  %v6438_v43 = vrot.slane %v4953_v14, 7 }
 0x30f   : > { %v6441_v28 = vrot.slane %v4952_v51, 7  ;;  %v12627_v45 = vrot.slane %v4955_v13, %v8348_v5  ;;  %v12629_v36 = vcombine.high %v4962_v10, %v4962_v10  ;;  %v6775_v17 = vrot.slane %v4962_v10, 7  ;;  %v6838_v0 = vpop.permute.xlu1 %6837  ;;  %v6621_v46 = vpop.permute.xlu0 %6620 }
 0x310   : > { %v7754_v12 = vrot.slane %v4954_v20, 9  ;;  %v6674_v21 = vcombine.low %v4954_v20, %v4962_v10  ;;  %v6436_v58 = vsel %vm8499_vm6, %v6434_v27, %v6435_v50  ;;  %v6584_v6 = vcombine.low %v4953_v14, %v4952_v51  ;;  %6517 = vrot.lane.b32.xlu0 %v6467_v16, %s8245_s8  ;;  %6883 = vst.msk [vmem:[#allocation3 + $0x48] sm:$0xff] %vm6873_vm13, %v6838_v0 }
 0x311   : > { %v12636_v52 = vcombine.high %v12627_v45, %v12627_v45  ;;  %v6778_v2 = vrot.slane %v12629_v36, 7  ;;  %v6893_v38 = vcombine.low %v4962_v10, %v12629_v36  ;;  %v6777_v23 = vrot.slane %v6775_v17, 2  ;;  %6665 = vst.msk [vmem:[#allocation3 + $0x50] sm:$0xff] %vm6654_vm11, %v6621_v46 }
 0x312   : > { %v6468_v42 = vcombine.low %v6433_v31, %v6436_v58  ;;  %v12642_v13 = vrot.slane %v6335_v55, %v8348_v5  ;;  %v6681_v50 = vrot.slane %v6674_v21, %v8348_v5  ;;  %v6781_v51 = vrot.slane %v12627_v45, 7 }
 0x313   : > { %v12649_v14 = vrot.slane %v6583_v24, %v8348_v5  ;;  %v6439_v16 = vsel %vm8499_vm6, %v6437_v61, %v6438_v43  ;;  %v6440_v10 = vrot.slane %v6438_v43, 2  ;;  %v6776_v55 = vsel %vm8499_vm6, %v7754_v12, %v6775_v17  ;;  %v6938_v21 = vpop.permute.xlu1 %6937 }
 0x314   : > { %v12654_v31 = vrot.slane %v6468_v42, %v8348_v5  ;;  %v6682_v20 = vcombine.low %v12642_v13, %v6681_v50  ;;  %v6779_v15 = vsel %vm8499_vm6, %v6777_v23, %v6778_v2  ;;  %6632 = vrot.lane.b32.xlu0 %v6582_v18, %s8248_s19  ;;  %v12670_v43 = vrot.slane %v6584_v6, %v8348_v5 }
 0x315   : > { %v6892_v24 = vcombine.low %v12565_v39, %v12649_v14  ;;  %v6442_v61 = vsel %vm8499_vm6, %v6440_v10, %v6441_v28  ;;  %v6793_v27 = vcombine.low %v6776_v55, %v6779_v15  ;;  %v6900_v23 = vrot.slane %v6893_v38, %v8348_v5  ;;  %6983 = vst.msk [vmem:[#allocation3 + $0x48] sm:$0xff] %vm6973_vm14, %v6938_v21  ;;  %v7366_v21 = vld [vmem:[%s13288_s5] sm:$0x3] }
 0x316   : > { %v6792_v12 = vcombine.low %v12573_v25, %v12654_v31  ;;  %v4508_v17 = vpop.f32.mrb[48].mxu0  ;;  %v6469_v58 = vcombine.low %v6439_v16, %v6442_v61  ;;  %v6350_v7 = vcombine.low %v12582_v57, %v12642_v13  ;;  %v6599_v6 = vcombine.low %v12649_v14, %v12670_v43 }
 0x317   : > { %v4509_v39 = vadd.f32 %v12608_v37, %v4508_v17  ;;  %v6800_v18 = vrot.slane %v6793_v27, %v8348_v5  ;;  %v7895_v28 = vpop.f32.mrb[49].mxu0  ;;  %v6901_v38 = vcombine.low %v12670_v43, %v6900_v23  ;;  %v6780_v46 = vrot.slane %v6778_v2, 2  ;;  %v5880_v10 = vpop.permute.xlu1 %5879 }
 0x318   : > { %6849 = vrot.lane.b32.xlu1 %v6792_v12, %s8251_s16  ;;  %v12684_v25 = vrot.slane %v6469_v58, %v8348_v5  ;;  %v4511_v0 = vpop.f32.mrb[50].mxu0  ;;  %v6783_v42 = vrot.slane %v6781_v51, 2  ;;  %6732 = vrot.lane.b32.xlu0 %v6682_v20, %s8249_s29  ;;  %v6784_v16 = vrot.slane %v12636_v52, 7  ;;  %5923 = vst.msk [vmem:[#allocation3 + $0x58] sm:$0xff] %vm5911_vm2, %v5880_v10  ;;  %v6683_v2 = vcombine.low %v12629_v36, %v12627_v45  ;;  %v7000_v58 = vld [vmem:[#allocation3 + $0x40] sm:$0xff] }
 0x319   : > { %v4538_v50 = vmax.f32 %v4509_v39, 0.0  ;;  %v7896_v37 = vpop.f32.mrb[51].mxu0  ;;  %v6782_v20 = vsel %vm8499_vm6, %v6780_v46, %v6781_v51  ;;  %v6902_v27 = vcombine.low %v12627_v45, %v12636_v52  ;;  %v7402_v39 = vsel %vm4374_vm8, %v7366_v21, 0 }
 0x31a   : > { %v6801_v55 = vcombine.low %v12684_v25, %v6800_v18  ;;  %v6484_v15 = vcombine.low %v12654_v31, %v12684_v25  ;;  %v6786_v51 = vrot.slane %v6784_v16, 2  ;;  %7944 = vmatpush3.bf16.msra.mxu1 %v7402_v39 }
 0x31b   : > { %v4978_v61 = vrot.slane %v4538_v50, %v8348_v5  ;;  %v6259_v36 = vpop.permute.xlu1 %6258  ;;  %v6910_v37 = vrot.slane %v6902_v27, %v8348_v5 }
 0x31c   : > { %6949 = vrot.lane.b32.xlu1 %v6892_v24, %s8250_s15  ;;  %6851 = vrot.lane.b32.xlu0 %v6801_v55, %s8251_s16  ;;  %v6785_v24 = vsel %vm8499_vm6, %v6783_v42, %v6784_v16  ;;  %v7001_v23 = vld [vmem:[#allocation3 + $0x48] sm:$0xff]  ;;  %6302 = vst.msk [vmem:[#allocation3 + $0x58] sm:$0xff] %vm6290_vm3, %v6259_v36 }
 0x31d   : > { %v4979_v31 = vcombine.high %v4978_v61, %v4978_v61  ;;  %v6684_v12 = vcombine.low %v12636_v52, %v4978_v61  ;;  %v6787_v17 = vrot.slane %v4978_v61, 7  ;;  %v7014_v25 = vpack.c.bf16 %v7001_v23, %v7000_v58  ;;  %v13616_v58 = vld [vmem:[#allocation8_spill] sm:$0xff] }
 0x31e   : > { %v6691_v52 = vrot.slane %v6683_v2, %v8348_v5  ;;  %v6802_v42 = vcombine.low %v6782_v20, %v6785_v24  ;;  %v13610_v2 = vcombine.low %v11509_v49, %v11512_v59  ;;  %v13612_v59 = vcombine.low %v11569_v48, %v11582_v60 }
 0x31f   : > { %v6789_v45 = vrot.slane %v6787_v17, 2  ;;  %v6790_v18 = vrot.slane %v4979_v31, 7  ;;  %v6903_v28 = vcombine.low %v4978_v61, %v4979_v31  ;;  %v6698_v0 = vrot.slane %v6684_v12, %v8348_v5  ;;  %7924 = vmatmul.mubr.msk.bf16.gmra.mrb[4].mxu1 %vm7062_vm4, %v7014_v25 }
 0x320   : > { %5891 = vrot.lane.b32.xlu1 %v12578_v30, %s8238_s18  ;;  %v6788_v46 = vsel %vm8499_vm6, %v6786_v51, %v6787_v17  ;;  %6951 = vrot.lane.b32.xlu0 %v6901_v38, %s8250_s15  ;;  %v6374_v30 = vpop.permute.xlu1 %6373  ;;  %v6810_v38 = vrot.slane %v6802_v42, %v8348_v5  ;;  %v13614_v60 = vcombine.low %v11585_v11, %v11602_v63  ;;  %v7209_v23 = vrot.slane %v13616_v58, 6  ;;  %v13640_v58 = vld [vmem:[#allocation31_spill] sm:$0xff] }
 0x321   : > { %v6791_v50 = vsel %vm8499_vm6, %v6789_v45, %v6790_v18  ;;  %v6917_v16 = vrot.slane %v6903_v28, %v8348_v5  ;;  %v6699_v10 = vcombine.low %v6691_v52, %v6698_v0  ;;  %7927 = vmatprep.mubr.msk.bf16.mxu1 %vm8247_vm9, %v13436_v3  ;;  %6417 = vst.msk [vmem:[#allocation3 + $0x58] sm:$0xff] %vm6405_vm5, %v6374_v30  ;;  %vm7199_vm6 = vcmask 1045508   ;;  %v8150_v52 = vld [vmem:[%s8346_s17 + $0x20] sm:$0xff] }
 0x322   : > { %v6803_v55 = vcombine.low %v6788_v46, %v6791_v50  ;;  %vm12779_vm15 = vmor %vm4374_vm8, %vm7199_vm6  ;;  %v13619_v25 = vcombine.low %v11563_v40, %v11599_v33  ;;  %v7770_v0 = vrot.slane %v8150_v52, 10  ;;  %v8151_v50 = vld [vmem:[%s8346_s17 + $0x30] sm:$0xff] }
 0x323   : > { %v6918_v61 = vcombine.low %v6910_v37, %v6917_v16  ;;  %v7771_v37 = vrot.slane %v8151_v50, 10  ;;  %v13620_v16 = vld [vmem:[#allocation9_spill] sm:$0xff]  ;;  %v13649_v50 = vld [vmem:[#allocation52_spill] sm:$0xff] }
 0x324   : > { %6270 = vrot.lane.b32.xlu1 %v12594_v62, %s8243_s23  ;;  %v6817_v8 = vrot.slane %v6803_v55, %v8348_v5  ;;  %5857 = vrot.lane.b32.xlu0 %v13610_v2, %s8238_s18  ;;  %v6508_v20 = vpop.permute.xlu1 %6507  ;;  %v13611_v5 = vcombine.low %v11466_v22, %v11469_v32  ;;  %v13613_v22 = vcombine.low %v11599_v33, %v11615_v4  ;;  %v7213_v30 = vrot.slane %v13620_v16, 6 }
 0x325   : > { %v6721_v27 = vpop.permute.xlu0 %6720  ;;  %6551 = vst.msk [vmem:[#allocation3 + $0x58] sm:$0xff] %vm6539_vm10, %v6508_v20  ;;  %v13622_v2 = vcombine.low %v11615_v4, %v11644_v41  ;;  %v13625_v4 = vcombine.low %v11644_v41, %v11706_v35  ;;  %v13628_v41 = vld [vmem:[#allocation44_spill] sm:$0xff] }
 0x326   : > { %v6818_v21 = vcombine.low %v6810_v38, %v6817_v8  ;;  %6765 = vst.msk [vmem:[#allocation3 + $0x50] sm:$0xff] %vm6754_vm12, %v6721_v27  ;;  %v7214_v55 = vsel %vm12779_vm15, %v7771_v37, %v7213_v30  ;;  %v13621_v38 = vcombine.low %v11549_v1, %v11585_v11  ;;  %v13624_v1 = vcombine.low %v11602_v63, %v11630_v44 }
 0x327   : > { %v13627_v63 = vcombine.low %v11630_v44, %v11696_v54  ;;  %v13629_v35 = vcombine.low %v11730_v34, %v13628_v41  ;;  %v13634_v34 = vld [vmem:[#allocation34_spill] sm:$0xff] }
 0x328   : > { %6385 = vrot.lane.b32.xlu1 %v6350_v7, %s8241_s21  ;;  %6236 = vrot.lane.b32.xlu0 %v13611_v5, %s8243_s23  ;;  %v13615_v7 = vld [vmem:[#allocation7_spill] sm:$0xff] }
 0x32a   : > { %v6840_v49 = vpop.permute.xlu0 %6839 }
 0x32b   : > { %v6623_v62 = vpop.permute.xlu1 %6622  ;;  %6884 = vst.msk [vmem:[#allocation3 + $0x50] sm:$0xff] %vm6873_vm13, %v6840_v49 }
 0x32c   : > { %6666 = vst.msk [vmem:[#allocation3 + $0x58] sm:$0xff] %vm6654_vm11, %v6623_v62  ;;  %6519 = vrot.lane.b32.xlu1 %v6484_v15, %s8245_s8  ;;  %6351 = vrot.lane.b32.xlu0 %v13612_v59, %s8241_s21  ;;  %v8149_v15 = vld [vmem:[%s8346_s17 + $0x28] sm:$0xff]  ;;  %v13632_v59 = vld [vmem:[#allocation36_spill] sm:$0xff] }
 0x32d   : > { %v7206_v31 = vrot.slane %v8149_v15, 6 }
 0x32e   : > { %v6940_v13 = vpop.permute.xlu0 %6939 }
 0x32f   : > { %v6723_v57 = vpop.permute.xlu1 %6722  ;;  %6984 = vst.msk [vmem:[#allocation3 + $0x50] sm:$0xff] %vm6973_vm14, %v6940_v13  ;;  %v7208_v36 = vrot.slane %v7206_v31, 4  ;;  %v13635_v13 = vld [vmem:[#allocation47_spill] sm:$0xff] }
 0x330   : > { %6766 = vst.msk [vmem:[#allocation3 + $0x58] sm:$0xff] %vm6754_vm12, %v6723_v57  ;;  %6634 = vrot.lane.b32.xlu1 %v6599_v6, %s8248_s19  ;;  %6485 = vrot.lane.b32.xlu0 %v13613_v22, %s8245_s8  ;;  %v7203_v6 = vrot.slane %v13615_v7, 6  ;;  %v13638_v7 = vld [vmem:[#allocation53_spill] sm:$0xff] }
 0x331   : > { %v7210_v42 = vsel %vm12779_vm15, %v7208_v36, %v7209_v23  ;;  %v13639_v36 = vld [vmem:[#allocation38_spill] sm:$0xff] }
 0x332   : > { %v5882_v48 = vpop.permute.xlu0 %5881  ;;  %v7205_v24 = vrot.slane %v7203_v6, 4  ;;  %v7204_v40 = vsel %vm12779_vm15, %v7770_v0, %v7203_v6  ;;  %v7322_v8 = vcombine.low %v7210_v42, %v7214_v55  ;;  %v13641_v23 = vcombine.low %v13639_v36, %v13640_v58  ;;  %v13648_v42 = vld [vmem:[#allocation46_spill] sm:$0xff]  ;;  %v13674_v36 = vld [vmem:[#allocation64_spill] sm:$0xff] }
 0x333   : > { %v6842_v32 = vpop.permute.xlu1 %6841  ;;  %5924 = vst.msk [vmem:[#allocation3 + $0x60] sm:$0xff] %vm5911_vm2, %v5882_v48  ;;  %v13636_v48 = vld [vmem:[#allocation30_spill] sm:$0xff]  ;;  %v13650_v37 = vcombine.low %v13648_v42, %v13649_v50 }
 0x334   : > { %6885 = vst.msk [vmem:[#allocation3 + $0x58] sm:$0xff] %vm6873_vm13, %v6842_v32  ;;  %6734 = vrot.lane.b32.xlu1 %v6699_v10, %s8249_s29  ;;  %6600 = vrot.lane.b32.xlu0 %v13614_v60, %s8248_s19  ;;  %v7207_v46 = vsel %vm12779_vm15, %v7205_v24, %v7206_v31  ;;  %v13637_v60 = vld [vmem:[#allocation42_spill] sm:$0xff] }
 0x336   : > { %v6261_v43 = vpop.permute.xlu0 %6260  ;;  %v7002_v39 = vld [vmem:[#allocation3 + $0x50] sm:$0xff] }
 0x337   : > { %v6942_v14 = vpop.permute.xlu1 %6941  ;;  %6303 = vst.msk [vmem:[#allocation3 + $0x60] sm:$0xff] %vm6290_vm3, %v6261_v43 }
 0x338   : > { %6985 = vst.msk [vmem:[#allocation3 + $0x58] sm:$0xff] %vm6973_vm14, %v6942_v14  ;;  %6853 = vrot.lane.b32.xlu1 %v6818_v21, %s8251_s16  ;;  %6700 = vrot.lane.b32.xlu0 %v11685_v9, %s8249_s29  ;;  %v13623_v21 = vcombine.low %v11622_v53, %v11594_v56  ;;  %v13626_v56 = vcombine.low %v11671_v47, %v11712_v26  ;;  %v13630_v47 = vld [vmem:[#allocation45_spill] sm:$0xff] }
 0x339   : > { %v13631_v26 = vld [vmem:[#allocation41_spill] sm:$0xff] }
 0x33a   : > { %v6376_v17 = vpop.permute.xlu0 %6375  ;;  %v13633_v57 = vcombine.low %v13631_v26, %v13632_v59 }
 0x33b   : > { %v5884_v12 = vpop.permute.xlu1 %5883  ;;  %6418 = vst.msk [vmem:[#allocation3 + $0x60] sm:$0xff] %vm6405_vm5, %v6376_v17 }
 0x33c   : > { %5925 = vst.msk [vmem:[#allocation3 + $0x68] sm:$0xff] %vm5911_vm2, %v5884_v12  ;;  %6953 = vrot.lane.b32.xlu1 %v6918_v61, %s8250_s15  ;;  %6819 = vrot.lane.b32.xlu0 %v11751_v29, %s8251_s16  ;;  %v7321_v61 = vcombine.low %v7204_v40, %v7207_v46  ;;  %v13652_v40 = vld [vmem:[#allocation49_spill] sm:$0xff] }
 0x33e   : > { %v6510_v28 = vpop.permute.xlu0 %6509  ;;  %v12819_v20 = vpack.c.bf16 %v7322_v8, %v7321_v61  ;;  %v13655_v8 = vld [vmem:[#allocation54_spill] sm:$0xff] }
 0x33f   : > { %v6263_v9 = vpop.permute.xlu1 %6262  ;;  %v7003_v45 = vld [vmem:[#allocation3 + $0x58] sm:$0xff]  ;;  %6552 = vst.msk [vmem:[#allocation3 + $0x60] sm:$0xff] %vm6539_vm10, %v6510_v28  ;;  %v13645_v28 = vld [vmem:[#allocation33_spill] sm:$0xff] }
 0x340   : > { %6304 = vst.msk [vmem:[#allocation3 + $0x68] sm:$0xff] %vm6290_vm3, %v6263_v9  ;;  %v7015_v18 = vpack.c.bf16 %v7003_v45, %v7002_v39  ;;  %5859 = vrot.lane.b32.xlu1 %v13619_v25, %s8238_s18  ;;  %6919 = vrot.lane.b32.xlu0 %v11718_v19, %s8250_s15  ;;  %v13642_v39 = vld [vmem:[#allocation43_spill] sm:$0xff]  ;;  %v13643_v45 = vld [vmem:[#allocation50_spill] sm:$0xff]  ;;  %v13646_v25 = vld [vmem:[#allocation48_spill] sm:$0xff] }
 0x341   : > { %v13647_v52 = vcombine.low %v13645_v28, %v13646_v25 }
 0x342   : > { %7928 = vmatmul.mubr.msk.bf16.gmra.mrb[8].mxu1 %vm7062_vm4, %v7015_v18  ;;  %v6625_v33 = vpop.permute.xlu0 %6624  ;;  %v13644_v18 = vcombine.low %v13642_v39, %v13643_v45 }
 0x343   : > { %v6378_v10 = vpop.permute.xlu1 %6377  ;;  %7931 = vmatprep.mubr.msk.bf16.mxu1 %vm8247_vm9, %v13436_v3  ;;  %6667 = vst.msk [vmem:[#allocation3 + $0x60] sm:$0xff] %vm6654_vm11, %v6625_v33 }
 0x344   : > { %6419 = vst.msk [vmem:[#allocation3 + $0x68] sm:$0xff] %vm6405_vm5, %v6378_v10  ;;  %6238 = vrot.lane.b32.xlu1 %v13621_v38, %s8243_s23  ;;  %5861 = vrot.lane.b32.xlu0 %v13622_v2, %s8238_s18  ;;  %v13651_v10 = vld [vmem:[#allocation55_spill] sm:$0xff] }
 0x345   : > { %v13653_v33 = vcombine.low %v13651_v10, %v13652_v40  ;;  %v13654_v38 = vld [vmem:[#allocation51_spill] sm:$0xff] }
 0x346   : > { %v6725_v27 = vpop.permute.xlu0 %6724  ;;  %v13656_v2 = vld [vmem:[#allocation27_spill] sm:$0xff] }
 0x347   : > { %6767 = vst.msk [vmem:[#allocation3 + $0x60] sm:$0xff] %vm6754_vm12, %v6725_v27  ;;  %v13657_v27 = vcombine.low %v13655_v8, %v13656_v2  ;;  %v8152_v10 = vld [vmem:[%s8346_s17 + $0x38] sm:$0xff]  ;;  %v7215_v8 = vrot.slane %v7213_v30, 4  ;;  %v8153_v2 = vld [vmem:[%s8346_s17 + $0x40] sm:$0xff] }
 0x348   : > { %6353 = vrot.lane.b32.xlu1 %v13623_v21, %s8241_s21  ;;  %6240 = vrot.lane.b32.xlu0 %v13624_v1, %s8243_s23  ;;  %v13658_v1 = vld [vmem:[#allocation59_spill] sm:$0xff]  ;;  %v7216_v40 = vrot.slane %v8152_v10, 6  ;;  %v13682_v10 = vld [vmem:[#allocation16_spill] sm:$0xff] }
 0x34a   : > { %v6512_v11 = vpop.permute.xlu1 %6511  ;;  %v7217_v16 = vsel %vm12779_vm15, %v7215_v8, %v7216_v40  ;;  %v8160_v8 = vld [vmem:[%s8346_s17 + $0x78] sm:$0xff] }
 0x34b   : > { %6553 = vst.msk [vmem:[#allocation3 + $0x68] sm:$0xff] %vm6539_vm10, %v6512_v11  ;;  %v13659_v11 = vld [vmem:[#allocation63_spill] sm:$0xff] }
 0x34c   : > { %6487 = vrot.lane.b32.xlu1 %v13625_v4, %s8245_s8  ;;  %6355 = vrot.lane.b32.xlu0 %v13626_v56, %s8241_s21  ;;  %v13660_v56 = vld [vmem:[#allocation26_spill] sm:$0xff] }
 0x34e   : > { %v6627_v53 = vpop.permute.xlu1 %6626  ;;  %v6844_v5 = vpop.permute.xlu0 %6843 }
 0x34f   : > { %6668 = vst.msk [vmem:[#allocation3 + $0x68] sm:$0xff] %vm6654_vm11, %v6627_v53  ;;  %v13661_v53 = vld [vmem:[#allocation61_spill] sm:$0xff] }
 0x350   : > { %6886 = vst.msk [vmem:[#allocation3 + $0x60] sm:$0xff] %vm6873_vm13, %v6844_v5  ;;  %6602 = vrot.lane.b32.xlu1 %v13627_v63, %s8248_s19  ;;  %6489 = vrot.lane.b32.xlu0 %v13629_v35, %s8245_s8  ;;  %v13662_v63 = vld [vmem:[#allocation58_spill] sm:$0xff] }
 0x352   : > { %v6944_v62 = vpop.permute.xlu0 %6943  ;;  %v6727_v49 = vpop.permute.xlu1 %6726 }
 0x353   : > { %6986 = vst.msk [vmem:[#allocation3 + $0x60] sm:$0xff] %vm6973_vm14, %v6944_v62  ;;  %v13663_v62 = vld [vmem:[#allocation37_spill] sm:$0xff] }
 0x354   : > { %6768 = vst.msk [vmem:[#allocation3 + $0x68] sm:$0xff] %vm6754_vm12, %v6727_v49  ;;  %6702 = vrot.lane.b32.xlu1 %v13630_v47, %s8249_s29  ;;  %6604 = vrot.lane.b32.xlu0 %v13633_v57, %s8248_s19  ;;  %v13664_v49 = vld [vmem:[#allocation62_spill] sm:$0xff]  ;;  %v13666_v57 = vld [vmem:[#allocation57_spill] sm:$0xff] }
 0x355   : > { %v13665_v47 = vcombine.low %v13663_v62, %v13664_v49  ;;  %v13677_v49 = vld [vmem:[#allocation13_spill] sm:$0xff] }
 0x356   : > { %v5886_v44 = vpop.permute.xlu0 %5885  ;;  %v6846_v54 = vpop.permute.xlu1 %6845 }
 0x357   : > { %5926 = vst.msk [vmem:[#allocation3 + $0x70] sm:$0xff] %vm5911_vm2, %v5886_v44  ;;  %v13667_v44 = vld [vmem:[#allocation60_spill] sm:$0xff] }
 0x358   : > { %6887 = vst.msk [vmem:[#allocation3 + $0x68] sm:$0xff] %vm6873_vm13, %v6846_v54  ;;  %6821 = vrot.lane.b32.xlu1 %v13634_v34, %s8251_s16  ;;  %6704 = vrot.lane.b32.xlu0 %v13635_v13, %s8249_s29  ;;  %v13668_v54 = vcombine.low %v13666_v57, %v13667_v44 }
 0x35a   : > { %v6265_v22 = vpop.permute.xlu0 %6264  ;;  %v6946_v32 = vpop.permute.xlu1 %6945  ;;  %v7004_v31 = vld [vmem:[#allocation3 + $0x60] sm:$0xff] }
 0x35b   : > { %6305 = vst.msk [vmem:[#allocation3 + $0x70] sm:$0xff] %vm6290_vm3, %v6265_v22  ;;  %v13669_v22 = vld [vmem:[#allocation56_spill] sm:$0xff] }
 0x35c   : > { %6987 = vst.msk [vmem:[#allocation3 + $0x68] sm:$0xff] %vm6973_vm14, %v6946_v32  ;;  %6921 = vrot.lane.b32.xlu1 %v13636_v48, %s8250_s15  ;;  %6823 = vrot.lane.b32.xlu0 %v13637_v60, %s8251_s16  ;;  %v13670_v32 = vld [vmem:[#allocation40_spill] sm:$0xff] }
 0x35e   : > { %v6380_v14 = vpop.permute.xlu0 %6379  ;;  %v5888_v43 = vpop.permute.xlu1 %5887 }
 0x35f   : > { %6420 = vst.msk [vmem:[#allocation3 + $0x70] sm:$0xff] %vm6405_vm5, %v6380_v14 }
 0x360   : > { %5927 = vst.msk [vmem:[#allocation3 + $0x78] sm:$0xff] %vm5911_vm2, %v5888_v43  ;;  %5863 = vrot.lane.b32.xlu1 %v11751_v29, %s8238_s18  ;;  %6923 = vrot.lane.b32.xlu0 %v13638_v7, %s8250_s15  ;;  %v13672_v43 = vld [vmem:[#allocation66_spill] sm:$0xff] }
 0x362   : > { %v6514_v6 = vpop.permute.xlu0 %6513  ;;  %v6267_v15 = vpop.permute.xlu1 %6266 }
 0x363   : > { %v7005_v12 = vld [vmem:[#allocation3 + $0x68] sm:$0xff]  ;;  %6554 = vst.msk [vmem:[#allocation3 + $0x70] sm:$0xff] %vm6539_vm10, %v6514_v6 }
 0x364   : > { %6306 = vst.msk [vmem:[#allocation3 + $0x78] sm:$0xff] %vm6290_vm3, %v6267_v15  ;;  %v7016_v17 = vpack.c.bf16 %v7005_v12, %v7004_v31  ;;  %6242 = vrot.lane.b32.xlu1 %v11718_v19, %s8243_s23  ;;  %5865 = vrot.lane.b32.xlu0 %v13634_v34, %s8238_s18 }
 0x366   : > { %7932 = vmatmul.mubr.msk.bf16.gmra.mrb[12].mxu1 %vm7062_vm4, %v7016_v17  ;;  %v6629_v29 = vpop.permute.xlu0 %6628  ;;  %v6382_v24 = vpop.permute.xlu1 %6381  ;;  %v13673_v17 = vld [vmem:[#allocation65_spill] sm:$0xff] }
 0x367   : > { %7935 = vmatprep.mubr.msk.bf16.mxu1 %vm8247_vm9, %v13436_v3  ;;  %6669 = vst.msk [vmem:[#allocation3 + $0x70] sm:$0xff] %vm6654_vm11, %v6629_v29 }
 0x368   : > { %6421 = vst.msk [vmem:[#allocation3 + $0x78] sm:$0xff] %vm6405_vm5, %v6382_v24  ;;  %6357 = vrot.lane.b32.xlu1 %v13641_v23, %s8241_s21  ;;  %6244 = vrot.lane.b32.xlu0 %v13636_v48, %s8243_s23  ;;  %v13671_v48 = vcombine.low %v13669_v22, %v13670_v32 }
 0x36a   : > { %v6729_v19 = vpop.permute.xlu0 %6728 }
 0x36b   : > { %6769 = vst.msk [vmem:[#allocation3 + $0x70] sm:$0xff] %vm6754_vm12, %v6729_v19  ;;  %v6516_v9 = vpop.permute.xlu1 %6515 }
 0x36c   : > { %6555 = vst.msk [vmem:[#allocation3 + $0x78] sm:$0xff] %vm6539_vm10, %v6516_v9  ;;  %6491 = vrot.lane.b32.xlu1 %v13644_v18, %s8245_s8  ;;  %6359 = vrot.lane.b32.xlu0 %v13647_v52, %s8241_s21 }
 0x36e   : > { %v6848_v0 = vpop.permute.xlu0 %6847 }
 0x36f   : > { %v6631_v46 = vpop.permute.xlu1 %6630  ;;  %6888 = vst.msk [vmem:[#allocation3 + $0x70] sm:$0xff] %vm6873_vm13, %v6848_v0 }
 0x370   : > { %6670 = vst.msk [vmem:[#allocation3 + $0x78] sm:$0xff] %vm6654_vm11, %v6631_v46  ;;  %6606 = vrot.lane.b32.xlu1 %v13650_v37, %s8248_s19  ;;  %6493 = vrot.lane.b32.xlu0 %v13653_v33, %s8245_s8  ;;  %v13675_v33 = vld [vmem:[#allocation11_spill] sm:$0xff] }
 0x372   : > { %v6948_v55 = vpop.permute.xlu0 %6947 }
 0x373   : > { %v6731_v61 = vpop.permute.xlu1 %6730  ;;  %6988 = vst.msk [vmem:[#allocation3 + $0x70] sm:$0xff] %vm6973_vm14, %v6948_v55  ;;  %v7223_v55 = vrot.slane %v13675_v33, 6 }
 0x374   : > { %6770 = vst.msk [vmem:[#allocation3 + $0x78] sm:$0xff] %vm6754_vm12, %v6731_v61  ;;  %6706 = vrot.lane.b32.xlu1 %v13654_v38, %s8249_s29  ;;  %6608 = vrot.lane.b32.xlu0 %v13657_v27, %s8248_s19  ;;  %v7772_v27 = vrot.slane %v8153_v2, 10  ;;  %v7256_v2 = vrot.slane %v8160_v8, 6 }
 0x376   : > { %v5890_v21 = vpop.permute.xlu0 %5889  ;;  %v7224_v30 = vsel %vm12779_vm15, %v7772_v27, %v7223_v55 }
 0x377   : > { %5928 = vst.msk [vmem:[#allocation3 + $0x80] sm:$0xff] %vm5911_vm2, %v5890_v21 }
 0x378   : > { %6825 = vrot.lane.b32.xlu1 %v13658_v1, %s8251_s16  ;;  %6708 = vrot.lane.b32.xlu0 %v13659_v11, %s8249_s29  ;;  %v7218_v1 = vrot.slane %v7216_v40, 4  ;;  %v13676_v11 = vld [vmem:[#allocation10_spill] sm:$0xff]  ;;  %v7253_v40 = vrot.slane %v13682_v10, 6  ;;  %v8165_v10 = vld [vmem:[%s8346_s17 + $0xa8] sm:$0xff] }
 0x37a   : > { %v6269_v4 = vpop.permute.xlu0 %6268  ;;  %v7006_v6 = vld [vmem:[#allocation3 + $0x70] sm:$0xff] }
 0x37b   : > { %6307 = vst.msk [vmem:[#allocation3 + $0x80] sm:$0xff] %vm6290_vm3, %v6269_v4  ;;  %v7219_v4 = vrot.slane %v13676_v11, 6  ;;  %v13683_v11 = vld [vmem:[#allocation22_spill] sm:$0xff] }
 0x37c   : > { %6925 = vrot.lane.b32.xlu1 %v13660_v56, %s8250_s15  ;;  %6827 = vrot.lane.b32.xlu0 %v13661_v53, %s8251_s16  ;;  %v7225_v56 = vrot.slane %v7223_v55, 4  ;;  %v8154_v53 = vld [vmem:[%s8346_s17 + $0x48] sm:$0xff] }
 0x37e   : > { %v6384_v5 = vpop.permute.xlu0 %6383 }
 0x37f   : > { %6422 = vst.msk [vmem:[#allocation3 + $0x80] sm:$0xff] %vm6405_vm5, %v6384_v5  ;;  %v7226_v5 = vrot.slane %v8154_v53, 6 }
 0x380   : > { %5867 = vrot.lane.b32.xlu1 %v13637_v60, %s8238_s18  ;;  %6927 = vrot.lane.b32.xlu0 %v13662_v63, %s8250_s15 }
 0x381   : > { %v7227_v62 = vsel %vm12779_vm15, %v7225_v56, %v7226_v5 }
 0x382   : > { %v6518_v41 = vpop.permute.xlu0 %6517 }
 0x383   : > { %6556 = vst.msk [vmem:[#allocation3 + $0x80] sm:$0xff] %vm6539_vm10, %v6518_v41 }
 0x384   : > { %6246 = vrot.lane.b32.xlu1 %v13638_v7, %s8243_s23 }
 0x386   : > { %v6633_v35 = vpop.permute.xlu0 %6632 }
 0x387   : > { %6671 = vst.msk [vmem:[#allocation3 + $0x80] sm:$0xff] %vm6654_vm11, %v6633_v35  ;;  %v7220_v35 = vsel %vm12779_vm15, %v7218_v1, %v7219_v4  ;;  %v7263_v4 = vrot.slane %v13683_v11, 6 }
 0x388   : > { %6361 = vrot.lane.b32.xlu1 %v13665_v47, %s8241_s21  ;;  %v7233_v47 = vrot.slane %v13677_v49, 6  ;;  %v7323_v44 = vcombine.low %v7217_v16, %v7220_v35  ;;  %v7258_v16 = vrot.slane %v7256_v2, 4 }
 0x38a   : > { %v6850_v26 = vpop.permute.xlu1 %6849  ;;  %v6733_v59 = vpop.permute.xlu0 %6732 }
 0x38b   : > { %6889 = vst.msk [vmem:[#allocation3 + $0x78] sm:$0xff] %vm6873_vm13, %v6850_v26  ;;  %v8155_v26 = vld [vmem:[%s8346_s17 + $0x58] sm:$0xff] }
 0x38c   : > { %6771 = vst.msk [vmem:[#allocation3 + $0x80] sm:$0xff] %vm6754_vm12, %v6733_v59  ;;  %6495 = vrot.lane.b32.xlu1 %v13668_v54, %s8245_s8  ;;  %v7236_v59 = vrot.slane %v8155_v26, 6  ;;  %v7324_v54 = vcombine.low %v7224_v30, %v7227_v62  ;;  %v13684_v30 = vld [vmem:[#allocation18_spill] sm:$0xff]  ;;  %v8161_v62 = vld [vmem:[%s8346_s17 + $0x80] sm:$0xff]  ;;  %v8162_v26 = vld [vmem:[%s8346_s17 + $0x88] sm:$0xff]  ;;  %s269_s8 = sand.u32 1, %s8227_s25  }
 0x38d   : > { %v7776_v49 = vrot.slane %v8161_v62, 10  ;;  %s7613_s14 = scalar_lea.sflag [#allocation5], %s269_s8 }
 0x38e   : > { %v6950_v34 = vpop.permute.xlu1 %6949  ;;  %v6852_v13 = vpop.permute.xlu0 %6851 }
 0x38f   : > { %6989 = vst.msk [vmem:[#allocation3 + $0x78] sm:$0xff] %vm6973_vm14, %v6950_v34  ;;  %v7228_v34 = vrot.slane %v7226_v5, 4 }
 0x390   : > { %6890 = vst.msk [vmem:[#allocation3 + $0x80] sm:$0xff] %vm6873_vm13, %v6852_v13  ;;  %6610 = vrot.lane.b32.xlu1 %v13671_v48, %s8248_s19  ;;  %v13678_v13 = vld [vmem:[#allocation12_spill] sm:$0xff]  ;;  %v8156_v48 = vld [vmem:[%s8346_s17 + $0x50] sm:$0xff]  ;;  %s7690_s19 = sshll.u32 %s269_s8, 4 }
 0x391   : > { %v7229_v22 = vrot.slane %v13678_v13, 6 }
 0x392   : > { %v5892_v60 = vpop.permute.xlu1 %5891  ;;  %v6952_v14 = vpop.permute.xlu0 %6951 }
 0x393   : > { %5929 = vst.msk [vmem:[#allocation3 + $0x88] sm:$0xff] %vm5911_vm2, %v5892_v60  ;;  %v7773_v60 = vrot.slane %v8156_v48, 10  ;;  %v7264_v48 = vsel %vm12779_vm15, %v7776_v49, %v7263_v4 }
 0x394   : > { %6990 = vst.msk [vmem:[#allocation3 + $0x80] sm:$0xff] %vm6973_vm14, %v6952_v14  ;;  %6710 = vrot.lane.b32.xlu1 %v13672_v43, %s8249_s29  ;;  %v7235_v14 = vrot.slane %v7233_v47, 4  ;;  %v7238_v43 = vrot.slane %v7236_v59, 4  ;;  %s271_s29 = scalar_lea.vmem [#allocation4], %s7690_s19 }
 0x396   : > { %v6271_v7 = vpop.permute.xlu1 %6270  ;;  %v7007_v15 = vld [vmem:[#allocation3 + $0x78] sm:$0xff]  ;;  %v5858_v31 = vpop.permute.xlu0 %5857 }
 0x397   : > { %6308 = vst.msk [vmem:[#allocation3 + $0x88] sm:$0xff] %vm6290_vm3, %v6271_v7  ;;  %v7017_v12 = vpack.c.bf16 %v7007_v15, %v7006_v6  ;;  %v13679_v7 = vld [vmem:[#allocation15_spill] sm:$0xff] }
 0x398   : > { %5912 = vst.msk [vmem:[#allocation3] sm:$0xff] %vm5911_vm2, %v5858_v31  ;;  %6829 = vrot.lane.b32.xlu1 %v13673_v17, %s8251_s16  ;;  %v7239_v6 = vrot.slane %v13679_v7, 6  ;;  %v7230_v31 = vsel %vm12779_vm15, %v7228_v34, %v7229_v22  ;;  %v8163_v7 = vld [vmem:[%s8346_s17 + $0x98] sm:$0xff]  ;;  %s7627_s16 = sshll.u32 %s271_s29, 4  ;;  %s13243_s16 = int_to_ptr.vmem [resolvable:$true] %s7627_s16 }
 0x399   : > { %7936 = vmatmul.mubr.msk.bf16.gmra.mrb[16].mxu1 %vm7062_vm4, %v7017_v12  ;;  %v13680_v12 = vld [vmem:[#allocation14_spill] sm:$0xff]  ;;  %s8173_s20 = scalar_lea.vmem %s13243_s16, 256 }
 0x39a   : > { %v6386_v29 = vpop.permute.xlu1 %6385  ;;  %7939 = vmatprep.mubr.msk.bf16.mxu1 %vm8247_vm9, %v13436_v3  ;;  %v6237_v24 = vpop.permute.xlu0 %6236  ;;  %v7243_v17 = vrot.slane %v13680_v12, 6  ;;  %p8174_p11 = scmp.ne.s32.totalorder %s13243_s16, %s8173_s20 }
 0x39b   : > { %6423 = vst.msk [vmem:[#allocation3 + $0x88] sm:$0xff] %vm6405_vm5, %v6386_v29  ;;  %v7008_v50 = vld [vmem:[#allocation3 + $0x80] sm:$0xff] }
 0x39c   : > { %6291 = vst.msk [vmem:[#allocation3] sm:$0xff] %vm6290_vm3, %v6237_v24  ;;  %6929 = vrot.lane.b32.xlu1 %v13674_v36, %s8250_s15  ;;  %v7234_v24 = vsel %vm12779_vm15, %v7773_v60, %v7233_v47  ;;  %v7237_v36 = vsel %vm12779_vm15, %v7235_v14, %v7236_v59  ;;  %v7265_v47 = vrot.slane %v7263_v4, 4  ;;  %v7266_v59 = vrot.slane %v8162_v26, 6  ;;  %v13685_v14 = vld [vmem:[#allocation24_spill] sm:$0xff]  ;;  %s7798_s15 = sshll.u32 %s8314_s28, 8  ;;  %p8175_p12 = pnand %p8174_p11, %p8331_p5 }
 0x39d   : > { %s13241_s13 = scalar_lea.hbm %s13290_s7, %s7798_s15  ;;  %s8252_s28 = smov [#allocation4]  }
 0x39e   : > { %v6520_v58 = vpop.permute.xlu1 %6519  ;;  %v6352_v23 = vpop.permute.xlu0 %6351  ;;  %v7267_v60 = vsel %vm12779_vm15, %v7265_v47, %v7266_v59  ;;  %v8168_v47 = vld [vmem:[%s8346_s17 + $0xb8] sm:$0xff]  ;;  %p8176_p13 = pneg %p8175_p12 }
 0x39f   : > { %6557 = vst.msk [vmem:[#allocation3 + $0x88] sm:$0xff] %vm6539_vm10, %v6520_v58  ;;  %v7240_v58 = vsel %vm12779_vm15, %v7238_v43, %v7239_v6  ;;  %v7273_v43 = vrot.slane %v13685_v14, 6  ;;  %v7276_v6 = vrot.slane %v8163_v7, 6  ;;  %v7330_v12 = vcombine.low %v7264_v48, %v7267_v60  ;;  %v13692_v14 = vld [vmem:[#allocation17_spill] sm:$0xff] }
 0x3a0   : > { %6406 = vst.msk [vmem:[#allocation3] sm:$0xff] %vm6405_vm5, %v6352_v23  ;;  %v8157_v23 = vld [vmem:[%s8346_s17 + $0x68] sm:$0xff]  ;;  %v7296_v26 = vrot.slane %v8168_v47, 6 }
 0x3a2   : > { %v6635_v19 = vpop.permute.xlu1 %6634  ;;  %v6486_v9 = vpop.permute.xlu0 %6485  ;;  %v7298_v60 = vrot.slane %v7296_v26, 4 }
 0x3a3   : > { %6672 = vst.msk [vmem:[#allocation3 + $0x88] sm:$0xff] %vm6654_vm11, %v6635_v19  ;;  %v7246_v19 = vrot.slane %v8157_v23, 6 }
 0x3a4   : > { %6540 = vst.msk [vmem:[#allocation3] sm:$0xff] %vm6539_vm10, %v6486_v9 }
 0x3a6   : > { %v6735_v39 = vpop.permute.xlu1 %6734  ;;  %v6601_v45 = vpop.permute.xlu0 %6600 }
 0x3a7   : > { %6772 = vst.msk [vmem:[#allocation3 + $0x88] sm:$0xff] %vm6754_vm12, %v6735_v39  ;;  %v7325_v39 = vcombine.low %v7230_v31, %v7234_v24 }
 0x3a8   : > { %6655 = vst.msk [vmem:[#allocation3] sm:$0xff] %vm6654_vm11, %v6601_v45  ;;  %v7326_v45 = vcombine.low %v7237_v36, %v7240_v58  ;;  %v8164_v36 = vld [vmem:[%s8346_s17 + $0x90] sm:$0xff] }
 0x3a9   : > { %v7777_v58 = vrot.slane %v8164_v36, 10 }
 0x3aa   : > { %v6854_v18 = vpop.permute.xlu1 %6853  ;;  %v6701_v28 = vpop.permute.xlu0 %6700  ;;  %v7359_v55 = vpack.c.bf16 %v7326_v45, %v7325_v39  ;;  %v13687_v39 = vld [vmem:[#allocation28_spill] sm:$0xff] }
 0x3ab   : > { %6891 = vst.msk [vmem:[#allocation3 + $0x88] sm:$0xff] %vm6873_vm13, %v6854_v18  ;;  %v8158_v18 = vld [vmem:[%s8346_s17 + $0x60] sm:$0xff]  ;;  %v7279_v45 = vrot.slane %v13687_v39, 6 }
 0x3ac   : > { %6755 = vst.msk [vmem:[#allocation3] sm:$0xff] %vm6754_vm12, %v6701_v28  ;;  %v7774_v28 = vrot.slane %v8158_v18, 10 }
 0x3ae   : > { %v6954_v25 = vpop.permute.xlu1 %6953  ;;  %v6820_v52 = vpop.permute.xlu0 %6819 }
 0x3af   : > { %6991 = vst.msk [vmem:[#allocation3 + $0x88] sm:$0xff] %vm6973_vm14, %v6954_v25  ;;  %v7245_v25 = vrot.slane %v7243_v17, 4 }
 0x3b0   : > { %6874 = vst.msk [vmem:[#allocation3] sm:$0xff] %vm6873_vm13, %v6820_v52 }
 0x3b2   : > { %v5860_v0 = vpop.permute.xlu1 %5859  ;;  %v6920_v46 = vpop.permute.xlu0 %6919 }
 0x3b3   : > { %5913 = vst.msk [vmem:[#allocation3 + $0x8] sm:$0xff] %vm5911_vm2, %v5860_v0  ;;  %v7248_v0 = vrot.slane %v7246_v19, 4 }
 0x3b4   : > { %6974 = vst.msk [vmem:[#allocation3] sm:$0xff] %vm6973_vm14, %v6920_v46  ;;  %v13681_v46 = vld [vmem:[#allocation19_spill] sm:$0xff] }
 0x3b6   : > { %v6239_v42 = vpop.permute.xlu1 %6238  ;;  %v7009_v37 = vld [vmem:[#allocation3 + $0x88] sm:$0xff]  ;;  %v5862_v61 = vpop.permute.xlu0 %5861 }
 0x3b7   : > { %6292 = vst.msk [vmem:[#allocation3 + $0x8] sm:$0xff] %vm6290_vm3, %v6239_v42  ;;  %v7018_v38 = vpack.c.bf16 %v7009_v37, %v7008_v50  ;;  %v7249_v42 = vrot.slane %v13681_v46, 6  ;;  %v8159_v50 = vld [vmem:[%s8346_s17 + $0x70] sm:$0xff] }
 0x3b8   : > { %5914 = vst.msk [vmem:[#allocation3 + $0x10] sm:$0xff] %vm5911_vm2, %v5862_v61  ;;  %v7775_v37 = vrot.slane %v8159_v50, 10  ;;  %v7244_v61 = vsel %vm12779_vm15, %v7774_v28, %v7243_v17  ;;  %v7268_v17 = vrot.slane %v7266_v59, 4  ;;  %v13688_v50 = vld [vmem:[#allocation29_spill] sm:$0xff] }
 0x3b9   : > { %7940 = vmatmul.mubr.msk.bf16.gmra.mrb[20].mxu1 %vm7062_vm4, %v7018_v38  ;;  %v7247_v38 = vsel %vm12779_vm15, %v7245_v25, %v7246_v19  ;;  %v7275_v19 = vrot.slane %v7273_v43, 4  ;;  %v13691_v59 = vld [vmem:[#allocation25_spill] sm:$0xff] }
 0x3ba   : > { %v6354_v21 = vpop.permute.xlu1 %6353  ;;  %7945 = vmatprep.mubr.msk.bf16.mxu1 %vm8247_vm9, %v13436_v3  ;;  %v6241_v63 = vpop.permute.xlu0 %6240  ;;  %v7254_v1 = vsel %vm12779_vm15, %v7775_v37, %v7253_v40  ;;  %v7327_v53 = vcombine.low %v7244_v61, %v7247_v38  ;;  %v7283_v37 = vrot.slane %v13688_v50, 6  ;;  %v8166_v38 = vld [vmem:[%s8346_s17 + $0xa0] sm:$0xff] }
 0x3bb   : > { %6407 = vst.msk [vmem:[#allocation3 + $0x8] sm:$0xff] %vm6405_vm5, %v6354_v21  ;;  %v7250_v21 = vsel %vm12779_vm15, %v7248_v0, %v7249_v42  ;;  %v6992_v22 = vld [vmem:[#allocation3] sm:$0xff]  ;;  %v7277_v46 = vsel %vm12779_vm15, %v7275_v19, %v7276_v6  ;;  %v7778_v8 = vrot.slane %v8166_v38, 10  ;;  %v8171_v19 = vld [vmem:[%s8346_s17 + $0xd8] sm:$0xff] }
 0x3bc   : > { %6293 = vst.msk [vmem:[#allocation3 + $0x10] sm:$0xff] %vm6290_vm3, %v6241_v63  ;;  %v7328_v5 = vcombine.low %v7250_v21, %v7254_v1  ;;  %v7255_v63 = vrot.slane %v7253_v40, 4  ;;  %v7286_v40 = vrot.slane %v8165_v10, 6  ;;  %v13689_v21 = vld [vmem:[#allocation39_spill] sm:$0xff]  ;;  %v7285_v4 = vrot.slane %v7283_v37, 4 }
 0x3bd   : > { %v7293_v1 = vrot.slane %v13689_v21, 6  ;;  %v13695_v10 = vld [vmem:[#allocation35_spill] sm:$0xff] }
 0x3be   : > { %v6488_v41 = vpop.permute.xlu1 %6487  ;;  %v6356_v57 = vpop.permute.xlu0 %6355  ;;  %v7287_v62 = vsel %vm12779_vm15, %v7285_v4, %v7286_v40 }
 0x3bf   : > { %6541 = vst.msk [vmem:[#allocation3 + $0x8] sm:$0xff] %vm6539_vm10, %v6488_v41  ;;  %v7259_v41 = vrot.slane %v13684_v30, 6  ;;  %v7284_v30 = vsel %vm12779_vm15, %v7778_v8, %v7283_v37 }
 0x3c0   : > { %6408 = vst.msk [vmem:[#allocation3 + $0x10] sm:$0xff] %vm6405_vm5, %v6356_v57 }
 0x3c1   : > { %7946 = vmatmul.mubr.msk.bf16.vlgmr.msra.gmra.mrb[24].mxu1 %vm1241_vm7, %v12819_v20  ;;  %v7358_v20 = vpack.c.bf16 %v7324_v54, %v7323_v44  ;;  %v7360_v44 = vpack.c.bf16 %v7328_v5, %v7327_v53  ;;  %v7257_v54 = vsel %vm12779_vm15, %v7255_v63, %v7256_v2  ;;  %v7260_v34 = vsel %vm12779_vm15, %v7258_v16, %v7259_v41  ;;  %v8167_v2 = vld [vmem:[%s8346_s17 + $0xb0] sm:$0xff]  ;;  %v13690_v53 = vld [vmem:[#allocation32_spill] sm:$0xff] }
 0x3c2   : > { %v6603_v32 = vpop.permute.xlu1 %6602  ;;  %7949 = vmatprep.mubr.msk.bf16.mxu1 %vm8247_vm9, %v13436_v3  ;;  %v6490_v15 = vpop.permute.xlu0 %6489  ;;  %v7329_v31 = vcombine.low %v7257_v54, %v7260_v34  ;;  %v7289_v5 = vrot.slane %v13690_v53, 6  ;;  %v7333_v54 = vcombine.low %v7284_v30, %v7287_v62 }
 0x3c3   : > { %6656 = vst.msk [vmem:[#allocation3 + $0x8] sm:$0xff] %vm6654_vm11, %v6603_v32 }
 0x3c4   : > { %6542 = vst.msk [vmem:[#allocation3 + $0x10] sm:$0xff] %vm6539_vm10, %v6490_v15  ;;  %v7361_v28 = vpack.c.bf16 %v7330_v12, %v7329_v31 }
 0x3c6   : > { %v6703_v29 = vpop.permute.xlu1 %6702  ;;  %v6605_v9 = vpop.permute.xlu0 %6604 }
 0x3c7   : > { %6756 = vst.msk [vmem:[#allocation3 + $0x8] sm:$0xff] %vm6754_vm12, %v6703_v29  ;;  %v13686_v29 = vld [vmem:[#allocation23_spill] sm:$0xff] }
 0x3c8   : > { %6657 = vst.msk [vmem:[#allocation3 + $0x10] sm:$0xff] %vm6654_vm11, %v6605_v9  ;;  %v7269_v24 = vrot.slane %v13686_v29, 6  ;;  %v7278_v9 = vrot.slane %v7276_v6, 4  ;;  %v8170_v6 = vld [vmem:[%s8346_s17 + $0xc8] sm:$0xff] }
 0x3c9   : > { %7950 = vmatmul.mubr.msk.bf16.gmra.mrb[28].mxu1 %vm1241_vm7, %v7358_v20 }
 0x3ca   : > { %v6822_v52 = vpop.permute.xlu1 %6821  ;;  %7953 = vmatprep.mubr.msk.bf16.mxu1 %vm8247_vm9, %v13436_v3  ;;  %v6705_v33 = vpop.permute.xlu0 %6704  ;;  %v7270_v25 = vsel %vm12779_vm15, %v7268_v17, %v7269_v24  ;;  %v7280_v42 = vsel %vm12779_vm15, %v7278_v9, %v7279_v45  ;;  %v7316_v9 = vrot.slane %v8171_v19, 6 }
 0x3cb   : > { %6875 = vst.msk [vmem:[#allocation3 + $0x8] sm:$0xff] %vm6873_vm13, %v6822_v52  ;;  %v7274_v52 = vsel %vm12779_vm15, %v7777_v58, %v7273_v43  ;;  %v7332_v61 = vcombine.low %v7277_v46, %v7280_v42  ;;  %v7299_v43 = vrot.slane %v13692_v14, 6  ;;  %v13693_v58 = vld [vmem:[#allocation21_spill] sm:$0xff]  ;;  %v8172_v46 = vld [vmem:[%s8346_s17 + $0xd0] sm:$0xff] }
 0x3cc   : > { %6757 = vst.msk [vmem:[#allocation3 + $0x10] sm:$0xff] %vm6754_vm12, %v6705_v33  ;;  %v7781_v42 = vrot.slane %v8172_v46, 10  ;;  %v7318_v37 = vrot.slane %v7316_v9, 4 }
 0x3cd   : > { %v7300_v24 = vsel %vm12779_vm15, %v7298_v60, %v7299_v43  ;;  %v13172_v60 = vld [vmem:[%s13287_s4] ss:$0 sm:$0xff] }
 0x3ce   : > { %v6922_v27 = vpop.permute.xlu1 %6921  ;;  %v6824_v56 = vpop.permute.xlu0 %6823 }
 0x3cf   : > { %6975 = vst.msk [vmem:[#allocation3 + $0x8] sm:$0xff] %vm6973_vm14, %v6922_v27  ;;  %v7779_v27 = vrot.slane %v8167_v2, 10 }
 0x3d0   : > { %6876 = vst.msk [vmem:[#allocation3 + $0x10] sm:$0xff] %vm6873_vm13, %v6824_v56  ;;  %v7288_v56 = vrot.slane %v7286_v40, 4  ;;  %v7319_v40 = vrot.slane %v13695_v10, 6 }
 0x3d1   : > { %7954 = vmatmul.mubr.msk.bf16.gmra.mrb[32].mxu1 %vm1241_vm7, %v7359_v55  ;;  %v7331_v55 = vcombine.low %v7270_v25, %v7274_v52  ;;  %v7294_v41 = vsel %vm12779_vm15, %v7779_v27, %v7293_v1  ;;  %v13694_v25 = vld [vmem:[#allocation20_spill] sm:$0xff] }
 0x3d2   : > { %v5864_v35 = vpop.permute.xlu1 %5863  ;;  %7957 = vmatprep.mubr.msk.bf16.mxu1 %vm8247_vm9, %v13436_v3  ;;  %v6924_v57 = vpop.permute.xlu0 %6923  ;;  %v7290_v49 = vsel %vm12779_vm15, %v7288_v56, %v7289_v5  ;;  %v7309_v52 = vrot.slane %v13694_v25, 6 }
 0x3d3   : > { %5915 = vst.msk [vmem:[#allocation3 + $0x18] sm:$0xff] %vm5911_vm2, %v5864_v35  ;;  %v7362_v16 = vpack.c.bf16 %v7332_v61, %v7331_v55  ;;  %v7334_v34 = vcombine.low %v7290_v49, %v7294_v41 }
 0x3d4   : > { %6976 = vst.msk [vmem:[#allocation3 + $0x10] sm:$0xff] %vm6973_vm14, %v6924_v57  ;;  %v7303_v57 = vrot.slane %v13691_v59, 6 }
 0x3d5   : > { %v7363_v31 = vpack.c.bf16 %v7334_v34, %v7333_v54 }
 0x3d6   : > { %v6243_v13 = vpop.permute.xlu1 %6242  ;;  %v6993_v32 = vld [vmem:[#allocation3 + $0x8] sm:$0xff]  ;;  %v5866_v15 = vpop.permute.xlu0 %5865  ;;  %v7305_v7 = vrot.slane %v7303_v57, 4 }
 0x3d7   : > { %6294 = vst.msk [vmem:[#allocation3 + $0x18] sm:$0xff] %vm6290_vm3, %v6243_v13  ;;  %v7010_v20 = vpack.c.bf16 %v6993_v32, %v6992_v22  ;;  %v7295_v13 = vrot.slane %v7293_v1, 4  ;;  %v8169_v22 = vld [vmem:[%s8346_s17 + $0xc0] sm:$0xff]  ;;  %v7320_v1 = vsel %vm12779_vm15, %v7318_v37, %v7319_v40  ;;  %s8177_s17 = sshll.u32 %s8252_s28, 4  ;;  %s8178_s17 = int_to_ptr.vmem [resolvable:$false] %s8177_s17 }
 0x3d8   : > { %5916 = vst.msk [vmem:[#allocation3 + $0x20] sm:$0xff] %vm5911_vm2, %v5866_v15  ;;  %v7780_v32 = vrot.slane %v8169_v22, 10  ;;  %v7306_v15 = vrot.slane %v8170_v6, 6  ;;  %s8179_s18 = scalar_lea.vmem %s8178_s17, 512  ;;  %p8180_p0 = scmp.lt.s32.totalorder %s13243_s16, %s8178_s17 }
 0x3d9   : > { %7908 = vmatmul.mubr.msk.bf16.vlgmr.msra.gmra.mrb[52].mxu0 %vm7062_vm4, %v7010_v20  ;;  %7958 = vmatmul.mubr.msk.bf16.gmra.mrb[0].mxu1 %vm1241_vm7, %v7360_v44  ;;  %v7297_v12 = vsel %vm12779_vm15, %v7295_v13, %v7296_v26  ;;  %p8181_p1 = scmp.lt.s32.totalorder %s8179_s18, %s8173_s20 }
 0x3da   : > { %v6358_v23 = vpop.permute.xlu1 %6357  ;;  %7961 = vmatprep.mubr.msk.bf16.mxu1 %vm8247_vm9, %v13436_v3  ;;  %7911 = vmatprep.mubr.msk.bf16.mxu0 %vm8247_vm9, %v13436_v3  ;;  %v6245_v18 = vpop.permute.xlu0 %6244  ;;  %v7304_v17 = vsel %vm12779_vm15, %v7780_v32, %v7303_v57  ;;  %v7307_v36 = vsel %vm12779_vm15, %v7305_v7, %v7306_v15  ;;  %v7335_v45 = vcombine.low %v7297_v12, %v7300_v24 }
 0x3db   : > { %6409 = vst.msk [vmem:[#allocation3 + $0x18] sm:$0xff] %vm6405_vm5, %v6358_v23  ;;  %v7313_v23 = vrot.slane %v13693_v58, 6  ;;  %v6994_v38 = vld [vmem:[#allocation3 + $0x10] sm:$0xff]  ;;  %p8182_p2 = por %p8181_p1, %p8180_p0 }
 0x3dc   : > { %6295 = vst.msk [vmem:[#allocation3 + $0x20] sm:$0xff] %vm6290_vm3, %v6245_v18  ;;  %v7336_v18 = vcombine.low %v7304_v17, %v7307_v36 }
 0x3dd   : > { %v7315_v50 = vrot.slane %v7313_v23, 4  ;;  %v7314_v27 = vsel %vm12779_vm15, %v7781_v42, %v7313_v23  ;;  %p8183_p3 = pnand %p8182_p2, %p8176_p13 }
 0x3de   : > { %v6492_v0 = vpop.permute.xlu1 %6491  ;;  %v6360_v33 = vpop.permute.xlu0 %6359  ;;  %v7364_v55 = vpack.c.bf16 %v7336_v18, %v7335_v45 }
 0x3df   : > { %6543 = vst.msk [vmem:[#allocation3 + $0x18] sm:$0xff] %vm6539_vm10, %v6492_v0  ;;  %v7317_v21 = vsel %vm12779_vm15, %v7315_v50, %v7316_v9 }
 0x3e0   : > { %6410 = vst.msk [vmem:[#allocation3 + $0x20] sm:$0xff] %vm6405_vm5, %v6360_v33  ;;  %v7338_v56 = vcombine.low %v7317_v21, %v7320_v1 }
 0x3e1   : > { %7962 = vmatmul.mubr.msk.bf16.gmra.mrb[4].mxu1 %vm1241_vm7, %v7361_v28  ;;  %v7308_v28 = vrot.slane %v7306_v15, 4 }
 0x3e2   : > { %v6607_v11 = vpop.permute.xlu1 %6606  ;;  %7965 = vmatprep.mubr.msk.bf16.mxu1 %vm8247_vm9, %v13436_v3  ;;  %v6494_v63 = vpop.permute.xlu0 %6493 }
 0x3e3   : > { %6658 = vst.msk [vmem:[#allocation3 + $0x18] sm:$0xff] %vm6654_vm11, %v6607_v11  ;;  %v7310_v2 = vsel %vm12779_vm15, %v7308_v28, %v7309_v52 }
 0x3e4   : > { %6544 = vst.msk [vmem:[#allocation3 + $0x20] sm:$0xff] %vm6539_vm10, %v6494_v63  ;;  %v7337_v4 = vcombine.low %v7310_v2, %v7314_v27 }
 0x3e6   : > { %v6707_v35 = vpop.permute.xlu1 %6706  ;;  %v6609_v44 = vpop.permute.xlu0 %6608  ;;  %v7365_v51 = vpack.c.bf16 %v7338_v56, %v7337_v4 }
 0x3e7   : > { %6758 = vst.msk [vmem:[#allocation3 + $0x18] sm:$0xff] %vm6754_vm12, %v6707_v35 }
 0x3e8   : > { %6659 = vst.msk [vmem:[#allocation3 + $0x20] sm:$0xff] %vm6654_vm11, %v6609_v44 }
 0x3e9   : > { %7966 = vmatmul.mubr.msk.bf16.gmra.mrb[8].mxu1 %vm1241_vm7, %v7362_v16 }
 0x3ea   : > { %v6826_v48 = vpop.permute.xlu1 %6825  ;;  %7969 = vmatprep.mubr.msk.bf16.mxu1 %vm8247_vm9, %v13436_v3  ;;  %v6709_v20 = vpop.permute.xlu0 %6708 }
 0x3eb   : > { %6877 = vst.msk [vmem:[#allocation3 + $0x18] sm:$0xff] %vm6873_vm13, %v6826_v48 }
 0x3ec   : > { %6759 = vst.msk [vmem:[#allocation3 + $0x20] sm:$0xff] %vm6754_vm12, %v6709_v20  ;;  %v13180_v20 = vld [vmem:[%s13289_s6] ss:$0 sm:$0xff] }
 0x3ed   : > { %v13199_v37 = vadd.f32 %v13180_v20, %v13172_v60 }
 0x3ee   : > { %v6926_v29 = vpop.permute.xlu1 %6925  ;;  %v6828_v39 = vpop.permute.xlu0 %6827 }
 0x3ef   : > { %6977 = vst.msk [vmem:[#allocation3 + $0x18] sm:$0xff] %vm6973_vm14, %v6926_v29 }
 0x3f0   : > { %6878 = vst.msk [vmem:[#allocation3 + $0x20] sm:$0xff] %vm6873_vm13, %v6828_v39 }
 0x3f1   : > { %7970 = vmatmul.mubr.msk.bf16.gmra.mrb[12].mxu1 %vm1241_vm7, %v7363_v31 }
 0x3f2   : > { %v5868_v0 = vpop.permute.xlu1 %5867  ;;  %7973 = vmatprep.mubr.msk.bf16.mxu1 %vm8247_vm9, %v13436_v3  ;;  %v6928_v33 = vpop.permute.xlu0 %6927 }
 0x3f3   : > { %5917 = vst.msk [vmem:[#allocation3 + $0x28] sm:$0xff] %vm5911_vm2, %v5868_v0 }
 0x3f4   : > { %6978 = vst.msk [vmem:[#allocation3 + $0x20] sm:$0xff] %vm6973_vm14, %v6928_v33 }
 0x3f6   : > { %v6247_v61 = vpop.permute.xlu1 %6246  ;;  %v6995_v8 = vld [vmem:[#allocation3 + $0x18] sm:$0xff] }
 0x3f7   : > { %6296 = vst.msk [vmem:[#allocation3 + $0x28] sm:$0xff] %vm6290_vm3, %v6247_v61  ;;  %v7011_v11 = vpack.c.bf16 %v6995_v8, %v6994_v38 }
 0x3f9   : > { %7912 = vmatmul.mubr.msk.bf16.gmra.mrb[56].mxu0 %vm7062_vm4, %v7011_v11  ;;  %7974 = vmatmul.mubr.msk.bf16.gmra.mrb[16].mxu1 %vm1241_vm7, %v7364_v55 }
 0x3fa   : > { %v6362_v53 = vpop.permute.xlu1 %6361  ;;  %7977 = vmatprep.mubr.msk.bf16.mxu1 %vm8247_vm9, %v13436_v3  ;;  %7915 = vmatprep.mubr.msk.bf16.mxu0 %vm8247_vm9, %v13436_v3 }
 0x3fb   : > { %6411 = vst.msk [vmem:[#allocation3 + $0x28] sm:$0xff] %vm6405_vm5, %v6362_v53  ;;  %v6996_v3 = vld [vmem:[#allocation3 + $0x20] sm:$0xff] }
 0x3fe   : > { %v6496_v5 = vpop.permute.xlu1 %6495 }
 0x3ff   : > { %6545 = vst.msk [vmem:[#allocation3 + $0x28] sm:$0xff] %vm6539_vm10, %v6496_v5 }
 0x401   : > { %7978 = vmatmul.mubr.msk.bf16.gmra.mrb[20].mxu1 %vm1241_vm7, %v7365_v51  ;;  %vm7610_vm7 = vcmask 130048  }
 0x402   : > { %v6611_v63 = vpop.permute.xlu1 %6610 }
 0x403   : > { %6660 = vst.msk [vmem:[#allocation3 + $0x28] sm:$0xff] %vm6654_vm11, %v6611_v63 }
 0x406   : > { %v6711_v16 = vpop.permute.xlu1 %6710 }
 0x407   : > { %6760 = vst.msk [vmem:[#allocation3 + $0x28] sm:$0xff] %vm6754_vm12, %v6711_v16 }
 0x40a   : > { %v6830_v30 = vpop.permute.xlu1 %6829 }
 0x40b   : > { %6879 = vst.msk [vmem:[#allocation3 + $0x28] sm:$0xff] %vm6873_vm13, %v6830_v30 }
 0x40e   : > { %v6930_v41 = vpop.permute.xlu1 %6929 }
 0x40f   : > { %6979 = vst.msk [vmem:[#allocation3 + $0x28] sm:$0xff] %vm6973_vm14, %v6930_v41 }
 0x416   : > { %v6997_v35 = vld [vmem:[#allocation3 + $0x28] sm:$0xff] }
 0x417   : > { %v7012_v62 = vpack.c.bf16 %v6997_v35, %v6996_v3 }
 0x419   : > { %7916 = vmatmul.mubr.msk.bf16.gmra.mrb[60].mxu0 %vm7062_vm4, %v7012_v62 }
 0x494   : > { %v7438_v49 = vpop.f32.mrb[24].mxu1 }
 0x495   : > { %v7947_v47 = vpop.f32.mrb[25].mxu1 }
 0x496   : > { %v7441_v26 = vpop.f32.mrb[26].mxu1 }
 0x497   : > { %v7948_v59 = vpop.f32.mrb[27].mxu1 }
 0x49c   : > { %v7446_v57 = vpop.f32.mrb[28].mxu1 }
 0x49d   : > { %v7951_v44 = vpop.f32.mrb[29].mxu1 }
 0x49e   : > { %v7449_v54 = vpop.f32.mrb[30].mxu1 }
 0x49f   : > { %v7952_v34 = vpop.f32.mrb[31].mxu1 }
 0x4a4   : > { %v13165_v13 = vpop.f32.mrb[32].mxu1 }
 0x4a5   : > { %v7955_v22 = vpop.f32.mrb[33].mxu1 }
 0x4a6   : > { %v13167_v32 = vpop.f32.mrb[34].mxu1 }
 0x4a7   : > { %v7956_v48 = vpop.f32.mrb[35].mxu1 }
 0x4ac   : > { %v7128_v14 = vpop.f32.mrb[52].mxu0  ;;  %v13174_v43 = vpop.f32.mrb[0].mxu1 }
 0x4ad   : > { %v7129_v7 = vadd.f32 %v13172_v60, %v7128_v14  ;;  %v7909_v6 = vpop.f32.mrb[53].mxu0  ;;  %v7959_v15 = vpop.f32.mrb[1].mxu1 }
 0x4ae   : > { %v7131_v31 = vpop.f32.mrb[54].mxu0  ;;  %v13182_v12 = vpop.f32.mrb[2].mxu1 }
 0x4af   : > { %v7992_v17 = vadd.f32 %v13180_v20, %v7129_v7  ;;  %v7132_v29 = vadd.f32 %v13172_v60, %v7131_v31  ;;  %v7910_v24 = vpop.f32.mrb[55].mxu0  ;;  %v7960_v36 = vpop.f32.mrb[3].mxu1 }
 0x4b0   : > { %v8010_v24 = vadd.f32 %v13199_v37, %v13174_v43 }
 0x4b1   : > { %v7995_v58 = vadd.f32 %v13180_v20, %v7132_v29  ;;  %v7993_v23 = vadd.f32 %v7992_v17, %v7438_v49 }
 0x4b3   : > { %v7527_v19 = vmax.f32 %v7993_v23, 0.0  ;;  %v7996_v9 = vadd.f32 %v7995_v58, %v7441_v26  ;;  %v7533_v58 = vmax.f32 %v8010_v24, 0.0  ;;  %v8012_v23 = vadd.f32 %v13199_v37, %v13182_v12 }
 0x4b4   : > { %v13187_v39 = vpop.f32.mrb[4].mxu1 }
 0x4b5   : > { %v7963_v45 = vpop.f32.mrb[5].mxu1  ;;  %7545 = vxpose.xlu0.b32.start [1/16] (narrow) %v7527_v19, 8  ;;  %v7528_v25 = vmax.f32 %v7996_v9, 0.0 }
 0x4b6   : > { %v13189_v18 = vpop.f32.mrb[6].mxu1 }
 0x4b7   : > { %v7964_v28 = vpop.f32.mrb[7].mxu1 }
 0x4b9   : > { %7546 = vxpose.xlu0.b32.cont [2/16] (narrow) %v7528_v25, 8 }
 0x4bc   : > { %v13191_v52 = vpop.f32.mrb[8].mxu1 }
 0x4bd   : > { %v7967_v0 = vpop.f32.mrb[9].mxu1  ;;  %v8018_v43 = vadd.f32 %v13199_v37, %v13191_v52 }
 0x4be   : > { %v13193_v46 = vpop.f32.mrb[10].mxu1 }
 0x4bf   : > { %v7968_v42 = vpop.f32.mrb[11].mxu1  ;;  %v7537_v9 = vmax.f32 %v8018_v43, 0.0  ;;  %v8020_v12 = vadd.f32 %v13199_v37, %v13193_v46 }
 0x4c1   : > { %v7538_v45 = vmax.f32 %v8020_v12, 0.0 }
 0x4c4   : > { %v13195_v50 = vpop.f32.mrb[12].mxu1 }
 0x4c5   : > { %v7971_v10 = vpop.f32.mrb[13].mxu1 }
 0x4c6   : > { %v7489_v40 = vpop.f32.mrb[14].mxu1 }
 0x4c7   : > { %v13202_v33 = vadd.f32 %v13199_v37, %v7489_v40  ;;  %v7972_v55 = vpop.f32.mrb[15].mxu1 }
 0x4cc   : > { %v7136_v61 = vpop.f32.mrb[56].mxu0  ;;  %v7494_v38 = vpop.f32.mrb[16].mxu1 }
 0x4cd   : > { %v7137_v8 = vadd.f32 %v13172_v60, %v7136_v61  ;;  %v13206_v2 = vadd.f32 %v13199_v37, %v7494_v38  ;;  %v7913_v27 = vpop.f32.mrb[57].mxu0  ;;  %v7975_v21 = vpop.f32.mrb[17].mxu1 }
 0x4ce   : > { %v7139_v1 = vpop.f32.mrb[58].mxu0  ;;  %v7497_v11 = vpop.f32.mrb[18].mxu1 }
 0x4cf   : > { %v7998_v4 = vadd.f32 %v13180_v20, %v7137_v8  ;;  %v7140_v56 = vadd.f32 %v13172_v60, %v7139_v1  ;;  %v8028_v53 = vadd.f32 %v13199_v37, %v7497_v11  ;;  %v7914_v51 = vpop.f32.mrb[59].mxu0  ;;  %v7976_v5 = vpop.f32.mrb[19].mxu1  ;;  %v7541_v25 = vmax.f32 %v13206_v2, 0.0 }
 0x4d1   : > { %v8001_v63 = vadd.f32 %v13180_v20, %v7140_v56  ;;  %v7999_v16 = vadd.f32 %v7998_v4, %v7446_v57  ;;  %v7542_v52 = vmax.f32 %v8028_v53, 0.0 }
 0x4d3   : > { %v7529_v30 = vmax.f32 %v7999_v16, 0.0  ;;  %v8002_v41 = vadd.f32 %v8001_v63, %v7449_v54 }
 0x4d4   : > { %v7502_v3 = vpop.f32.mrb[20].mxu1 }
 0x4d5   : > { %v8030_v35 = vadd.f32 %v13199_v37, %v7502_v3  ;;  %v7979_v62 = vpop.f32.mrb[21].mxu1  ;;  %7547 = vxpose.xlu0.b32.cont [3/16] (narrow) %v7529_v30, 8  ;;  %v7530_v44 = vmax.f32 %v8002_v41, 0.0 }
 0x4d6   : > { %v7505_v49 = vpop.f32.mrb[22].mxu1 }
 0x4d7   : > { %v7543_v47 = vmax.f32 %v8030_v35, 0.0  ;;  %v8032_v26 = vadd.f32 %v13199_v37, %v7505_v49  ;;  %v7980_v59 = vpop.f32.mrb[23].mxu1 }
 0x4d9   : > { %7577 = vxpose.xlu1.b32.start [1/2] (short) (narrow) %v7543_v47, 8  ;;  %7548 = vxpose.xlu0.b32.cont [4/16] (narrow) %v7530_v44, 8  ;;  %v7544_v34 = vmax.f32 %v8032_v26, 0.0 }
 0x4dd   : > { %7578 = vxpose.xlu1.b32.end [2/2] (short) (narrow) %v7544_v34, 8 }
 0x4ec   : > { %v7144_v22 = vpop.f32.mrb[60].mxu0 }
 0x4ed   : > { %v7145_v57 = vadd.f32 %v13172_v60, %v7144_v22  ;;  %v7917_v48 = vpop.f32.mrb[61].mxu0 }
 0x4ee   : > { %v7147_v54 = vpop.f32.mrb[62].mxu0 }
 0x4ef   : > { %v8004_v14 = vadd.f32 %v13180_v20, %v7145_v57  ;;  %v7148_v7 = vadd.f32 %v13172_v60, %v7147_v54  ;;  %v7918_v6 = vpop.f32.mrb[63].mxu0  ;;  %v7534_v60 = vmax.f32 %v8012_v23, 0.0 }
 0x4f1   : > { %v8007_v15 = vadd.f32 %v13180_v20, %v7148_v7  ;;  %v8005_v31 = vadd.f32 %v8004_v14, %v13165_v13  ;;  %v8014_v20 = vadd.f32 %v13199_v37, %v13187_v39  ;;  %v8022_v39 = vadd.f32 %v13199_v37, %v13195_v50 }
 0x4f3   : > { %v7531_v17 = vmax.f32 %v8005_v31, 0.0  ;;  %v8008_v29 = vadd.f32 %v8007_v15, %v13167_v32  ;;  %v7535_v13 = vmax.f32 %v8014_v20, 0.0  ;;  %v8016_v32 = vadd.f32 %v13199_v37, %v13189_v18 }
 0x4f4   : > { %v7539_v28 = vmax.f32 %v8022_v39, 0.0  ;;  %v7540_v18 = vmax.f32 %v13202_v33, 0.0 }
 0x4f5   : > { %7549 = vxpose.xlu0.b32.cont [5/16] (narrow) %v7531_v17, 8  ;;  %v7532_v36 = vmax.f32 %v8008_v29, 0.0  ;;  %v7536_v19 = vmax.f32 %v8016_v32, 0.0 }
 0x4f9   : > { %7550 = vxpose.xlu0.b32.cont [6/16] (narrow) %v7532_v36, 8 }
 0x4fd   : > { %7551 = vxpose.xlu0.b32.cont [7/16] (narrow) %v7533_v58, 8 }
 0x501   : > { %7552 = vxpose.xlu0.b32.cont [8/16] (narrow) %v7534_v60, 8 }
 0x505   : > { %7553 = vxpose.xlu0.b32.cont [9/16] (narrow) %v7535_v13, 8 }
 0x509   : > { %7554 = vxpose.xlu0.b32.cont [10/16] (narrow) %v7536_v19, 8 }
 0x50d   : > { %7555 = vxpose.xlu0.b32.cont [11/16] (narrow) %v7537_v9, 8 }
 0x511   : > { %7556 = vxpose.xlu0.b32.cont [12/16] (narrow) %v7538_v45, 8 }
 0x515   : > { %7557 = vxpose.xlu0.b32.cont [13/16] (narrow) %v7539_v28, 8 }
 0x519   : > { %7558 = vxpose.xlu0.b32.cont [14/16] (narrow) %v7540_v18, 8 }
 0x51d   : > { %7559 = vxpose.xlu0.b32.cont [15/16] (narrow) %v7541_v25, 8 }
 0x521   : > { %7560 = vxpose.xlu0.b32.end [16/16] (narrow) %v7542_v52, 8 }
 0x559   : > { %v7593_v0 = vpop.trf.xlu1 }
 0x55a   : > { %7611 = vst.msk [vmem:[%s271_s29 + $0x8] sm:$0xff] %vm7610_vm7, %v7593_v0 }
 0x565   : > { %v7561_v46 = vpop.trf.xlu0 }
 0x566   : > { %7609 = vst [vmem:[%s271_s29] sm:$0xff] %v7561_v46 }
 0x567   : > { %8186 = shalt.err (!%p8183_p3)
}
 0x568   : > { %s8187_s21 = scalar_lea.hbm %s13241_s13, 256  ;;  %s8191_s19 = scalar_lea.hbm %s13290_s7, 512 }
 0x569   : > { %p8188_p4 = scmp.ne.s32.totalorder %s13241_s13, %s8187_s21  ;;  %p8192_p9 = scmp.lt.u32.totalorder %s13241_s13, %s13290_s7 }
 0x56a   : > { %p8193_p10 = scmp.lt.u32.totalorder %s8191_s19, %s8187_s21  ;;  %p8195_p12 = scmp.lt.u32.totalorder %s8187_s21, %s13241_s13 }
 0x56b   : > { %p8189_p7 = pnand %p8188_p4, %p8331_p5 }
 0x56c   : > { %p8194_p11 = por %p8193_p10, %p8192_p9 }
 0x56d   : > { %p8190_p8 = pneg %p8189_p7 }
 0x56e   : > { %p8196_p13 = por %p8195_p12, %p8194_p11 }
 0x570   : > { %p8197_p0 = pnand %p8196_p13, %p8190_p8 }
 0x572   : > { %8200 = shalt.err (!%p8197_p0)
}
 0x573   : > { %8057 = dma.vmem_to_hbm [thread:$0]  (%p8331_p5), %s13243_s16, 256, %s13241_s13, %s7613_s14  }
 0x574 PF: > { %p8063_p1 = scmp.ge.s32.totalorder %s8235_s27, 2  ;;  %s7639_s22 = sand.u32 1, %s8223_s24  }
 0x575   : > { %s7640_s9 = scalar_lea.sflag [#allocation5], %s7639_s22 }
 0x576   : > { %p8060_p2 = pnand %p8063_p1, %p8335_p6 }
 0x578   : > { %8218 = dma.done.wait (!%p8060_p2), %s7640_s9, 256  }
 0x579   : > { %8220 = vsyncadd (!%p8060_p2), %s7640_s9, 4294967040  ;;  %p17_p3 = scmp.ge.s32.totalorder %s8318_s30, 4   ;;  %s13696_s24 = smov %s8227_s25 }
 0x57a   : > { %s13697_s25 = smov %s8231_s26  ;;  %s13698_s26 = smov %s8329_s10 }
 0x57b   : > { %s13699_s27 = smov %s8318_s30  ;;  %19 = sbr.rel (!%p17_p3) target bundleno = 3 (0x3), region = 83 }
 0x582   :  { %7645 = vsyncpa [#allocation5], 1 }
 0x583   :  { %7647 = vsyncpa [#allocation5 + $0x1], 1 }

</bundles_post_ra>
